<compile_context>
chip_gen: v7x
topology: tpu7x:2x2x1
jax: 0.10.0
libtpu: 0.0.40
codegen_flags: <defaults>
</compile_context>

<pallas_src>
import functools

import jax
import jax.numpy as jnp
from jax.experimental import pallas as pl
from jax.experimental.pallas import tpu as pltpu

LATENT_DIM = 128
IMG = 16                                   # small stand-in for 224x224 invoices
FEAT = 64 * (IMG // 4) * (IMG // 4)        # 64*56*56 at production scale
SWIN_DIM = 768
PATCH = 4
PATCH_EMBED = 96

_VMEM_SOFT_BUDGET = 24 * 1024 * 1024       # below the default scoped VMEM limit everywhere
_VMEM_HARD_LIMIT = 56 * 1024 * 1024        # < v7x's 64 MiB physical VMEM


# --------------------------------------------------------------------------------------
# Helpers
# --------------------------------------------------------------------------------------

def _bf16(x):
    return x if x.dtype == jnp.bfloat16 else x.astype(jnp.bfloat16)


def _pick_tile(dim, pref, align):
    """Largest `align`-aligned tile <= pref that divides dim; otherwise the full dim.
    The full-dim fallback is guarded by the VMEM estimate fed to _mosaic_params."""
    if dim <= pref:
        return dim
    t = (pref // align) * align
    while t >= align:
        if dim % t == 0:
            return t
        t -= align
    return dim


def _mosaic_params(semantics, est_vmem_bytes=0, allow_input_fusion=None):
    vmem = None
    if est_vmem_bytes > _VMEM_SOFT_BUDGET:
        vmem = min(int(est_vmem_bytes) + (8 << 20), _VMEM_HARD_LIMIT)
    return pltpu.CompilerParams(dimension_semantics=semantics,
                                vmem_limit_bytes=vmem,
                                allow_input_fusion=allow_input_fusion)


# --------------------------------------------------------------------------------------
# Generic tiled matmul + bias + activation (bf16 MXU inputs, f32 accumulator)
# --------------------------------------------------------------------------------------

def _mm_kernel(x_ref, w_ref, b_ref, o_ref, acc_ref, *, activation):
    k = pl.program_id(2)

    @pl.when(k == 0)
    def _():
        acc_ref[...] = jnp.zeros_like(acc_ref)

    acc_ref[...] += jnp.dot(x_ref[...], w_ref[...], preferred_element_type=jnp.float32)

    @pl.when(k == pl.num_programs(2) - 1)
    def _():
        acc = acc_ref[...] + b_ref[...]
        if activation == "relu":
            acc = jnp.maximum(acc, 0.0)
        elif activation == "sigmoid":
            acc = jax.nn.sigmoid(acc)
        o_ref[...] = acc.astype(o_ref.dtype)


def matmul_bias_act(x, w, b, activation="none", out_dtype=jnp.bfloat16,
                    tm=256, tn=2048, tk=2048, fuse_input=False):
    """x:[M,K] @ w:[K,N] + b:[N] with fused activation.  K innermost ('arbitrary') with a
    persistent f32 accumulator; M/N 'parallel' (megacore).  fuse_input=True lets XLA fuse the
    producer of x (e.g. an im2col pad/stack/reshape chain) into the pallas_call input DMA."""
    M, K = x.shape
    _, N = w.shape
    bm = _pick_tile(M, tm, 16)      # 16-aligned: bf16 sublane packing
    bn = _pick_tile(N, tn, 128)
    bk = _pick_tile(K, tk, 128)
    wsteps = (N // bn) * (K // bk)  # steps over which the weight operand is streamed
    if wsteps >= 3:
        w_spec = pl.BlockSpec((bk, bn), lambda i, j, k: (k, j),
                              pipeline_mode=pl.Buffered(3))
        wbuf = 3
    else:
        w_spec = pl.BlockSpec((bk, bn), lambda i, j, k: (k, j))
        wbuf = 2
    est = (2 * bm * bk * 2 + wbuf * bk * bn * 2 + 2 * bn * 4
           + 2 * bm * bn * jnp.dtype(out_dtype).itemsize + bm * bn * 4)
    fusion = [True, False, False] if fuse_input else None
    return pl.pallas_call(
        functools.partial(_mm_kernel, activation=activation),
        out_shape=jax.ShapeDtypeStruct((M, N), out_dtype),
        grid=(M // bm, N // bn, K // bk),
        in_specs=[pl.BlockSpec((bm, bk), lambda i, j, k: (i, k)),
                  w_spec,
                  pl.BlockSpec((1, bn), lambda i, j, k: (0, j))],
        out_specs=pl.BlockSpec((bm, bn), lambda i, j, k: (i, j)),
        scratch_shapes=[pltpu.VMEM((bm, bn), jnp.float32)],
        compiler_params=_mosaic_params(("parallel", "parallel", "arbitrary"), est, fusion),
    )(_bf16(x), _bf16(w), b.reshape(1, N).astype(jnp.float32))


# --------------------------------------------------------------------------------------
# Fused fc_mu | fc_logvar  (weight streaming with a parallel axis over the two halves)
# --------------------------------------------------------------------------------------

def _mulv_kernel(h_ref, w_ref, b_ref, o_ref, acc_ref):
    k = pl.program_id(1)

    @pl.when(k == 0)
    def _():
        acc_ref[...] = jnp.zeros_like(acc_ref)

    acc_ref[...] += jnp.dot(h_ref[...], w_ref[...], preferred_element_type=jnp.float32)

    @pl.when(k == pl.num_programs(1) - 1)
    def _():
        o_ref[...] = acc_ref[...] + b_ref[...]


def mu_logvar(h_flat, w, b, latent=LATENT_DIM, tk=8192):
    """[B, FEAT] @ [FEAT, 2*latent].  Pure weight streaming at M=B, so K tiles are large
    (amortize per-step overhead) and the grid's leading 'parallel' axis splits the mu / logvar
    128-lane halves across v7x's two TensorCores."""
    B, K = h_flat.shape
    N = w.shape[1]                            # 2 * latent
    bk = _pick_tile(K, tk, 128)
    ksteps = K // bk
    if ksteps >= 3:
        w_spec = pl.BlockSpec((bk, latent), lambda n, k: (k, n),
                              pipeline_mode=pl.Buffered(3))
        wbuf = 3
    else:
        w_spec = pl.BlockSpec((bk, latent), lambda n, k: (k, n))
        wbuf = 2
    est = 2 * B * bk * 2 + wbuf * bk * latent * 2 + 2 * latent * 4 + 3 * B * latent * 4
    return pl.pallas_call(
        _mulv_kernel,
        out_shape=jax.ShapeDtypeStruct((B, N), jnp.float32),
        grid=(2, ksteps),
        in_specs=[pl.BlockSpec((B, bk), lambda n, k: (0, k)),
                  w_spec,
                  pl.BlockSpec((1, latent), lambda n, k: (0, n))],
        out_specs=pl.BlockSpec((B, latent), lambda n, k: (0, n)),
        scratch_shapes=[pltpu.VMEM((B, latent), jnp.float32)],
        compiler_params=_mosaic_params(("parallel", "arbitrary"), est),
    )(_bf16(h_flat), _bf16(w), b.reshape(1, N).astype(jnp.float32))


# --------------------------------------------------------------------------------------
# decoder_fc with the reparameterization fused into its prologue
# --------------------------------------------------------------------------------------

def _decfc_kernel(mulv_ref, eps_ref, w_ref, b_ref, o_ref, *, latent):
    mulv = mulv_ref[...]
    z = mulv[:, :latent] + eps_ref[...] * jnp.exp(0.5 * mulv[:, latent:])     # reparam
    y = jnp.dot(z.astype(jnp.bfloat16), w_ref[...],
                preferred_element_type=jnp.float32) + b_ref[...]
    o_ref[...] = y.astype(o_ref.dtype)


def decoder_fc_reparam(mulv, eps, w, b, latent=LATENT_DIM, tn=4096):
    """z = mu + eps*exp(0.5*logvar) followed by z @ decoder_fc, as one kernel.  The weight is
    streamed over N (FEAT) with large lane-dense tiles; K = latent fits in a single block so
    no accumulator is needed and the tiny reparam recompute per N tile is free."""
    B = mulv.shape[0]
    K, N = w.shape                            # K == latent
    bn = _pick_tile(N, tn, 128)
    nsteps = N // bn
    if nsteps >= 3:
        w_spec = pl.BlockSpec((K, bn), lambda n: (0, n), pipeline_mode=pl.Buffered(3))
        wbuf = 3
    else:
        w_spec = pl.BlockSpec((K, bn), lambda n: (0, n))
        wbuf = 2
    est = 2 * B * 2 * latent * 4 + 2 * B * latent * 4 + wbuf * K * bn * 2 \
        + 2 * bn * 4 + 2 * B * bn * 2
    return pl.pallas_call(
        functools.partial(_decfc_kernel, latent=latent),
        out_shape=jax.ShapeDtypeStruct((B, N), jnp.bfloat16),
        grid=(nsteps,),
        in_specs=[pl.BlockSpec((B, 2 * latent), lambda n: (0, 0)),
                  pl.BlockSpec((B, latent), lambda n: (0, 0)),
                  w_spec,
                  pl.BlockSpec((1, bn), lambda n: (0, n))],
        out_specs=pl.BlockSpec((B, bn), lambda n: (0, n)),
        compiler_params=_mosaic_params(("parallel",), est),
    )(mulv.astype(jnp.float32), eps.astype(jnp.float32), _bf16(w),
      b.reshape(1, N).astype(jnp.float32))


# --------------------------------------------------------------------------------------
# Conv / ConvTranspose glue (data movement; compute goes through the Pallas matmul)
# --------------------------------------------------------------------------------------

def conv_w2d(w_oihw):
    # Conv2d weight (Cout, Cin, kh, kw) -> [kh*kw*Cin, Cout], rows in (kh, kw, cin) order.
    return jnp.transpose(w_oihw, (2, 3, 1, 0)).reshape(-1, w_oihw.shape[0])


def im2col(x, k, stride, pad):
    # TODO(synk): gathering the k*k taps inside the matmul kernel via the BlockSpec index_map
    # (overlapping windows) would avoid even the fused producer; for now the pad/stack/reshape
    # chain is handed to XLA and allow_input_fusion folds it into the pallas_call input DMA.
    B, H, W, C = x.shape
    xp = jnp.pad(x, ((0, 0), (pad, pad), (pad, pad), (0, 0)))
    Ho = (H + 2 * pad - k) // stride + 1
    Wo = (W + 2 * pad - k) // stride + 1
    taps = [xp[:, i:i + stride * Ho:stride, j:j + stride * Wo:stride, :]
            for i in range(k) for j in range(k)]
    col = jnp.stack(taps, axis=-2)                          # [B, Ho, Wo, k*k, C]
    return col.reshape(B * Ho * Wo, k * k * C), Ho, Wo


def conv2d(x_nhwc, w2d, b, k, stride, pad, activation):
    B = x_nhwc.shape[0]
    col, Ho, Wo = im2col(x_nhwc, k, stride, pad)
    y = matmul_bias_act(col, w2d, b, activation, fuse_input=True)
    return y.reshape(B, Ho, Wo, w2d.shape[1])


_KMAP = {0: (3, 1), 1: (2, 0)}   # output parity r -> 4x4-kernel index for window tap t (dy=r+t)


def subpixel_weights_dense(w_iohw):
    """ConvTranspose2d weight (Cin, Cout, 4, 4), stride=2, padding=1  ->  one block-structured
    dense weight [9*Cin, 4*Cout] over a 3x3 stride-1 input window; output columns ordered
    (ry, rx, cout) so all four output parities come out of a single lane-dense matmul."""
    Cin, Cout = w_iohw.shape[0], w_iohw.shape[1]
    wd = jnp.zeros((3, 3, Cin, 2, 2, Cout), w_iohw.dtype)
    for ry in (0, 1):
        for rx in (0, 1):
            for ty in (0, 1):
                for tx in (0, 1):
                    ky, kx = _KMAP[ry][ty], _KMAP[rx][tx]
                    wd = wd.at[ry + ty, rx + tx, :, ry, rx, :].set(w_iohw[:, :, ky, kx])
    return wd.reshape(9 * Cin, 4 * Cout)


def conv_transpose2d_subpixel(x_nhwc, w_dense, b, activation, out_dtype=jnp.bfloat16,
                              interleave=True):
    """Exact sub-pixel decomposition of ConvTranspose2d(k=4, s=2, p=1): one stride-1 3x3-window
    matmul whose N = 4*Cout carries the 2x2 output parities (lane-dense N=128 for dec1), so no
    zero-dilated rows reach the MXU and no batched G=4 grid is needed.  interleave=False keeps
    the (b, iy, ix, ry, rx, c) parity-major layout for the consumer to read through the same
    index order instead of a depth-to-space relayout."""
    # TODO(synk): dec1's depth-to-space could also stay parity-major by folding the parity
    # offsets into dec2's 3x3 tap gather; kept explicit here for clarity.
    B, H, W, Cin = x_nhwc.shape
    Cout = w_dense.shape[1] // 4
    xp = jnp.pad(x_nhwc, ((0, 0), (1, 1), (1, 1), (0, 0)))
    taps = [xp[:, dy:dy + H, dx:dx + W, :] for dy in range(3) for dx in range(3)]
    col = jnp.stack(taps, axis=-2).reshape(B * H * W, 9 * Cin)
    y = matmul_bias_act(col, w_dense, jnp.tile(b, 4), activation,
                        out_dtype=out_dtype, fuse_input=True)
    y = y.reshape(B, H, W, 2, 2, Cout)
    if interleave:
        y = jnp.transpose(y, (0, 1, 3, 2, 4, 5)).reshape(B, 2 * H, 2 * W, Cout)
    return y


# --------------------------------------------------------------------------------------
# Fused Swin-surrogate + recon-error + classifier head (one kernel, grid=(1,))
# --------------------------------------------------------------------------------------

def _swin_classifier_kernel(recon_ref, x_ref, pooled_ref, pw_ref, pb_ref, hw_ref, hb_ref,
                            werr_ref, wfeat_ref, b1_ref, w2_ref, b2_ref, o_ref):
    # recon and x arrive in the SAME parity-major flatten -> exact element correspondence
    # for the MSE, independent of channel count.
    d = recon_ref[...].astype(jnp.float32) - x_ref[...].astype(jnp.float32)
    err = jnp.mean(d * d, axis=-1, keepdims=True)                              # [B, 1]
    # Swin-surrogate: patch-embed of the pooled patch vector + 768-d head.
    emb = jnp.dot(pooled_ref[...].astype(jnp.bfloat16), pw_ref[...],
                  preferred_element_type=jnp.float32) + pb_ref[...]            # [B, 96]
    feats = jnp.dot(emb.astype(jnp.bfloat16), hw_ref[...],
                    preferred_element_type=jnp.float32) + hb_ref[...]          # [B, 768]
    # classifier: concat([err, feats]) @ fc1 (split into err-row + feature-block) -> relu.
    h = jnp.dot(feats.astype(jnp.bfloat16), wfeat_ref[...],
                preferred_element_type=jnp.float32)
    h = h + err * werr_ref[...].astype(jnp.float32) + b1_ref[...]
    h = jnp.maximum(h, 0.0)
    logits = jnp.dot(h.astype(jnp.bfloat16), w2_ref[...],
                     preferred_element_type=jnp.float32) + b2_ref[...]
    o_ref[...] = jax.nn.sigmoid(logits)


def swin_classifier(recon_flat, x_flat, pooled, p):
    # TODO(synk): pretrained torchvision swin_t (windowed attention, patch merging,
    # IMAGENET1K_V1 weights) has no in-script equivalent; the surrogate is a 4x4 patch-embed
    # conv + global mean pool + linear head to 768-d.  The pool commutes with the linear patch
    # embed, so only the [B, 16*C] pooled patch vector enters the kernel.
    B, D = recon_flat.shape
    full = lambda shape: pl.BlockSpec(shape, lambda i: tuple(0 for _ in shape))
    return pl.pallas_call(
        _swin_classifier_kernel,
        out_shape=jax.ShapeDtypeStruct((B, 1), jnp.float32),
        grid=(1,),
        in_specs=[full((B, D)), full((B, D)), full(pooled.shape),
                  full(p["patch_w"].shape), full((1, PATCH_EMBED)),
                  full(p["head_w"].shape), full((1, SWIN_DIM)),
                  full((1, 256)), full((SWIN_DIM, 256)), full((1, 256)),
                  full((256, 1)), full((1, 1))],
        out_specs=full((B, 1)),
        compiler_params=_mosaic_params(("arbitrary",)),
    )(recon_flat, x_flat, pooled,
      p["patch_w"], p["patch_b"].reshape(1, -1),
      p["head_w"], p["head_b"].reshape(1, -1),
      p["fc1_werr"], p["fc1_wfeat"], p["fc1_b"].reshape(1, -1),
      p["fc2_w"], p["fc2_b"].reshape(1, -1))


# --------------------------------------------------------------------------------------
# Model
# --------------------------------------------------------------------------------------

def init_params(key):
    ks = jax.random.split(key, 12)
    s = 0.05
    n = lambda k, shape: (s * jax.random.normal(k, shape)).astype(jnp.float32)
    z = lambda shape: jnp.zeros(shape, jnp.float32)
    bf = lambda a: a.astype(jnp.bfloat16)
    # NB: fc_mu / fc_logvar / decoder_fc weights are stored directly in the NHWC-flatten layout
    # (torch's (C,H,W)->(H,W,C) flatten permutation is folded into the weights once at init),
    # so no activation transposes remain in the forward pass.
    return {
        # VAE encoder (Conv2d weights pre-reshaped to [k*k*Cin, Cout], bf16)
        "enc1_w": bf(conv_w2d(n(ks[0], (32, 1, 4, 4)))), "enc1_b": z((32,)),
        "enc2_w": bf(conv_w2d(n(ks[1], (64, 32, 4, 4)))), "enc2_b": z((64,)),
        # fc_mu and fc_logvar fused into one [FEAT, 2*LATENT] weight
        "mulv_w": bf(n(ks[2], (FEAT, 2 * LATENT_DIM))), "mulv_b": z((2 * LATENT_DIM,)),
        "dec_fc_w": bf(n(ks[3], (LATENT_DIM, FEAT))), "dec_fc_b": z((FEAT,)),
        # ConvTranspose2d weights (Cin, Cout, 4, 4) -> dense sub-pixel form once at init
        "dec1_w": bf(subpixel_weights_dense(n(ks[4], (64, 32, 4, 4)))), "dec1_b": z((32,)),
        "dec2_w": bf(subpixel_weights_dense(n(ks[5], (32, 1, 4, 4)))), "dec2_b": z((1,)),
        # Swin-surrogate branch
        "patch_w": bf(conv_w2d(n(ks[6], (PATCH_EMBED, 1, PATCH, PATCH)))),
        "patch_b": z((PATCH_EMBED,)),
        "head_w": bf(n(ks[7], (PATCH_EMBED, SWIN_DIM))), "head_b": z((SWIN_DIM,)),
        # classifier over [recon_err(1), swin(768)] (769-d, per forward()); fc1 is split into
        # the err row + feature block so no [B,769] concat / K-padding is needed.
        "fc1_werr": bf(n(ks[8], (1, 256))),
        "fc1_wfeat": bf(n(ks[9], (SWIN_DIM, 256))), "fc1_b": z((256,)),
        "fc2_w": bf(n(ks[10], (256, 1))), "fc2_b": z((1,)),
    }


def invoice_forgery_forward(x_nchw, p, eps):
    B, C, H, W = x_nchw.shape
    x_nhwc = jnp.transpose(x_nchw, (0, 2, 3, 1))                        # NHWC, f32
    x_bf = x_nhwc.astype(jnp.bfloat16)

    # ---- VAE encoder ----
    h = conv2d(x_bf, p["enc1_w"], p["enc1_b"], 4, 2, 1, "relu")         # [B, H/2, W/2, 32]
    h = conv2d(h, p["enc2_w"], p["enc2_b"], 4, 2, 1, "relu")            # [B, H/4, W/4, 64]
    h_flat = h.reshape(B, -1)                                           # NHWC flatten

    # ---- fused fc_mu | fc_logvar (parallel over the mu / logvar halves) ----
    mulv = mu_logvar(h_flat, p["mulv_w"], p["mulv_b"])                  # [B, 2*latent] f32

    # ---- decoder_fc with the reparameterization fused into its prologue ----
    d = decoder_fc_reparam(mulv, eps, p["dec_fc_w"], p["dec_fc_b"])     # [B, FEAT] bf16
    d = d.reshape(B, H // 4, W // 4, 64)                                # NHWC (weights pre-permuted)

    # ---- sub-pixel ConvTranspose decoder ----
    d = conv_transpose2d_subpixel(d, p["dec1_w"], p["dec1_b"], "relu",
                                  interleave=True)                      # [B, H/2, W/2, 32]
    recon = conv_transpose2d_subpixel(d, p["dec2_w"], p["dec2_b"], "sigmoid",
                                      out_dtype=jnp.float32,
                                      interleave=False)                 # [B, H/2, W/2, 2, 2, 1]

    # ---- Swin-surrogate pooled patch vector (global mean pool commutes with patch embed) ----
    pooled = x_nhwc.reshape(B, H // PATCH, PATCH, W // PATCH, PATCH, C) \
                   .mean(axis=(1, 3)).reshape(B, PATCH * PATCH * C)     # [B, 16*C]

    # ---- x in recon's parity-major layout: exact elementwise MSE, no recon relayout ----
    x_pm = x_nhwc.reshape(B, H // 2, 2, W // 2, 2, C) \
                 .transpose(0, 1, 3, 2, 4, 5).reshape(B, -1)

    # ---- fused swin-surrogate + recon-error + fc1 + fc2 + sigmoid ----
    return swin_classifier(recon.reshape(B, -1), x_pm, pooled, p)


# --------------------------------------------------------------------------------------

if __name__ == "__main__":
    key = jax.random.PRNGKey(0)
    kx, keps, kp = jax.random.split(key, 3)
    x = jax.random.uniform(kx, (2, 1, IMG, IMG), dtype=jnp.float32)      # [B, C=1, H, W]
    eps = jax.random.normal(keps, (2, LATENT_DIM), dtype=jnp.float32)    # reparam noise
    params = init_params(kp)

    out = jax.jit(invoice_forgery_forward)(x, params, eps)
    out = jax.block_until_ready(out)
    assert out.shape == (2, 1) and bool(jnp.all(jnp.isfinite(out)))
    print("KERNEL_OK")
</pallas_src>

<mosaic_0001>
module attributes {stable_mosaic.version = 11 : i64} {
  func.func @_mm_kernel(%arg0: i32, %arg1: i32, %arg2: i32, %arg3: memref<128x16xbf16, #tpu.memory_space<vmem>>, %arg4: memref<16x32xbf16, #tpu.memory_space<vmem>>, %arg5: memref<1x32xf32, #tpu.memory_space<vmem>>, %arg6: memref<128x32xbf16, #tpu.memory_space<vmem>>, %arg7: memref<128x32xf32, #tpu.memory_space<vmem>>) attributes {dimension_semantics = [#tpu.dimension_semantics<parallel>, #tpu.dimension_semantics<parallel>, #tpu.dimension_semantics<arbitrary>], iteration_bounds = array<i64: 1, 1, 1>, scalar_prefetch = 0 : i64, scratch_operands = 1 : i64, tpu.core_type = #tpu.core_type<tc>, window_params = [{transform_indices = @transform_0, window_bounds = array<i64: 128, 16>}, {transform_indices = @transform_1, window_bounds = array<i64: 16, 32>}, {transform_indices = @transform_2, window_bounds = array<i64: 1, 32>}, {transform_indices = @transform_3, window_bounds = array<i64: 128, 32>}]} {
    %c0_i32 = arith.constant 0 : i32
    %0 = arith.cmpi eq, %arg2, %c0_i32 : i32
    %1 = arith.extui %0 : i1 to i32
    %c0_i32_0 = arith.constant 0 : i32
    %2 = arith.cmpi ne, %1, %c0_i32_0 : i32
    scf.if %2 {
      %cst_10 = arith.constant 0.000000e+00 : f32
      %12 = vector.broadcast %cst_10 : f32 to vector<128x32xf32>
      %c0_11 = arith.constant 0 : index
      %c0_12 = arith.constant 0 : index
      %13 = vector.load %arg7[%c0_11, %c0_12] : memref<128x32xf32, #tpu.memory_space<vmem>>, vector<128x32xf32>
      tpu.vector_store %arg7[%c0_11, %c0_12], %12 {strides = array<i32>} : memref<128x32xf32, #tpu.memory_space<vmem>>, vector<128x32xf32>,
    } else {
    }
    %c0 = arith.constant 0 : index
    %c0_1 = arith.constant 0 : index
    %3 = vector.load %arg7[%c0, %c0_1] : memref<128x32xf32, #tpu.memory_space<vmem>>, vector<128x32xf32>
    %c0_2 = arith.constant 0 : index
    %c0_3 = arith.constant 0 : index
    %4 = vector.load %arg3[%c0_2, %c0_3] : memref<128x16xbf16, #tpu.memory_space<vmem>>, vector<128x16xbf16>
    %c0_4 = arith.constant 0 : index
    %c0_5 = arith.constant 0 : index
    %5 = vector.load %arg4[%c0_4, %c0_5] : memref<16x32xbf16, #tpu.memory_space<vmem>>, vector<16x32xbf16>
    %cst = arith.constant dense<0.000000e+00> : vector<128x32xf32>
    %6 = tpu.matmul %4, %5, %cst {dimension_numbers = #tpu.dot_dimension_numbers<[1], [0], [0], [1], [0, 0, 1, 1], [], []>} : vector<128x16xbf16>, vector<16x32xbf16>, vector<128x32xf32> -> vector<128x32xf32>
    %7 = arith.addf %3, %6 : vector<128x32xf32>
    %c0_6 = arith.constant 0 : index
    %c0_7 = arith.constant 0 : index
    %8 = vector.load %arg7[%c0_6, %c0_7] : memref<128x32xf32, #tpu.memory_space<vmem>>, vector<128x32xf32>
    tpu.vector_store %arg7[%c0_6, %c0_7], %7 {strides = array<i32>} : memref<128x32xf32, #tpu.memory_space<vmem>>, vector<128x32xf32>,
    %c0_i32_8 = arith.constant 0 : i32
    %9 = arith.cmpi eq, %arg2, %c0_i32_8 : i32
    %10 = arith.extui %9 : i1 to i32
    %c0_i32_9 = arith.constant 0 : i32
    %11 = arith.cmpi ne, %10, %c0_i32_9 : i32
    scf.if %11 {
      %c0_10 = arith.constant 0 : index
      %c0_11 = arith.constant 0 : index
      %12 = vector.load %arg7[%c0_10, %c0_11] : memref<128x32xf32, #tpu.memory_space<vmem>>, vector<128x32xf32>
      %c0_12 = arith.constant 0 : index
      %c0_13 = arith.constant 0 : index
      %13 = vector.load %arg5[%c0_12, %c0_13] : memref<1x32xf32, #tpu.memory_space<vmem>>, vector<1x32xf32>
      %14 = vector.broadcast %13 : vector<1x32xf32> to vector<128x32xf32>
      %15 = arith.addf %12, %14 : vector<128x32xf32>
      %cst_14 = arith.constant 0.000000e+00 : f32
      %16 = vector.broadcast %cst_14 : f32 to vector<128x32xf32>
      %17 = arith.maximumf %15, %16 : vector<128x32xf32>
      %18 = arith.truncf %17 : vector<128x32xf32> to vector<128x32xbf16>
      %c0_15 = arith.constant 0 : index
      %c0_16 = arith.constant 0 : index
      %19 = vector.load %arg6[%c0_15, %c0_16] : memref<128x32xbf16, #tpu.memory_space<vmem>>, vector<128x32xbf16>
      tpu.vector_store %arg6[%c0_15, %c0_16], %18 {strides = array<i32>} : memref<128x32xbf16, #tpu.memory_space<vmem>>, vector<128x32xbf16>,
    } else {
    }
    return
  }
  func.func @transform_0(%arg0: i32, %arg1: i32, %arg2: i32) -> (i32, i32) {
    %c0_i32 = arith.constant 0 : i32
    return %arg0, %arg2 : i32, i32
  }
  func.func @transform_1(%arg0: i32, %arg1: i32, %arg2: i32) -> (i32, i32) {
    %c0_i32 = arith.constant 0 : i32
    return %arg2, %arg1 : i32, i32
  }
  func.func @transform_2(%arg0: i32, %arg1: i32, %arg2: i32) -> (i32, i32) {
    %c0_i32 = arith.constant 0 : i32
    %c0_i32_0 = arith.constant 0 : i32
    return %c0_i32, %arg1 : i32, i32
  }
  func.func @transform_3(%arg0: i32, %arg1: i32, %arg2: i32) -> (i32, i32) {
    %c0_i32 = arith.constant 0 : i32
    return %arg0, %arg1 : i32, i32
  }
}

module attributes {stable_mosaic.version = 11 : i64} {
  func.func @_mm_kernel(%arg0: i32, %arg1: i32, %arg2: i32, %arg3: memref<32x512xbf16, #tpu.memory_space<vmem>>, %arg4: memref<512x64xbf16, #tpu.memory_space<vmem>>, %arg5: memref<1x64xf32, #tpu.memory_space<vmem>>, %arg6: memref<32x64xbf16, #tpu.memory_space<vmem>>, %arg7: memref<32x64xf32, #tpu.memory_space<vmem>>) attributes {dimension_semantics = [#tpu.dimension_semantics<parallel>, #tpu.dimension_semantics<parallel>, #tpu.dimension_semantics<arbitrary>], iteration_bounds = array<i64: 1, 1, 1>, scalar_prefetch = 0 : i64, scratch_operands = 1 : i64, tpu.core_type = #tpu.core_type<tc>, window_params = [{transform_indices = @transform_0, window_bounds = array<i64: 32, 512>}, {transform_indices = @transform_1, window_bounds = array<i64: 512, 64>}, {transform_indices = @transform_2, window_bounds = array<i64: 1, 64>}, {transform_indices = @transform_3, window_bounds = array<i64: 32, 64>}]} {
    %c0_i32 = arith.constant 0 : i32
    %0 = arith.cmpi eq, %arg2, %c0_i32 : i32
    %1 = arith.extui %0 : i1 to i32
    %c0_i32_0 = arith.constant 0 : i32
    %2 = arith.cmpi ne, %1, %c0_i32_0 : i32
    scf.if %2 {
      %cst_10 = arith.constant 0.000000e+00 : f32
      %12 = vector.broadcast %cst_10 : f32 to vector<32x64xf32>
      %c0_11 = arith.constant 0 : index
      %c0_12 = arith.constant 0 : index
      %13 = vector.load %arg7[%c0_11, %c0_12] : memref<32x64xf32, #tpu.memory_space<vmem>>, vector<32x64xf32>
      tpu.vector_store %arg7[%c0_11, %c0_12], %12 {strides = array<i32>} : memref<32x64xf32, #tpu.memory_space<vmem>>, vector<32x64xf32>,
    } else {
    }
    %c0 = arith.constant 0 : index
    %c0_1 = arith.constant 0 : index
    %3 = vector.load %arg7[%c0, %c0_1] : memref<32x64xf32, #tpu.memory_space<vmem>>, vector<32x64xf32>
    %c0_2 = arith.constant 0 : index
    %c0_3 = arith.constant 0 : index
    %4 = vector.load %arg3[%c0_2, %c0_3] : memref<32x512xbf16, #tpu.memory_space<vmem>>, vector<32x512xbf16>
    %c0_4 = arith.constant 0 : index
    %c0_5 = arith.constant 0 : index
    %5 = vector.load %arg4[%c0_4, %c0_5] : memref<512x64xbf16, #tpu.memory_space<vmem>>, vector<512x64xbf16>
    %cst = arith.constant dense<0.000000e+00> : vector<32x64xf32>
    %6 = tpu.matmul %4, %5, %cst {dimension_numbers = #tpu.dot_dimension_numbers<[1], [0], [0], [1], [0, 0, 1, 1], [], []>} : vector<32x512xbf16>, vector<512x64xbf16>, vector<32x64xf32> -> vector<32x64xf32>
    %7 = arith.addf %3, %6 : vector<32x64xf32>
    %c0_6 = arith.constant 0 : index
    %c0_7 = arith.constant 0 : index
    %8 = vector.load %arg7[%c0_6, %c0_7] : memref<32x64xf32, #tpu.memory_space<vmem>>, vector<32x64xf32>
    tpu.vector_store %arg7[%c0_6, %c0_7], %7 {strides = array<i32>} : memref<32x64xf32, #tpu.memory_space<vmem>>, vector<32x64xf32>,
    %c0_i32_8 = arith.constant 0 : i32
    %9 = arith.cmpi eq, %arg2, %c0_i32_8 : i32
    %10 = arith.extui %9 : i1 to i32
    %c0_i32_9 = arith.constant 0 : i32
    %11 = arith.cmpi ne, %10, %c0_i32_9 : i32
    scf.if %11 {
      %c0_10 = arith.constant 0 : index
      %c0_11 = arith.constant 0 : index
      %12 = vector.load %arg7[%c0_10, %c0_11] : memref<32x64xf32, #tpu.memory_space<vmem>>, vector<32x64xf32>
      %c0_12 = arith.constant 0 : index
      %c0_13 = arith.constant 0 : index
      %13 = vector.load %arg5[%c0_12, %c0_13] : memref<1x64xf32, #tpu.memory_space<vmem>>, vector<1x64xf32>
      %14 = vector.broadcast %13 : vector<1x64xf32> to vector<32x64xf32>
      %15 = arith.addf %12, %14 : vector<32x64xf32>
      %cst_14 = arith.constant 0.000000e+00 : f32
      %16 = vector.broadcast %cst_14 : f32 to vector<32x64xf32>
      %17 = arith.maximumf %15, %16 : vector<32x64xf32>
      %18 = arith.truncf %17 : vector<32x64xf32> to vector<32x64xbf16>
      %c0_15 = arith.constant 0 : index
      %c0_16 = arith.constant 0 : index
      %19 = vector.load %arg6[%c0_15, %c0_16] : memref<32x64xbf16, #tpu.memory_space<vmem>>, vector<32x64xbf16>
      tpu.vector_store %arg6[%c0_15, %c0_16], %18 {strides = array<i32>} : memref<32x64xbf16, #tpu.memory_space<vmem>>, vector<32x64xbf16>,
    } else {
    }
    return
  }
  func.func @transform_0(%arg0: i32, %arg1: i32, %arg2: i32) -> (i32, i32) {
    %c0_i32 = arith.constant 0 : i32
    return %arg0, %arg2 : i32, i32
  }
  func.func @transform_1(%arg0: i32, %arg1: i32, %arg2: i32) -> (i32, i32) {
    %c0_i32 = arith.constant 0 : i32
    return %arg2, %arg1 : i32, i32
  }
  func.func @transform_2(%arg0: i32, %arg1: i32, %arg2: i32) -> (i32, i32) {
    %c0_i32 = arith.constant 0 : i32
    %c0_i32_0 = arith.constant 0 : i32
    return %c0_i32, %arg1 : i32, i32
  }
  func.func @transform_3(%arg0: i32, %arg1: i32, %arg2: i32) -> (i32, i32) {
    %c0_i32 = arith.constant 0 : i32
    return %arg0, %arg1 : i32, i32
  }
}

module attributes {stable_mosaic.version = 11 : i64} {
  func.func @_decfc_kernel(%arg0: i32, %arg1: memref<2x256xf32, #tpu.memory_space<vmem>>, %arg2: memref<2x128xf32, #tpu.memory_space<vmem>>, %arg3: memref<128x1024xbf16, #tpu.memory_space<vmem>>, %arg4: memref<1x1024xf32, #tpu.memory_space<vmem>>, %arg5: memref<2x1024xbf16, #tpu.memory_space<vmem>>) attributes {dimension_semantics = [#tpu.dimension_semantics<parallel>], iteration_bounds = array<i64: 1>, scalar_prefetch = 0 : i64, scratch_operands = 0 : i64, tpu.core_type = #tpu.core_type<tc>, window_params = [{pipeline_mode = #tpu.pipeline_mode<synchronous>, transform_indices = @transform_0, window_bounds = array<i64: 2, 256>}, {pipeline_mode = #tpu.pipeline_mode<synchronous>, transform_indices = @transform_1, window_bounds = array<i64: 2, 128>}, {transform_indices = @transform_2, window_bounds = array<i64: 128, 1024>}, {transform_indices = @transform_3, window_bounds = array<i64: 1, 1024>}, {transform_indices = @transform_4, window_bounds = array<i64: 2, 1024>}]} {
    %c0 = arith.constant 0 : index
    %c0_0 = arith.constant 0 : index
    %0 = vector.load %arg1[%c0, %c0_0] : memref<2x256xf32, #tpu.memory_space<vmem>>, vector<2x256xf32>
    %1 = vector.extract_strided_slice %0 {offsets = [0, 0], sizes = [2, 128], strides = [1, 1]} : vector<2x256xf32> to vector<2x128xf32>
    %c0_1 = arith.constant 0 : index
    %c0_2 = arith.constant 0 : index
    %2 = vector.load %arg2[%c0_1, %c0_2] : memref<2x128xf32, #tpu.memory_space<vmem>>, vector<2x128xf32>
    %3 = vector.extract_strided_slice %0 {offsets = [0, 128], sizes = [2, 128], strides = [1, 1]} : vector<2x256xf32> to vector<2x128xf32>
    %cst = arith.constant 5.000000e-01 : f32
    %4 = vector.broadcast %cst : f32 to vector<2x128xf32>
    %5 = arith.mulf %4, %3 : vector<2x128xf32>
    %6 = math.exp %5 : vector<2x128xf32>
    %7 = arith.mulf %2, %6 : vector<2x128xf32>
    %8 = arith.addf %1, %7 : vector<2x128xf32>
    %9 = arith.truncf %8 : vector<2x128xf32> to vector<2x128xbf16>
    %c0_3 = arith.constant 0 : index
    %c0_4 = arith.constant 0 : index
    %10 = vector.load %arg3[%c0_3, %c0_4] : memref<128x1024xbf16, #tpu.memory_space<vmem>>, vector<128x1024xbf16>
    %cst_5 = arith.constant dense<0.000000e+00> : vector<2x1024xf32>
    %11 = tpu.matmul %9, %10, %cst_5 {dimension_numbers = #tpu.dot_dimension_numbers<[1], [0], [0], [1], [0, 0, 1, 1], [], []>} : vector<2x128xbf16>, vector<128x1024xbf16>, vector<2x1024xf32> -> vector<2x1024xf32>
    %c0_6 = arith.constant 0 : index
    %c0_7 = arith.constant 0 : index
    %12 = vector.load %arg4[%c0_6, %c0_7] : memref<1x1024xf32, #tpu.memory_space<vmem>>, vector<1x1024xf32>
    %13 = vector.broadcast %12 : vector<1x1024xf32> to vector<2x1024xf32>
    %14 = arith.addf %11, %13 : vector<2x1024xf32>
    %15 = arith.truncf %14 : vector<2x1024xf32> to vector<2x1024xbf16>
    %c0_8 = arith.constant 0 : index
    %c0_9 = arith.constant 0 : index
    %16 = vector.load %arg5[%c0_8, %c0_9] : memref<2x1024xbf16, #tpu.memory_space<vmem>>, vector<2x1024xbf16>
    tpu.vector_store %arg5[%c0_8, %c0_9], %15 {strides = array<i32>} : memref<2x1024xbf16, #tpu.memory_space<vmem>>, vector<2x1024xbf16>,
    return
  }
  func.func @transform_0(%arg0: i32) -> (i32, i32) {
    %c0_i32 = arith.constant 0 : i32
    %c0_i32_0 = arith.constant 0 : i32
    %c0_i32_1 = arith.constant 0 : i32
    return %c0_i32, %c0_i32_0 : i32, i32
  }
  func.func @transform_1(%arg0: i32) -> (i32, i32) {
    %c0_i32 = arith.constant 0 : i32
    %c0_i32_0 = arith.constant 0 : i32
    %c0_i32_1 = arith.constant 0 : i32
    return %c0_i32, %c0_i32_0 : i32, i32
  }
  func.func @transform_2(%arg0: i32) -> (i32, i32) {
    %c0_i32 = arith.constant 0 : i32
    %c0_i32_0 = arith.constant 0 : i32
    return %c0_i32, %arg0 : i32, i32
  }
  func.func @transform_3(%arg0: i32) -> (i32, i32) {
    %c0_i32 = arith.constant 0 : i32
    %c0_i32_0 = arith.constant 0 : i32
    return %c0_i32, %arg0 : i32, i32
  }
  func.func @transform_4(%arg0: i32) -> (i32, i32) {
    %c0_i32 = arith.constant 0 : i32
    %c0_i32_0 = arith.constant 0 : i32
    return %c0_i32, %arg0 : i32, i32
  }
}

module attributes {stable_mosaic.version = 11 : i64} {
  func.func @_mulv_kernel(%arg0: i32, %arg1: i32, %arg2: memref<2x1024xbf16, #tpu.memory_space<vmem>>, %arg3: memref<1024x128xbf16, #tpu.memory_space<vmem>>, %arg4: memref<1x128xf32, #tpu.memory_space<vmem>>, %arg5: memref<2x128xf32, #tpu.memory_space<vmem>>, %arg6: memref<2x128xf32, #tpu.memory_space<vmem>>) attributes {dimension_semantics = [#tpu.dimension_semantics<parallel>, #tpu.dimension_semantics<arbitrary>], iteration_bounds = array<i64: 2, 1>, scalar_prefetch = 0 : i64, scratch_operands = 1 : i64, tpu.core_type = #tpu.core_type<tc>, window_params = [{transform_indices = @transform_0, window_bounds = array<i64: 2, 1024>}, {transform_indices = @transform_1, window_bounds = array<i64: 1024, 128>}, {transform_indices = @transform_2, window_bounds = array<i64: 1, 128>}, {transform_indices = @transform_3, window_bounds = array<i64: 2, 128>}]} {
    %c0_i32 = arith.constant 0 : i32
    %0 = arith.cmpi eq, %arg1, %c0_i32 : i32
    %1 = arith.extui %0 : i1 to i32
    %c0_i32_0 = arith.constant 0 : i32
    %2 = arith.cmpi ne, %1, %c0_i32_0 : i32
    scf.if %2 {
      %cst_10 = arith.constant 0.000000e+00 : f32
      %12 = vector.broadcast %cst_10 : f32 to vector<2x128xf32>
      %c0_11 = arith.constant 0 : index
      %c0_12 = arith.constant 0 : index
      %13 = vector.load %arg6[%c0_11, %c0_12] : memref<2x128xf32, #tpu.memory_space<vmem>>, vector<2x128xf32>
      tpu.vector_store %arg6[%c0_11, %c0_12], %12 {strides = array<i32>} : memref<2x128xf32, #tpu.memory_space<vmem>>, vector<2x128xf32>,
    } else {
    }
    %c0 = arith.constant 0 : index
    %c0_1 = arith.constant 0 : index
    %3 = vector.load %arg6[%c0, %c0_1] : memref<2x128xf32, #tpu.memory_space<vmem>>, vector<2x128xf32>
    %c0_2 = arith.constant 0 : index
    %c0_3 = arith.constant 0 : index
    %4 = vector.load %arg2[%c0_2, %c0_3] : memref<2x1024xbf16, #tpu.memory_space<vmem>>, vector<2x1024xbf16>
    %c0_4 = arith.constant 0 : index
    %c0_5 = arith.constant 0 : index
    %5 = vector.load %arg3[%c0_4, %c0_5] : memref<1024x128xbf16, #tpu.memory_space<vmem>>, vector<1024x128xbf16>
    %cst = arith.constant dense<0.000000e+00> : vector<2x128xf32>
    %6 = tpu.matmul %4, %5, %cst {dimension_numbers = #tpu.dot_dimension_numbers<[1], [0], [0], [1], [0, 0, 1, 1], [], []>} : vector<2x1024xbf16>, vector<1024x128xbf16>, vector<2x128xf32> -> vector<2x128xf32>
    %7 = arith.addf %3, %6 : vector<2x128xf32>
    %c0_6 = arith.constant 0 : index
    %c0_7 = arith.constant 0 : index
    %8 = vector.load %arg6[%c0_6, %c0_7] : memref<2x128xf32, #tpu.memory_space<vmem>>, vector<2x128xf32>
    tpu.vector_store %arg6[%c0_6, %c0_7], %7 {strides = array<i32>} : memref<2x128xf32, #tpu.memory_space<vmem>>, vector<2x128xf32>,
    %c0_i32_8 = arith.constant 0 : i32
    %9 = arith.cmpi eq, %arg1, %c0_i32_8 : i32
    %10 = arith.extui %9 : i1 to i32
    %c0_i32_9 = arith.constant 0 : i32
    %11 = arith.cmpi ne, %10, %c0_i32_9 : i32
    scf.if %11 {
      %c0_10 = arith.constant 0 : index
      %c0_11 = arith.constant 0 : index
      %12 = vector.load %arg6[%c0_10, %c0_11] : memref<2x128xf32, #tpu.memory_space<vmem>>, vector<2x128xf32>
      %c0_12 = arith.constant 0 : index
      %c0_13 = arith.constant 0 : index
      %13 = vector.load %arg4[%c0_12, %c0_13] : memref<1x128xf32, #tpu.memory_space<vmem>>, vector<1x128xf32>
      %14 = vector.broadcast %13 : vector<1x128xf32> to vector<2x128xf32>
      %15 = arith.addf %12, %14 : vector<2x128xf32>
      %c0_14 = arith.constant 0 : index
      %c0_15 = arith.constant 0 : index
      %16 = vector.load %arg5[%c0_14, %c0_15] : memref<2x128xf32, #tpu.memory_space<vmem>>, vector<2x128xf32>
      tpu.vector_store %arg5[%c0_14, %c0_15], %15 {strides = array<i32>} : memref<2x128xf32, #tpu.memory_space<vmem>>, vector<2x128xf32>,
    } else {
    }
    return
  }
  func.func @transform_0(%arg0: i32, %arg1: i32) -> (i32, i32) {
    %c0_i32 = arith.constant 0 : i32
    %c0_i32_0 = arith.constant 0 : i32
    return %c0_i32, %arg1 : i32, i32
  }
  func.func @transform_1(%arg0: i32, %arg1: i32) -> (i32, i32) {
    %c0_i32 = arith.constant 0 : i32
    return %arg1, %arg0 : i32, i32
  }
  func.func @transform_2(%arg0: i32, %arg1: i32) -> (i32, i32) {
    %c0_i32 = arith.constant 0 : i32
    %c0_i32_0 = arith.constant 0 : i32
    return %c0_i32, %arg0 : i32, i32
  }
  func.func @transform_3(%arg0: i32, %arg1: i32) -> (i32, i32) {
    %c0_i32 = arith.constant 0 : i32
    %c0_i32_0 = arith.constant 0 : i32
    return %c0_i32, %arg0 : i32, i32
  }
}

module attributes {stable_mosaic.version = 11 : i64} {
  func.func @_mm_kernel(%arg0: i32, %arg1: i32, %arg2: i32, %arg3: memref<32x576xbf16, #tpu.memory_space<vmem>>, %arg4: memref<576x128xbf16, #tpu.memory_space<vmem>>, %arg5: memref<1x128xf32, #tpu.memory_space<vmem>>, %arg6: memref<32x128xbf16, #tpu.memory_space<vmem>>, %arg7: memref<32x128xf32, #tpu.memory_space<vmem>>) attributes {dimension_semantics = [#tpu.dimension_semantics<parallel>, #tpu.dimension_semantics<parallel>, #tpu.dimension_semantics<arbitrary>], iteration_bounds = array<i64: 1, 1, 1>, scalar_prefetch = 0 : i64, scratch_operands = 1 : i64, tpu.core_type = #tpu.core_type<tc>, window_params = [{transform_indices = @transform_0, window_bounds = array<i64: 32, 576>}, {transform_indices = @transform_1, window_bounds = array<i64: 576, 128>}, {transform_indices = @transform_2, window_bounds = array<i64: 1, 128>}, {transform_indices = @transform_3, window_bounds = array<i64: 32, 128>}]} {
    %c0_i32 = arith.constant 0 : i32
    %0 = arith.cmpi eq, %arg2, %c0_i32 : i32
    %1 = arith.extui %0 : i1 to i32
    %c0_i32_0 = arith.constant 0 : i32
    %2 = arith.cmpi ne, %1, %c0_i32_0 : i32
    scf.if %2 {
      %cst_10 = arith.constant 0.000000e+00 : f32
      %12 = vector.broadcast %cst_10 : f32 to vector<32x128xf32>
      %c0_11 = arith.constant 0 : index
      %c0_12 = arith.constant 0 : index
      %13 = vector.load %arg7[%c0_11, %c0_12] : memref<32x128xf32, #tpu.memory_space<vmem>>, vector<32x128xf32>
      tpu.vector_store %arg7[%c0_11, %c0_12], %12 {strides = array<i32>} : memref<32x128xf32, #tpu.memory_space<vmem>>, vector<32x128xf32>,
    } else {
    }
    %c0 = arith.constant 0 : index
    %c0_1 = arith.constant 0 : index
    %3 = vector.load %arg7[%c0, %c0_1] : memref<32x128xf32, #tpu.memory_space<vmem>>, vector<32x128xf32>
    %c0_2 = arith.constant 0 : index
    %c0_3 = arith.constant 0 : index
    %4 = vector.load %arg3[%c0_2, %c0_3] : memref<32x576xbf16, #tpu.memory_space<vmem>>, vector<32x576xbf16>
    %c0_4 = arith.constant 0 : index
    %c0_5 = arith.constant 0 : index
    %5 = vector.load %arg4[%c0_4, %c0_5] : memref<576x128xbf16, #tpu.memory_space<vmem>>, vector<576x128xbf16>
    %cst = arith.constant dense<0.000000e+00> : vector<32x128xf32>
    %6 = tpu.matmul %4, %5, %cst {dimension_numbers = #tpu.dot_dimension_numbers<[1], [0], [0], [1], [0, 0, 1, 1], [], []>} : vector<32x576xbf16>, vector<576x128xbf16>, vector<32x128xf32> -> vector<32x128xf32>
    %7 = arith.addf %3, %6 : vector<32x128xf32>
    %c0_6 = arith.constant 0 : index
    %c0_7 = arith.constant 0 : index
    %8 = vector.load %arg7[%c0_6, %c0_7] : memref<32x128xf32, #tpu.memory_space<vmem>>, vector<32x128xf32>
    tpu.vector_store %arg7[%c0_6, %c0_7], %7 {strides = array<i32>} : memref<32x128xf32, #tpu.memory_space<vmem>>, vector<32x128xf32>,
    %c0_i32_8 = arith.constant 0 : i32
    %9 = arith.cmpi eq, %arg2, %c0_i32_8 : i32
    %10 = arith.extui %9 : i1 to i32
    %c0_i32_9 = arith.constant 0 : i32
    %11 = arith.cmpi ne, %10, %c0_i32_9 : i32
    scf.if %11 {
      %c0_10 = arith.constant 0 : index
      %c0_11 = arith.constant 0 : index
      %12 = vector.load %arg7[%c0_10, %c0_11] : memref<32x128xf32, #tpu.memory_space<vmem>>, vector<32x128xf32>
      %c0_12 = arith.constant 0 : index
      %c0_13 = arith.constant 0 : index
      %13 = vector.load %arg5[%c0_12, %c0_13] : memref<1x128xf32, #tpu.memory_space<vmem>>, vector<1x128xf32>
      %14 = vector.broadcast %13 : vector<1x128xf32> to vector<32x128xf32>
      %15 = arith.addf %12, %14 : vector<32x128xf32>
      %cst_14 = arith.constant 0.000000e+00 : f32
      %16 = vector.broadcast %cst_14 : f32 to vector<32x128xf32>
      %17 = arith.maximumf %15, %16 : vector<32x128xf32>
      %18 = arith.truncf %17 : vector<32x128xf32> to vector<32x128xbf16>
      %c0_15 = arith.constant 0 : index
      %c0_16 = arith.constant 0 : index
      %19 = vector.load %arg6[%c0_15, %c0_16] : memref<32x128xbf16, #tpu.memory_space<vmem>>, vector<32x128xbf16>
      tpu.vector_store %arg6[%c0_15, %c0_16], %18 {strides = array<i32>} : memref<32x128xbf16, #tpu.memory_space<vmem>>, vector<32x128xbf16>,
    } else {
    }
    return
  }
  func.func @transform_0(%arg0: i32, %arg1: i32, %arg2: i32) -> (i32, i32) {
    %c0_i32 = arith.constant 0 : i32
    return %arg0, %arg2 : i32, i32
  }
  func.func @transform_1(%arg0: i32, %arg1: i32, %arg2: i32) -> (i32, i32) {
    %c0_i32 = arith.constant 0 : i32
    return %arg2, %arg1 : i32, i32
  }
  func.func @transform_2(%arg0: i32, %arg1: i32, %arg2: i32) -> (i32, i32) {
    %c0_i32 = arith.constant 0 : i32
    %c0_i32_0 = arith.constant 0 : i32
    return %c0_i32, %arg1 : i32, i32
  }
  func.func @transform_3(%arg0: i32, %arg1: i32, %arg2: i32) -> (i32, i32) {
    %c0_i32 = arith.constant 0 : i32
    return %arg0, %arg1 : i32, i32
  }
}

module attributes {stable_mosaic.version = 11 : i64} {
  func.func @_mm_kernel(%arg0: i32, %arg1: i32, %arg2: i32, %arg3: memref<128x288xbf16, #tpu.memory_space<vmem>>, %arg4: memref<288x4xbf16, #tpu.memory_space<vmem>>, %arg5: memref<1x4xf32, #tpu.memory_space<vmem>>, %arg6: memref<128x4xf32, #tpu.memory_space<vmem>>, %arg7: memref<128x4xf32, #tpu.memory_space<vmem>>) attributes {dimension_semantics = [#tpu.dimension_semantics<parallel>, #tpu.dimension_semantics<parallel>, #tpu.dimension_semantics<arbitrary>], iteration_bounds = array<i64: 1, 1, 1>, scalar_prefetch = 0 : i64, scratch_operands = 1 : i64, tpu.core_type = #tpu.core_type<tc>, window_params = [{transform_indices = @transform_0, window_bounds = array<i64: 128, 288>}, {transform_indices = @transform_1, window_bounds = array<i64: 288, 4>}, {transform_indices = @transform_2, window_bounds = array<i64: 1, 4>}, {transform_indices = @transform_3, window_bounds = array<i64: 128, 4>}]} {
    %c0_i32 = arith.constant 0 : i32
    %0 = arith.cmpi eq, %arg2, %c0_i32 : i32
    %1 = arith.extui %0 : i1 to i32
    %c0_i32_0 = arith.constant 0 : i32
    %2 = arith.cmpi ne, %1, %c0_i32_0 : i32
    scf.if %2 {
      %cst_10 = arith.constant 0.000000e+00 : f32
      %12 = vector.broadcast %cst_10 : f32 to vector<128x4xf32>
      %c0_11 = arith.constant 0 : index
      %c0_12 = arith.constant 0 : index
      %13 = vector.load %arg7[%c0_11, %c0_12] : memref<128x4xf32, #tpu.memory_space<vmem>>, vector<128x4xf32>
      tpu.vector_store %arg7[%c0_11, %c0_12], %12 {strides = array<i32>} : memref<128x4xf32, #tpu.memory_space<vmem>>, vector<128x4xf32>,
    } else {
    }
    %c0 = arith.constant 0 : index
    %c0_1 = arith.constant 0 : index
    %3 = vector.load %arg7[%c0, %c0_1] : memref<128x4xf32, #tpu.memory_space<vmem>>, vector<128x4xf32>
    %c0_2 = arith.constant 0 : index
    %c0_3 = arith.constant 0 : index
    %4 = vector.load %arg3[%c0_2, %c0_3] : memref<128x288xbf16, #tpu.memory_space<vmem>>, vector<128x288xbf16>
    %c0_4 = arith.constant 0 : index
    %c0_5 = arith.constant 0 : index
    %5 = vector.load %arg4[%c0_4, %c0_5] : memref<288x4xbf16, #tpu.memory_space<vmem>>, vector<288x4xbf16>
    %cst = arith.constant dense<0.000000e+00> : vector<128x4xf32>
    %6 = tpu.matmul %4, %5, %cst {dimension_numbers = #tpu.dot_dimension_numbers<[1], [0], [0], [1], [0, 0, 1, 1], [], []>} : vector<128x288xbf16>, vector<288x4xbf16>, vector<128x4xf32> -> vector<128x4xf32>
    %7 = arith.addf %3, %6 : vector<128x4xf32>
    %c0_6 = arith.constant 0 : index
    %c0_7 = arith.constant 0 : index
    %8 = vector.load %arg7[%c0_6, %c0_7] : memref<128x4xf32, #tpu.memory_space<vmem>>, vector<128x4xf32>
    tpu.vector_store %arg7[%c0_6, %c0_7], %7 {strides = array<i32>} : memref<128x4xf32, #tpu.memory_space<vmem>>, vector<128x4xf32>,
    %c0_i32_8 = arith.constant 0 : i32
    %9 = arith.cmpi eq, %arg2, %c0_i32_8 : i32
    %10 = arith.extui %9 : i1 to i32
    %c0_i32_9 = arith.constant 0 : i32
    %11 = arith.cmpi ne, %10, %c0_i32_9 : i32
    scf.if %11 {
      %c0_10 = arith.constant 0 : index
      %c0_11 = arith.constant 0 : index
      %12 = vector.load %arg7[%c0_10, %c0_11] : memref<128x4xf32, #tpu.memory_space<vmem>>, vector<128x4xf32>
      %c0_12 = arith.constant 0 : index
      %c0_13 = arith.constant 0 : index
      %13 = vector.load %arg5[%c0_12, %c0_13] : memref<1x4xf32, #tpu.memory_space<vmem>>, vector<1x4xf32>
      %14 = vector.broadcast %13 : vector<1x4xf32> to vector<128x4xf32>
      %15 = arith.addf %12, %14 : vector<128x4xf32>
      %16 = arith.negf %15 : vector<128x4xf32>
      %17 = math.exp %16 : vector<128x4xf32>
      %cst_14 = arith.constant 1.000000e+00 : f32
      %18 = vector.broadcast %cst_14 : f32 to vector<128x4xf32>
      %19 = arith.addf %18, %17 : vector<128x4xf32>
      %20 = arith.divf %18, %19 : vector<128x4xf32>
      %c0_15 = arith.constant 0 : index
      %c0_16 = arith.constant 0 : index
      %21 = vector.load %arg6[%c0_15, %c0_16] : memref<128x4xf32, #tpu.memory_space<vmem>>, vector<128x4xf32>
      tpu.vector_store %arg6[%c0_15, %c0_16], %20 {strides = array<i32>} : memref<128x4xf32, #tpu.memory_space<vmem>>, vector<128x4xf32>,
    } else {
    }
    return
  }
  func.func @transform_0(%arg0: i32, %arg1: i32, %arg2: i32) -> (i32, i32) {
    %c0_i32 = arith.constant 0 : i32
    return %arg0, %arg2 : i32, i32
  }
  func.func @transform_1(%arg0: i32, %arg1: i32, %arg2: i32) -> (i32, i32) {
    %c0_i32 = arith.constant 0 : i32
    return %arg2, %arg1 : i32, i32
  }
  func.func @transform_2(%arg0: i32, %arg1: i32, %arg2: i32) -> (i32, i32) {
    %c0_i32 = arith.constant 0 : i32
    %c0_i32_0 = arith.constant 0 : i32
    return %c0_i32, %arg1 : i32, i32
  }
  func.func @transform_3(%arg0: i32, %arg1: i32, %arg2: i32) -> (i32, i32) {
    %c0_i32 = arith.constant 0 : i32
    return %arg0, %arg1 : i32, i32
  }
}

module attributes {stable_mosaic.version = 11 : i64} {
  func.func @_swin_classifier_kernel(%arg0: i32, %arg1: memref<2x256xf32, #tpu.memory_space<vmem>>, %arg2: memref<2x256xf32, #tpu.memory_space<vmem>>, %arg3: memref<2x16xf32, #tpu.memory_space<vmem>>, %arg4: memref<16x96xbf16, #tpu.memory_space<vmem>>, %arg5: memref<1x96xf32, #tpu.memory_space<vmem>>, %arg6: memref<96x768xbf16, #tpu.memory_space<vmem>>, %arg7: memref<1x768xf32, #tpu.memory_space<vmem>>, %arg8: memref<1x256xbf16, #tpu.memory_space<vmem>>, %arg9: memref<768x256xbf16, #tpu.memory_space<vmem>>, %arg10: memref<1x256xf32, #tpu.memory_space<vmem>>, %arg11: memref<256x1xbf16, #tpu.memory_space<vmem>>, %arg12: memref<1x1xf32, #tpu.memory_space<vmem>>, %arg13: memref<2x1xf32, #tpu.memory_space<vmem>>) attributes {dimension_semantics = [#tpu.dimension_semantics<arbitrary>], iteration_bounds = array<i64: 1>, scalar_prefetch = 0 : i64, scratch_operands = 0 : i64, tpu.core_type = #tpu.core_type<tc>, window_params = [{pipeline_mode = #tpu.pipeline_mode<synchronous>, transform_indices = @transform_0, window_bounds = array<i64: 2, 256>}, {pipeline_mode = #tpu.pipeline_mode<synchronous>, transform_indices = @transform_1, window_bounds = array<i64: 2, 256>}, {pipeline_mode = #tpu.pipeline_mode<synchronous>, transform_indices = @transform_2, window_bounds = array<i64: 2, 16>}, {pipeline_mode = #tpu.pipeline_mode<synchronous>, transform_indices = @transform_3, window_bounds = array<i64: 16, 96>}, {pipeline_mode = #tpu.pipeline_mode<synchronous>, transform_indices = @transform_4, window_bounds = array<i64: 1, 96>}, {pipeline_mode = #tpu.pipeline_mode<synchronous>, transform_indices = @transform_5, window_bounds = array<i64: 96, 768>}, {pipeline_mode = #tpu.pipeline_mode<synchronous>, transform_indices = @transform_6, window_bounds = array<i64: 1, 768>}, {pipeline_mode = #tpu.pipeline_mode<synchronous>, transform_indices = @transform_7, window_bounds = array<i64: 1, 256>}, {pipeline_mode = #tpu.pipeline_mode<synchronous>, transform_indices = @transform_8, window_bounds = array<i64: 768, 256>}, {pipeline_mode = #tpu.pipeline_mode<synchronous>, transform_indices = @transform_9, window_bounds = array<i64: 1, 256>}, {pipeline_mode = #tpu.pipeline_mode<synchronous>, transform_indices = @transform_10, window_bounds = array<i64: 256, 1>}, {pipeline_mode = #tpu.pipeline_mode<synchronous>, transform_indices = @transform_11, window_bounds = array<i64: 1, 1>}, {pipeline_mode = #tpu.pipeline_mode<synchronous>, transform_indices = @transform_12, window_bounds = array<i64: 2, 1>}]} {
    %c0 = arith.constant 0 : index
    %c0_0 = arith.constant 0 : index
    %0 = vector.load %arg1[%c0, %c0_0] : memref<2x256xf32, #tpu.memory_space<vmem>>, vector<2x256xf32>
    %c0_1 = arith.constant 0 : index
    %c0_2 = arith.constant 0 : index
    %1 = vector.load %arg2[%c0_1, %c0_2] : memref<2x256xf32, #tpu.memory_space<vmem>>, vector<2x256xf32>
    %2 = arith.subf %0, %1 : vector<2x256xf32>
    %3 = arith.mulf %2, %2 : vector<2x256xf32>
    %cst = arith.constant dense<0.000000e+00> : vector<2xf32>
    %4 = vector.multi_reduction <add>, %3, %cst [1] : vector<2x256xf32> to vector<2xf32>
    %5 = vector.shape_cast %4 : vector<2xf32> to vector<2x1xf32>
    %cst_3 = arith.constant 2.560000e+02 : f32
    %6 = vector.broadcast %cst_3 : f32 to vector<2x1xf32>
    %7 = arith.divf %5, %6 : vector<2x1xf32>
    %c0_4 = arith.constant 0 : index
    %c0_5 = arith.constant 0 : index
    %8 = vector.load %arg3[%c0_4, %c0_5] : memref<2x16xf32, #tpu.memory_space<vmem>>, vector<2x16xf32>
    %9 = arith.truncf %8 : vector<2x16xf32> to vector<2x16xbf16>
    %c0_6 = arith.constant 0 : index
    %c0_7 = arith.constant 0 : index
    %10 = vector.load %arg4[%c0_6, %c0_7] : memref<16x96xbf16, #tpu.memory_space<vmem>>, vector<16x96xbf16>
    %cst_8 = arith.constant dense<0.000000e+00> : vector<2x96xf32>
    %11 = tpu.matmul %9, %10, %cst_8 {dimension_numbers = #tpu.dot_dimension_numbers<[1], [0], [0], [1], [0, 0, 1, 1], [], []>} : vector<2x16xbf16>, vector<16x96xbf16>, vector<2x96xf32> -> vector<2x96xf32>
    %c0_9 = arith.constant 0 : index
    %c0_10 = arith.constant 0 : index
    %12 = vector.load %arg5[%c0_9, %c0_10] : memref<1x96xf32, #tpu.memory_space<vmem>>, vector<1x96xf32>
    %13 = vector.broadcast %12 : vector<1x96xf32> to vector<2x96xf32>
    %14 = arith.addf %11, %13 : vector<2x96xf32>
    %15 = arith.truncf %14 : vector<2x96xf32> to vector<2x96xbf16>
    %c0_11 = arith.constant 0 : index
    %c0_12 = arith.constant 0 : index
    %16 = vector.load %arg6[%c0_11, %c0_12] : memref<96x768xbf16, #tpu.memory_space<vmem>>, vector<96x768xbf16>
    %cst_13 = arith.constant dense<0.000000e+00> : vector<2x768xf32>
    %17 = tpu.matmul %15, %16, %cst_13 {dimension_numbers = #tpu.dot_dimension_numbers<[1], [0], [0], [1], [0, 0, 1, 1], [], []>} : vector<2x96xbf16>, vector<96x768xbf16>, vector<2x768xf32> -> vector<2x768xf32>
    %c0_14 = arith.constant 0 : index
    %c0_15 = arith.constant 0 : index
    %18 = vector.load %arg7[%c0_14, %c0_15] : memref<1x768xf32, #tpu.memory_space<vmem>>, vector<1x768xf32>
    %19 = vector.broadcast %18 : vector<1x768xf32> to vector<2x768xf32>
    %20 = arith.addf %17, %19 : vector<2x768xf32>
    %21 = arith.truncf %20 : vector<2x768xf32> to vector<2x768xbf16>
    %c0_16 = arith.constant 0 : index
    %c0_17 = arith.constant 0 : index
    %22 = vector.load %arg9[%c0_16, %c0_17] : memref<768x256xbf16, #tpu.memory_space<vmem>>, vector<768x256xbf16>
    %cst_18 = arith.constant dense<0.000000e+00> : vector<2x256xf32>
    %23 = tpu.matmul %21, %22, %cst_18 {dimension_numbers = #tpu.dot_dimension_numbers<[1], [0], [0], [1], [0, 0, 1, 1], [], []>} : vector<2x768xbf16>, vector<768x256xbf16>, vector<2x256xf32> -> vector<2x256xf32>
    %c0_19 = arith.constant 0 : index
    %c0_20 = arith.constant 0 : index
    %24 = vector.load %arg8[%c0_19, %c0_20] : memref<1x256xbf16, #tpu.memory_space<vmem>>, vector<1x256xbf16>
    %25 = arith.extf %24 : vector<1x256xbf16> to vector<1x256xf32>
    %26 = vector.broadcast %7 : vector<2x1xf32> to vector<2x256xf32>
    %27 = vector.broadcast %25 : vector<1x256xf32> to vector<2x256xf32>
    %28 = arith.mulf %26, %27 : vector<2x256xf32>
    %29 = arith.addf %23, %28 : vector<2x256xf32>
    %c0_21 = arith.constant 0 : index
    %c0_22 = arith.constant 0 : index
    %30 = vector.load %arg10[%c0_21, %c0_22] : memref<1x256xf32, #tpu.memory_space<vmem>>, vector<1x256xf32>
    %31 = vector.broadcast %30 : vector<1x256xf32> to vector<2x256xf32>
    %32 = arith.addf %29, %31 : vector<2x256xf32>
    %cst_23 = arith.constant 0.000000e+00 : f32
    %33 = vector.broadcast %cst_23 : f32 to vector<2x256xf32>
    %34 = arith.maximumf %32, %33 : vector<2x256xf32>
    %35 = arith.truncf %34 : vector<2x256xf32> to vector<2x256xbf16>
    %c0_24 = arith.constant 0 : index
    %c0_25 = arith.constant 0 : index
    %36 = vector.load %arg11[%c0_24, %c0_25] : memref<256x1xbf16, #tpu.memory_space<vmem>>, vector<256x1xbf16>
    %cst_26 = arith.constant dense<0.000000e+00> : vector<2x1xf32>
    %37 = tpu.matmul %35, %36, %cst_26 {dimension_numbers = #tpu.dot_dimension_numbers<[1], [0], [0], [1], [0, 0, 1, 1], [], []>} : vector<2x256xbf16>, vector<256x1xbf16>, vector<2x1xf32> -> vector<2x1xf32>
    %c0_27 = arith.constant 0 : index
    %c0_28 = arith.constant 0 : index
    %38 = vector.load %arg12[%c0_27, %c0_28] : memref<1x1xf32, #tpu.memory_space<vmem>>, vector<1x1xf32>
    %39 = vector.broadcast %38 : vector<1x1xf32> to vector<2x1xf32>
    %40 = arith.addf %37, %39 : vector<2x1xf32>
    %41 = arith.negf %40 : vector<2x1xf32>
    %42 = math.exp %41 : vector<2x1xf32>
    %cst_29 = arith.constant 1.000000e+00 : f32
    %43 = vector.broadcast %cst_29 : f32 to vector<2x1xf32>
    %44 = arith.addf %43, %42 : vector<2x1xf32>
    %45 = arith.divf %43, %44 : vector<2x1xf32>
    %c0_30 = arith.constant 0 : index
    %c0_31 = arith.constant 0 : index
    %46 = vector.load %arg13[%c0_30, %c0_31] : memref<2x1xf32, #tpu.memory_space<vmem>>, vector<2x1xf32>
    tpu.vector_store %arg13[%c0_30, %c0_31], %45 {strides = array<i32>} : memref<2x1xf32, #tpu.memory_space<vmem>>, vector<2x1xf32>,
    return
  }
  func.func @transform_0(%arg0: i32) -> (i32, i32) {
    %c0_i32 = arith.constant 0 : i32
    %c0_i32_0 = arith.constant 0 : i32
    %c0_i32_1 = arith.constant 0 : i32
    return %c0_i32, %c0_i32_0 : i32, i32
  }
  func.func @transform_1(%arg0: i32) -> (i32, i32) {
    %c0_i32 = arith.constant 0 : i32
    %c0_i32_0 = arith.constant 0 : i32
    %c0_i32_1 = arith.constant 0 : i32
    return %c0_i32, %c0_i32_0 : i32, i32
  }
  func.func @transform_2(%arg0: i32) -> (i32, i32) {
    %c0_i32 = arith.constant 0 : i32
    %c0_i32_0 = arith.constant 0 : i32
    %c0_i32_1 = arith.constant 0 : i32
    return %c0_i32, %c0_i32_0 : i32, i32
  }
  func.func @transform_3(%arg0: i32) -> (i32, i32) {
    %c0_i32 = arith.constant 0 : i32
    %c0_i32_0 = arith.constant 0 : i32
    %c0_i32_1 = arith.constant 0 : i32
    return %c0_i32, %c0_i32_0 : i32, i32
  }
  func.func @transform_4(%arg0: i32) -> (i32, i32) {
    %c0_i32 = arith.constant 0 : i32
    %c0_i32_0 = arith.constant 0 : i32
    %c0_i32_1 = arith.constant 0 : i32
    return %c0_i32, %c0_i32_0 : i32, i32
  }
  func.func @transform_5(%arg0: i32) -> (i32, i32) {
    %c0_i32 = arith.constant 0 : i32
    %c0_i32_0 = arith.constant 0 : i32
    %c0_i32_1 = arith.constant 0 : i32
    return %c0_i32, %c0_i32_0 : i32, i32
  }
  func.func @transform_6(%arg0: i32) -> (i32, i32) {
    %c0_i32 = arith.constant 0 : i32
    %c0_i32_0 = arith.constant 0 : i32
    %c0_i32_1 = arith.constant 0 : i32
    return %c0_i32, %c0_i32_0 : i32, i32
  }
  func.func @transform_7(%arg0: i32) -> (i32, i32) {
    %c0_i32 = arith.constant 0 : i32
    %c0_i32_0 = arith.constant 0 : i32
    %c0_i32_1 = arith.constant 0 : i32
    return %c0_i32, %c0_i32_0 : i32, i32
  }
  func.func @transform_8(%arg0: i32) -> (i32, i32) {
    %c0_i32 = arith.constant 0 : i32
    %c0_i32_0 = arith.constant 0 : i32
    %c0_i32_1 = arith.constant 0 : i32
    return %c0_i32, %c0_i32_0 : i32, i32
  }
  func.func @transform_9(%arg0: i32) -> (i32, i32) {
    %c0_i32 = arith.constant 0 : i32
    %c0_i32_0 = arith.constant 0 : i32
    %c0_i32_1 = arith.constant 0 : i32
    return %c0_i32, %c0_i32_0 : i32, i32
  }
  func.func @transform_10(%arg0: i32) -> (i32, i32) {
    %c0_i32 = arith.constant 0 : i32
    %c0_i32_0 = arith.constant 0 : i32
    %c0_i32_1 = arith.constant 0 : i32
    return %c0_i32, %c0_i32_0 : i32, i32
  }
  func.func @transform_11(%arg0: i32) -> (i32, i32) {
    %c0_i32 = arith.constant 0 : i32
    %c0_i32_0 = arith.constant 0 : i32
    %c0_i32_1 = arith.constant 0 : i32
    return %c0_i32, %c0_i32_0 : i32, i32
  }
  func.func @transform_12(%arg0: i32) -> (i32, i32) {
    %c0_i32 = arith.constant 0 : i32
    %c0_i32_0 = arith.constant 0 : i32
    %c0_i32_1 = arith.constant 0 : i32
    return %c0_i32, %c0_i32_0 : i32, i32
  }
}

</mosaic_0001>

<bundles_post_ra>
// kernel: invoice_forgery_forward.7
= control target key start
LH: loop header
LB: loop body
LE: loop exit
PB: predicated region body
PF: predicated region fallthrough
CT: control target
= control target key end

     0   :  { %vm19_vm0 = vcmask 261120   ;;  %v503_v1 = vmov 0.0   ;;  %vm116_vm1 = vcmask 130048   ;;  %vm393_vm2 = vcmask 257024   ;;  %s676_s1 = inlined_call_operand.vmem [shape: bf16[16,32], index: 1, kind: input, shape index: {}]   ;;  %s677_s0 = inlined_call_operand.vmem [shape: bf16[128,16], index: 0, kind: input, shape index: {}]   ;;  %s678_s2 = inlined_call_operand.vmem [shape: f32[1,32], index: 2, kind: input, shape index: {}]   ;;  %s679_s3 = inlined_call_operand.vmem [shape: bf16[128,32], index: 3, kind: output, shape index: {}]  }
   0x1   :  { %v494_v0 = vld [vmem:[%s676_s1] sm:$0xff]   ;;  %22 = vst.msk [vmem:[#allocation2 + $0x10] sm:$0xff] %vm19_vm0, %v503_v1  ;;  %20 = vst.msk [vmem:[#allocation2] sm:$0xff] %vm19_vm0, %v503_v1  ;;  %v497_v4 = vld [vmem:[%s677_s0 + $0x8] sm:$0xff]  }
   0x2   :  { %21 = vst.msk [vmem:[#allocation2 + $0x8] sm:$0xff] %vm19_vm0, %v503_v1  ;;  %23 = vst.msk [vmem:[#allocation2 + $0x18] sm:$0xff] %vm19_vm0, %v503_v1  ;;  %v495_v2 = vld [vmem:[%s677_s0] sm:$0xff]   ;;  %473 = vmatprep.subr.bf16.mxu0 %v494_v0  ;;  %491 = vmatprep.subr.bf16.mxu1 %v494_v0  ;;  %v498_v5 = vld [vmem:[%s677_s0 + $0x28] sm:$0xff]  }
   0x3   :  { %24 = vst.msk [vmem:[#allocation2 + $0x20] sm:$0xff] %vm19_vm0, %v503_v1  ;;  %25 = vst.msk [vmem:[#allocation2 + $0x28] sm:$0xff] %vm19_vm0, %v503_v1  ;;  %v496_v3 = vld [vmem:[%s677_s0 + $0x20] sm:$0xff]   ;;  %474 = vmatpush3.bf16.msra.mxu0 %v494_v0  ;;  %492 = vmatpush3.bf16.msra.mxu1 %v494_v0  ;;  %v499_v6 = vld [vmem:[%s677_s0 + $0x10] sm:$0xff]  }
   0x4   :  { %26 = vst.msk [vmem:[#allocation2 + $0x30] sm:$0xff] %vm19_vm0, %v503_v1  ;;  %27 = vst.msk [vmem:[#allocation2 + $0x38] sm:$0xff] %vm19_vm0, %v503_v1  ;;  %475 = vmatprep.mubr.msk.bf16.mxu0 %vm116_vm1, %v495_v2  ;;  %483 = vmatprep.mubr.msk.bf16.mxu1 %vm116_vm1, %v496_v3  ;;  %v500_v7 = vld [vmem:[%s677_s0 + $0x30] sm:$0xff]   ;;  %v501_v8 = vld [vmem:[%s677_s0 + $0x18] sm:$0xff]  }
   0x5   :  { %28 = vst.msk [vmem:[#allocation2 + $0x40] sm:$0xff] %vm19_vm0, %v503_v1  ;;  %29 = vst.msk [vmem:[#allocation2 + $0x48] sm:$0xff] %vm19_vm0, %v503_v1  ;;  %v502_v9 = vld [vmem:[%s677_s0 + $0x38] sm:$0xff]   ;;  %v586_v38 = vld [vmem:[%s678_s2] ss:$0 sm:$0xff] }
   0x6   :  { %30 = vst.msk [vmem:[#allocation2 + $0x50] sm:$0xff] %vm19_vm0, %v503_v1  ;;  %31 = vst.msk [vmem:[#allocation2 + $0x58] sm:$0xff] %vm19_vm0, %v503_v1  ;;  %476 = vmatmul.mubr.msk.bf16.vlgmr.msra.gmra.mrb[0].mxu0 %vm116_vm1, %v497_v4  ;;  %484 = vmatmul.mubr.msk.bf16.vlgmr.msra.gmra.mrb[0].mxu1 %vm116_vm1, %v498_v5 }
   0x7   :  { %32 = vst.msk [vmem:[#allocation2 + $0x60] sm:$0xff] %vm19_vm0, %v503_v1  ;;  %33 = vst.msk [vmem:[#allocation2 + $0x68] sm:$0xff] %vm19_vm0, %v503_v1  ;;  %479 = vmatprep.mubr.msk.bf16.mxu0 %vm116_vm1, %v499_v6  ;;  %487 = vmatprep.mubr.msk.bf16.mxu1 %vm116_vm1, %v500_v7 }
   0x8   :  { %34 = vst.msk [vmem:[#allocation2 + $0x70] sm:$0xff] %vm19_vm0, %v503_v1  ;;  %35 = vst.msk [vmem:[#allocation2 + $0x78] sm:$0xff] %vm19_vm0, %v503_v1  ;;  %v38_v10 = vld [vmem:[#allocation2 + $0x10] sm:$0xff]  ;;  %v36_v12 = vld [vmem:[#allocation2] sm:$0xff] }
   0x9   :  { %v39_v16 = vld [vmem:[#allocation2 + $0x18] sm:$0xff]  ;;  %v37_v22 = vld [vmem:[#allocation2 + $0x8] sm:$0xff] }
   0xa   :  { %v40_v36 = vld [vmem:[#allocation2 + $0x20] sm:$0xff]  ;;  %v41_v47 = vld [vmem:[#allocation2 + $0x28] sm:$0xff] }
   0xb   :  { %v42_v34 = vld [vmem:[#allocation2 + $0x30] sm:$0xff]  ;;  %v43_v41 = vld [vmem:[#allocation2 + $0x38] sm:$0xff] }
   0xc   :  { %v44_v13 = vld [vmem:[#allocation2 + $0x40] sm:$0xff]  ;;  %v45_v23 = vld [vmem:[#allocation2 + $0x48] sm:$0xff] }
   0xd   :  { %v46_v11 = vld [vmem:[#allocation2 + $0x50] sm:$0xff]  ;;  %v47_v17 = vld [vmem:[#allocation2 + $0x58] sm:$0xff] }
   0xe   :  { %480 = vmatmul.mubr.msk.bf16.gmra.mrb[4].mxu0 %vm116_vm1, %v501_v8  ;;  %488 = vmatmul.mubr.msk.bf16.gmra.mrb[4].mxu1 %vm116_vm1, %v502_v9  ;;  %v48_v37 = vld [vmem:[#allocation2 + $0x60] sm:$0xff]  ;;  %v49_v48 = vld [vmem:[#allocation2 + $0x68] sm:$0xff] }
   0xf   :  { %v50_v35 = vld [vmem:[#allocation2 + $0x70] sm:$0xff]  ;;  %v51_v42 = vld [vmem:[#allocation2 + $0x78] sm:$0xff] }
  0xd9   :  { %v477_v14 = vpop.f32.mrb[0].mxu0  ;;  %v485_v15 = vpop.f32.mrb[0].mxu1 }
  0xda   :  { %v240_v18 = vadd.f32 %v477_v14, %v38_v10  ;;  %v248_v19 = vadd.f32 %v485_v15, %v46_v11  ;;  %v175_v20 = vpop.f32.mrb[1].mxu0  ;;  %v207_v21 = vpop.f32.mrb[1].mxu1 }
  0xdb   :  { %v238_v24 = vadd.f32 %v175_v20, %v36_v12  ;;  %v246_v25 = vadd.f32 %v207_v21, %v44_v13  ;;  %v478_v26 = vpop.f32.mrb[2].mxu0  ;;  %v486_v27 = vpop.f32.mrb[2].mxu1 }
  0xdc   :  { %257 = vst.msk [vmem:[#allocation2 + $0x10] sm:$0xff] %vm19_vm0, %v240_v18  ;;  %265 = vst.msk [vmem:[#allocation2 + $0x50] sm:$0xff] %vm19_vm0, %v248_v19  ;;  %v241_v28 = vadd.f32 %v478_v26, %v39_v16  ;;  %v249_v29 = vadd.f32 %v486_v27, %v47_v17  ;;  %v178_v30 = vpop.f32.mrb[3].mxu0  ;;  %v210_v31 = vpop.f32.mrb[3].mxu1 }
  0xdd   :  { %255 = vst.msk [vmem:[#allocation2] sm:$0xff] %vm19_vm0, %v238_v24  ;;  %263 = vst.msk [vmem:[#allocation2 + $0x40] sm:$0xff] %vm19_vm0, %v246_v25  ;;  %v239_v32 = vadd.f32 %v178_v30, %v37_v22  ;;  %v247_v33 = vadd.f32 %v210_v31, %v45_v23 }
  0xde   :  { %258 = vst.msk [vmem:[#allocation2 + $0x18] sm:$0xff] %vm19_vm0, %v241_v28  ;;  %266 = vst.msk [vmem:[#allocation2 + $0x58] sm:$0xff] %vm19_vm0, %v249_v29 }
  0xdf   :  { %256 = vst.msk [vmem:[#allocation2 + $0x8] sm:$0xff] %vm19_vm0, %v239_v32  ;;  %264 = vst.msk [vmem:[#allocation2 + $0x48] sm:$0xff] %vm19_vm0, %v247_v33 }
  0xe1   :  { %v481_v39 = vpop.f32.mrb[4].mxu0  ;;  %v489_v40 = vpop.f32.mrb[4].mxu1 }
  0xe2   :  { %v244_v43 = vadd.f32 %v481_v39, %v42_v34  ;;  %v252_v44 = vadd.f32 %v489_v40, %v50_v35  ;;  %v191_v45 = vpop.f32.mrb[5].mxu0  ;;  %v223_v46 = vpop.f32.mrb[5].mxu1 }
  0xe3   :  { %v276_v49 = vld [vmem:[#allocation2 + $0x10] sm:$0xff]  ;;  %v242_v51 = vadd.f32 %v191_v45, %v40_v36  ;;  %v250_v52 = vadd.f32 %v223_v46, %v48_v37  ;;  %v482_v53 = vpop.f32.mrb[6].mxu0  ;;  %v490_v54 = vpop.f32.mrb[6].mxu1 }
  0xe4   :  { %v284_v50 = vld [vmem:[#allocation2 + $0x50] sm:$0xff]  ;;  %v299_v55 = vadd.f32 %v586_v38, %v276_v49  ;;  %v274_v57 = vld [vmem:[#allocation2] sm:$0xff]  ;;  %261 = vst.msk [vmem:[#allocation2 + $0x30] sm:$0xff] %vm19_vm0, %v244_v43  ;;  %269 = vst.msk [vmem:[#allocation2 + $0x70] sm:$0xff] %vm19_vm0, %v252_v44  ;;  %v245_v59 = vadd.f32 %v482_v53, %v43_v41  ;;  %v253_v60 = vadd.f32 %v490_v54, %v51_v42  ;;  %v194_v61 = vpop.f32.mrb[7].mxu0  ;;  %v226_v62 = vpop.f32.mrb[7].mxu1 }
  0xe5   :  { %v307_v56 = vadd.f32 %v586_v38, %v284_v50  ;;  %v282_v58 = vld [vmem:[#allocation2 + $0x40] sm:$0xff]  ;;  %v297_v63 = vadd.f32 %v586_v38, %v274_v57  ;;  %v277_v1 = vld [vmem:[#allocation2 + $0x18] sm:$0xff]  ;;  %259 = vst.msk [vmem:[#allocation2 + $0x20] sm:$0xff] %vm19_vm0, %v242_v51  ;;  %267 = vst.msk [vmem:[#allocation2 + $0x60] sm:$0xff] %vm19_vm0, %v250_v52  ;;  %v243_v3 = vadd.f32 %v194_v61, %v41_v47 }
  0xe6   :  { %v305_v0 = vadd.f32 %v586_v38, %v282_v58  ;;  %v285_v2 = vld [vmem:[#allocation2 + $0x58] sm:$0xff]  ;;  %v251_v4 = vadd.f32 %v226_v62, %v49_v48  ;;  %v315_v5 = vmax.f32 %v299_v55, 0.0  ;;  %v300_v7 = vadd.f32 %v586_v38, %v277_v1  ;;  %v275_v9 = vld [vmem:[#allocation2 + $0x8] sm:$0xff]  ;;  %262 = vst.msk [vmem:[#allocation2 + $0x38] sm:$0xff] %vm19_vm0, %v245_v59  ;;  %270 = vst.msk [vmem:[#allocation2 + $0x78] sm:$0xff] %vm19_vm0, %v253_v60 }
  0xe7   :  { %v323_v6 = vmax.f32 %v307_v56, 0.0  ;;  %v308_v8 = vadd.f32 %v586_v38, %v285_v2  ;;  %v283_v10 = vld [vmem:[#allocation2 + $0x48] sm:$0xff]  ;;  %v313_v11 = vmax.f32 %v297_v63, 0.0  ;;  %v298_v13 = vadd.f32 %v586_v38, %v275_v9  ;;  %260 = vst.msk [vmem:[#allocation2 + $0x28] sm:$0xff] %vm19_vm0, %v243_v3 }
  0xe8   :  { %v321_v12 = vmax.f32 %v305_v0, 0.0  ;;  %v306_v14 = vadd.f32 %v586_v38, %v283_v10  ;;  %268 = vst.msk [vmem:[#allocation2 + $0x68] sm:$0xff] %vm19_vm0, %v251_v4  ;;  %v450_v15 = vpack.c.bf16 %v315_v5, %v315_v5  ;;  %v316_v17 = vmax.f32 %v300_v7, 0.0 }
  0xe9   :  { %v458_v16 = vpack.c.bf16 %v323_v6, %v323_v6  ;;  %v324_v18 = vmax.f32 %v308_v8, 0.0  ;;  %v448_v19 = vpack.c.bf16 %v313_v11, %v313_v11  ;;  %v314_v21 = vmax.f32 %v298_v13, 0.0 }
  0xea   :  { %v456_v20 = vpack.c.bf16 %v321_v12, %v321_v12  ;;  %v322_v22 = vmax.f32 %v306_v14, 0.0  ;;  %396 = vst.msk [vmem:[%s679_s3 + $0x8] sm:$0xf] %vm393_vm2, %v450_v15  ;;  %v451_v23 = vpack.c.bf16 %v316_v17, %v316_v17 }
  0xeb   :  { %404 = vst.msk [vmem:[%s679_s3 + $0x28] sm:$0xf] %vm393_vm2, %v458_v16  ;;  %v459_v24 = vpack.c.bf16 %v324_v18, %v324_v18  ;;  %394 = vst.msk [vmem:[%s679_s3] sm:$0xf] %vm393_vm2, %v448_v19  ;;  %v449_v25 = vpack.c.bf16 %v314_v21, %v314_v21  ;;  %v280_v27 = vld [vmem:[#allocation2 + $0x30] sm:$0xff] }
  0xec   :  { %402 = vst.msk [vmem:[%s679_s3 + $0x20] sm:$0xf] %vm393_vm2, %v456_v20  ;;  %v457_v26 = vpack.c.bf16 %v322_v22, %v322_v22  ;;  %v288_v28 = vld [vmem:[#allocation2 + $0x70] sm:$0xff]  ;;  %397 = vst.msk [vmem:[%s679_s3 + $0xc] sm:$0xf] %vm393_vm2, %v451_v23  ;;  %v303_v29 = vadd.f32 %v586_v38, %v280_v27  ;;  %v278_v31 = vld [vmem:[#allocation2 + $0x20] sm:$0xff] }
  0xed   :  { %405 = vst.msk [vmem:[%s679_s3 + $0x2c] sm:$0xf] %vm393_vm2, %v459_v24  ;;  %v311_v30 = vadd.f32 %v586_v38, %v288_v28  ;;  %v286_v32 = vld [vmem:[#allocation2 + $0x60] sm:$0xff]  ;;  %395 = vst.msk [vmem:[%s679_s3 + $0x4] sm:$0xf] %vm393_vm2, %v449_v25  ;;  %v301_v33 = vadd.f32 %v586_v38, %v278_v31  ;;  %v281_v35 = vld [vmem:[#allocation2 + $0x38] sm:$0xff] }
  0xee   :  { %403 = vst.msk [vmem:[%s679_s3 + $0x24] sm:$0xf] %vm393_vm2, %v457_v26  ;;  %v309_v34 = vadd.f32 %v586_v38, %v286_v32  ;;  %v289_v36 = vld [vmem:[#allocation2 + $0x78] sm:$0xff]  ;;  %v319_v37 = vmax.f32 %v303_v29, 0.0  ;;  %v304_v40 = vadd.f32 %v586_v38, %v281_v35  ;;  %v279_v42 = vld [vmem:[#allocation2 + $0x28] sm:$0xff] }
  0xef   :  { %v327_v39 = vmax.f32 %v311_v30, 0.0  ;;  %v312_v41 = vadd.f32 %v586_v38, %v289_v36  ;;  %v287_v43 = vld [vmem:[#allocation2 + $0x68] sm:$0xff]  ;;  %v317_v44 = vmax.f32 %v301_v33, 0.0  ;;  %v302_v46 = vadd.f32 %v586_v38, %v279_v42 }
  0xf0   :  { %v325_v45 = vmax.f32 %v309_v34, 0.0  ;;  %v310_v47 = vadd.f32 %v586_v38, %v287_v43  ;;  %v454_v48 = vpack.c.bf16 %v319_v37, %v319_v37  ;;  %v320_v50 = vmax.f32 %v304_v40, 0.0 }
  0xf1   :  { %v462_v49 = vpack.c.bf16 %v327_v39, %v327_v39  ;;  %v328_v51 = vmax.f32 %v312_v41, 0.0  ;;  %v452_v52 = vpack.c.bf16 %v317_v44, %v317_v44  ;;  %v318_v54 = vmax.f32 %v302_v46, 0.0 }
  0xf2   :  { %v460_v53 = vpack.c.bf16 %v325_v45, %v325_v45  ;;  %v326_v55 = vmax.f32 %v310_v47, 0.0  ;;  %400 = vst.msk [vmem:[%s679_s3 + $0x18] sm:$0xf] %vm393_vm2, %v454_v48  ;;  %v455_v56 = vpack.c.bf16 %v320_v50, %v320_v50 }
  0xf3   :  { %408 = vst.msk [vmem:[%s679_s3 + $0x38] sm:$0xf] %vm393_vm2, %v462_v49  ;;  %v463_v38 = vpack.c.bf16 %v328_v51, %v328_v51  ;;  %398 = vst.msk [vmem:[%s679_s3 + $0x10] sm:$0xf] %vm393_vm2, %v452_v52  ;;  %v453_v57 = vpack.c.bf16 %v318_v54, %v318_v54 }
  0xf4   :  { %406 = vst.msk [vmem:[%s679_s3 + $0x30] sm:$0xf] %vm393_vm2, %v460_v53  ;;  %v461_v58 = vpack.c.bf16 %v326_v55, %v326_v55  ;;  %401 = vst.msk [vmem:[%s679_s3 + $0x1c] sm:$0xf] %vm393_vm2, %v455_v56 }
  0xf5   :  { %409 = vst.msk [vmem:[%s679_s3 + $0x3c] sm:$0xf] %vm393_vm2, %v463_v38  ;;  %399 = vst.msk [vmem:[%s679_s3 + $0x14] sm:$0xf] %vm393_vm2, %v453_v57 }
  0xf6   :  { %407 = vst.msk [vmem:[%s679_s3 + $0x34] sm:$0xf] %vm393_vm2, %v461_v58 }

// kernel: invoice_forgery_forward.8
= control target key start
LH: loop header
LB: loop body
LE: loop exit
PB: predicated region body
PF: predicated region fallthrough
CT: control target
= control target key end

     0   :  { %vm19_vm0 = vcmask 523264   ;;  %v636_v40 = vmov 0.0   ;;  %vm477_vm1 = vcmask 519168   ;;  %s800_s1 = inlined_call_operand.vmem [shape: bf16[512,64], index: 1, kind: input, shape index: {}]   ;;  %s801_s0 = inlined_call_operand.vmem [shape: bf16[32,512], index: 0, kind: input, shape index: {}]   ;;  %s802_s2 = inlined_call_operand.vmem [shape: f32[1,64], index: 2, kind: input, shape index: {}]   ;;  %s803_s3 = inlined_call_operand.vmem [shape: bf16[32,64], index: 3, kind: output, shape index: {}]  }
   0x1   :  { %v592_v0 = vld [vmem:[%s800_s1 + $0x40] sm:$0xff]   ;;  %v596_v4 = vld [vmem:[%s800_s1 + $0x48] sm:$0xff]   ;;  %v600_v8 = vld [vmem:[%s800_s1 + $0x50] sm:$0xff]   ;;  %20 = vst.msk [vmem:[#allocation2] sm:$0xff] %vm19_vm0, %v636_v40 }
   0x2   :  { %v593_v1 = vld [vmem:[%s800_s1 + $0xc0] sm:$0xff]   ;;  %535 = vmatprep.subr.bf16.mxu0 %v592_v0  ;;  %v597_v5 = vld [vmem:[%s800_s1 + $0xc8] sm:$0xff]   ;;  %v601_v9 = vld [vmem:[%s800_s1 + $0xd0] sm:$0xff]   ;;  %21 = vst.msk [vmem:[#allocation2 + $0x8] sm:$0xff] %vm19_vm0, %v636_v40 }
   0x3   :  { %v594_v2 = vld [vmem:[%s800_s1] sm:$0xff]   ;;  %563 = vmatprep.subr.bf16.mxu1 %v593_v1  ;;  %v598_v6 = vld [vmem:[%s800_s1 + $0x8] sm:$0xff]   ;;  %v602_v10 = vld [vmem:[%s800_s1 + $0x10] sm:$0xff]   ;;  %22 = vst.msk [vmem:[#allocation2 + $0x10] sm:$0xff] %vm19_vm0, %v636_v40 }
   0x4   :  { %v595_v3 = vld [vmem:[%s800_s1 + $0x80] sm:$0xff]   ;;  %536 = vmatpush3.bf16.msra.mxu0 %v594_v2  ;;  %v599_v7 = vld [vmem:[%s800_s1 + $0x88] sm:$0xff]   ;;  %v603_v11 = vld [vmem:[%s800_s1 + $0x90] sm:$0xff]   ;;  %23 = vst.msk [vmem:[#allocation2 + $0x18] sm:$0xff] %vm19_vm0, %v636_v40 }
   0x5   :  { %564 = vmatpush3.bf16.msra.mxu1 %v595_v3  ;;  %537 = vmatprep.subr.bf16.mxu0 %v596_v4  ;;  %v604_v12 = vld [vmem:[%s800_s1 + $0x58] sm:$0xff]   ;;  %v608_v16 = vld [vmem:[%s800_s1 + $0x60] sm:$0xff]   ;;  %v612_v20 = vld [vmem:[%s800_s1 + $0x68] sm:$0xff]  }
   0x6   :  { %565 = vmatprep.subr.bf16.mxu1 %v597_v5  ;;  %v605_v13 = vld [vmem:[%s800_s1 + $0xd8] sm:$0xff]   ;;  %v609_v17 = vld [vmem:[%s800_s1 + $0xe0] sm:$0xff]   ;;  %v613_v21 = vld [vmem:[%s800_s1 + $0xe8] sm:$0xff]  }
   0x7   :  { %v606_v14 = vld [vmem:[%s800_s1 + $0x18] sm:$0xff]   ;;  %v610_v18 = vld [vmem:[%s800_s1 + $0x20] sm:$0xff]   ;;  %v614_v22 = vld [vmem:[%s800_s1 + $0x28] sm:$0xff]  }
   0x8   :  { %538 = vmatpush3.bf16.msra.mxu0 %v598_v6  ;;  %v607_v15 = vld [vmem:[%s800_s1 + $0x98] sm:$0xff]   ;;  %v611_v19 = vld [vmem:[%s800_s1 + $0xa0] sm:$0xff]   ;;  %v615_v23 = vld [vmem:[%s800_s1 + $0xa8] sm:$0xff]  }
   0x9   :  { %566 = vmatpush3.bf16.msra.mxu1 %v599_v7  ;;  %539 = vmatprep.subr.bf16.mxu0 %v600_v8  ;;  %v616_v24 = vld [vmem:[%s800_s1 + $0x70] sm:$0xff]   ;;  %v620_v28 = vld [vmem:[%s800_s1 + $0x78] sm:$0xff]   ;;  %v24_v50 = vld [vmem:[#allocation2] sm:$0xff] }
   0xa   :  { %567 = vmatprep.subr.bf16.mxu1 %v601_v9  ;;  %v617_v25 = vld [vmem:[%s800_s1 + $0xf0] sm:$0xff]   ;;  %v621_v29 = vld [vmem:[%s800_s1 + $0xf8] sm:$0xff]   ;;  %v25_v55 = vld [vmem:[#allocation2 + $0x8] sm:$0xff] }
   0xb   :  { %v618_v26 = vld [vmem:[%s800_s1 + $0x30] sm:$0xff]   ;;  %v622_v30 = vld [vmem:[%s800_s1 + $0x38] sm:$0xff]   ;;  %v526_v9 = vld [vmem:[%s802_s2] ss:$0 sm:$0xff] }
   0xc   :  { %540 = vmatpush3.bf16.msra.mxu0 %v602_v10  ;;  %v619_v27 = vld [vmem:[%s800_s1 + $0xb0] sm:$0xff]   ;;  %v623_v31 = vld [vmem:[%s800_s1 + $0xb8] sm:$0xff]  }
   0xd   :  { %568 = vmatpush3.bf16.msra.mxu1 %v603_v11  ;;  %541 = vmatprep.subr.bf16.mxu0 %v604_v12  ;;  %v624_v32 = vld [vmem:[%s801_s0] ss:$16 sps:$4 sm:$0xff]   ;;  %v626_v33 = vld [vmem:[%s801_s0 + $0x4] ss:$16 sps:$4 sm:$0xff]   ;;  %v627_v34 = vld [vmem:[%s801_s0 + $0x8] ss:$16 sps:$4 sm:$0xff]  }
   0xe   :  { %569 = vmatprep.subr.bf16.mxu1 %v605_v13  ;;  %v629_v35 = vld [vmem:[%s801_s0 + $0xc] ss:$16 sps:$4 sm:$0xff]   ;;  %364 = vmatprep.mubr.bf16.mxu0 %v626_v33  ;;  %v630_v36 = vld [vmem:[%s801_s0 + $0x24] ss:$16 sps:$4 sm:$0xff]   ;;  %v634_v38 = vld [vmem:[%s801_s0 + $0x20] ss:$16 sps:$4 sm:$0xff]  }
   0xf   :  { %413 = vmatprep.mubr.bf16.mxu1 %v629_v35  ;;  %v632_v37 = vld [vmem:[%s801_s0 + $0x2c] ss:$16 sps:$4 sm:$0xff]   ;;  %v635_v39 = vld [vmem:[%s801_s0 + $0x28] ss:$16 sps:$4 sm:$0xff]   ;;  %v26_v4 = vld [vmem:[#allocation2 + $0x10] sm:$0xff] }
  0x10   :  { %542 = vmatpush3.bf16.msra.mxu0 %v606_v14  ;;  %v27_v10 = vld [vmem:[#allocation2 + $0x18] sm:$0xff] }
  0x11   :  { %570 = vmatpush3.bf16.msra.mxu1 %v607_v15  ;;  %543 = vmatprep.subr.bf16.mxu0 %v608_v16 }
  0x12   :  { %571 = vmatprep.subr.bf16.mxu1 %v609_v17 }
  0x14   :  { %544 = vmatpush3.bf16.msra.mxu0 %v610_v18 }
  0x15   :  { %572 = vmatpush3.bf16.msra.mxu1 %v611_v19  ;;  %545 = vmatprep.subr.bf16.mxu0 %v612_v20 }
  0x16   :  { %573 = vmatprep.subr.bf16.mxu1 %v613_v21 }
  0x18   :  { %546 = vmatpush3.bf16.msra.mxu0 %v614_v22 }
  0x19   :  { %574 = vmatpush3.bf16.msra.mxu1 %v615_v23  ;;  %547 = vmatprep.subr.bf16.mxu0 %v616_v24 }
  0x1a   :  { %575 = vmatprep.subr.bf16.mxu1 %v617_v25 }
  0x1c   :  { %548 = vmatpush3.bf16.msra.mxu0 %v618_v26 }
  0x1d   :  { %576 = vmatpush3.bf16.msra.mxu1 %v619_v27  ;;  %549 = vmatprep.subr.bf16.mxu0 %v620_v28 }
  0x1e   :  { %577 = vmatprep.subr.bf16.mxu1 %v621_v29 }
  0x20   :  { %550 = vmatpush3.bf16.msra.mxu0 %v622_v30 }
  0x21   :  { %578 = vmatpush3.bf16.msra.mxu1 %v623_v31 }
  0x23   :  { %365 = vmatmul.mubr.bf16.vlgmr.msra.gmra.mrb[0].mxu0 %v624_v32 }
  0x24   :  { %414 = vmatmul.mubr.bf16.vlgmr.msra.gmra.mrb[0].mxu1 %v627_v34  ;;  %372 = vmatprep.mubr.bf16.mxu0 %v630_v36 }
  0x25   :  { %421 = vmatprep.mubr.bf16.mxu1 %v632_v37 }
  0x2b   :  { %373 = vmatmul.mubr.bf16.gmra.mrb[4].mxu0 %v634_v38 }
  0x2c   :  { %422 = vmatmul.mubr.bf16.gmra.mrb[4].mxu1 %v635_v39 }
  0xf6   :  { %v551_v41 = vpop.f32.mrb[0].mxu0 }
  0xf7   :  { %v579_v42 = vpop.f32.mrb[0].mxu1  ;;  %v552_v43 = vpop.f32.mrb[1].mxu0 }
  0xf8   :  { %v553_v44 = vadd.f32 %v552_v43, %v551_v41  ;;  %v580_v45 = vpop.f32.mrb[1].mxu1  ;;  %v554_v46 = vpop.f32.mrb[2].mxu0 }
  0xf9   :  { %v581_v47 = vadd.f32 %v580_v45, %v579_v42  ;;  %v582_v48 = vpop.f32.mrb[2].mxu1  ;;  %v555_v49 = vpop.f32.mrb[3].mxu0 }
  0xfa   :  { %v556_v51 = vadd.f32 %v555_v49, %v554_v46  ;;  %v583_v52 = vpop.f32.mrb[3].mxu1 }
  0xfb   :  { %v416_v53 = vadd.f32 %v581_v47, %v553_v44  ;;  %v584_v54 = vadd.f32 %v583_v52, %v582_v48 }
  0xfd   :  { %v430_v56 = vadd.f32 %v416_v53, %v24_v50  ;;  %v419_v57 = vadd.f32 %v584_v54, %v556_v51 }
  0xfe   :  { %v557_v58 = vpop.f32.mrb[4].mxu0 }
  0xff   :  { %435 = vst.msk [vmem:[#allocation2] sm:$0xff] %vm19_vm0, %v430_v56  ;;  %v431_v59 = vadd.f32 %v419_v57, %v25_v55  ;;  %v585_v60 = vpop.f32.mrb[4].mxu1  ;;  %v558_v61 = vpop.f32.mrb[5].mxu0 }
 0x100   :  { %v559_v62 = vadd.f32 %v558_v61, %v557_v58  ;;  %v586_v63 = vpop.f32.mrb[5].mxu1  ;;  %v560_v0 = vpop.f32.mrb[6].mxu0 }
 0x101   :  { %436 = vst.msk [vmem:[#allocation2 + $0x8] sm:$0xff] %vm19_vm0, %v431_v59  ;;  %v587_v1 = vadd.f32 %v586_v63, %v585_v60  ;;  %v588_v2 = vpop.f32.mrb[6].mxu1  ;;  %v561_v3 = vpop.f32.mrb[7].mxu0 }
 0x102   :  { %v562_v5 = vadd.f32 %v561_v3, %v560_v0  ;;  %v589_v6 = vpop.f32.mrb[7].mxu1 }
 0x103   :  { %v424_v7 = vadd.f32 %v587_v1, %v559_v62  ;;  %v590_v8 = vadd.f32 %v589_v6, %v588_v2 }
 0x105   :  { %v432_v11 = vadd.f32 %v424_v7, %v26_v4  ;;  %v427_v12 = vadd.f32 %v590_v8, %v562_v5 }
 0x106   :  { %v442_v13 = vld [vmem:[#allocation2] sm:$0xff] }
 0x107   :  { %v453_v14 = vadd.f32 %v526_v9, %v442_v13  ;;  %437 = vst.msk [vmem:[#allocation2 + $0x10] sm:$0xff] %vm19_vm0, %v432_v11  ;;  %v433_v15 = vadd.f32 %v427_v12, %v27_v10 }
 0x108   :  { %v443_v16 = vld [vmem:[#allocation2 + $0x8] sm:$0xff] }
 0x109   :  { %v457_v17 = vmax.f32 %v453_v14, 0.0  ;;  %v454_v18 = vadd.f32 %v526_v9, %v443_v16  ;;  %438 = vst.msk [vmem:[#allocation2 + $0x18] sm:$0xff] %vm19_vm0, %v433_v15 }
 0x10b   :  { %v531_v19 = vpack.c.bf16 %v457_v17, %v457_v17  ;;  %v458_v20 = vmax.f32 %v454_v18, 0.0 }
 0x10d   :  { %478 = vst.msk [vmem:[%s803_s3] sm:$0xf] %vm477_vm1, %v531_v19  ;;  %v532_v21 = vpack.c.bf16 %v458_v20, %v458_v20 }
 0x10e   :  { %v444_v22 = vld [vmem:[#allocation2 + $0x10] sm:$0xff] }
 0x10f   :  { %479 = vst.msk [vmem:[%s803_s3 + $0x4] sm:$0xf] %vm477_vm1, %v532_v21  ;;  %v455_v23 = vadd.f32 %v526_v9, %v444_v22 }
 0x110   :  { %v445_v24 = vld [vmem:[#allocation2 + $0x18] sm:$0xff] }
 0x111   :  { %v459_v25 = vmax.f32 %v455_v23, 0.0  ;;  %v456_v26 = vadd.f32 %v526_v9, %v445_v24 }
 0x113   :  { %v533_v27 = vpack.c.bf16 %v459_v25, %v459_v25  ;;  %v460_v28 = vmax.f32 %v456_v26, 0.0 }
 0x115   :  { %480 = vst.msk [vmem:[%s803_s3 + $0x8] sm:$0xf] %vm477_vm1, %v533_v27  ;;  %v534_v29 = vpack.c.bf16 %v460_v28, %v460_v28 }
 0x117   :  { %481 = vst.msk [vmem:[%s803_s3 + $0xc] sm:$0xf] %vm477_vm1, %v534_v29 }

// kernel: invoice_forgery_forward.10
= control target key start
LH: loop header
LB: loop body
LE: loop exit
PB: predicated region body
PF: predicated region fallthrough
CT: control target
= control target key end

     0   :  { %v762_v3 = vmov 0   ;;  %s1007_s2 = inlined_call_operand.vmem [shape: bf16[128,1024], index: 2, kind: input, shape index: {}]   ;;  %s1008_s0 = inlined_call_operand.vmem [shape: f32[2,256], index: 0, kind: input, shape index: {}]   ;;  %s1009_s1 = inlined_call_operand.vmem [shape: f32[2,128], index: 1, kind: input, shape index: {}]   ;;  %s1010_s3 = inlined_call_operand.vmem [shape: f32[1,1024], index: 3, kind: input, shape index: {}]   ;;  %s1011_s4 = inlined_call_operand.vmem [shape: bf16[2,1024], index: 4, kind: output, shape index: {}]  }
   0x1   :  { %v29_v0 = vld [vmem:[%s1007_s2] sm:$0xff]  ;;  %v30_v2 = vld [vmem:[%s1007_s2 + $0x8] sm:$0xff]  ;;  %487 = vmatprep.mubr.bf16.mxu0 %v762_v3  ;;  %528 = vmatprep.mubr.bf16.mxu1 %v762_v3 }
   0x2   :  { %v33_v1 = vld [vmem:[%s1007_s2 + $0x20] sm:$0xff]  ;;  %v34_v5 = vld [vmem:[%s1007_s2 + $0x28] sm:$0xff] }
   0x3   :  { %v691_v4 = vcombine.high %v29_v0, %v33_v1  ;;  %v690_v6 = vcombine.low %v29_v0, %v33_v1  ;;  %v37_v7 = vld [vmem:[%s1007_s2 + $0x40] sm:$0xff]  ;;  %v693_v9 = vcombine.high %v30_v2, %v34_v5  ;;  %v692_v10 = vcombine.low %v30_v2, %v34_v5  ;;  %v38_v12 = vld [vmem:[%s1007_s2 + $0x48] sm:$0xff]  ;;  %v31_v5 = vld [vmem:[%s1007_s2 + $0x10] sm:$0xff] }
   0x4   :  { %v41_v8 = vld [vmem:[%s1007_s2 + $0x60] sm:$0xff]  ;;  %v42_v13 = vld [vmem:[%s1007_s2 + $0x68] sm:$0xff] }
   0x5   :  { %v699_v11 = vcombine.high %v37_v7, %v41_v8  ;;  %v45_v14 = vld [vmem:[%s1007_s2 + $0x80] sm:$0xff]  ;;  %455 = vmatprep.subr.bf16.mxu0 %v691_v4  ;;  %v701_v15 = vcombine.high %v38_v12, %v42_v13  ;;  %v46_v17 = vld [vmem:[%s1007_s2 + $0x88] sm:$0xff]  ;;  %496 = vmatprep.subr.bf16.mxu1 %v693_v9  ;;  %v698_v19 = vcombine.low %v37_v7, %v41_v8  ;;  %v32_v8 = vld [vmem:[%s1007_s2 + $0x18] sm:$0xff] }
   0x6   :  { %v49_v16 = vld [vmem:[%s1007_s2 + $0xa0] sm:$0xff]  ;;  %v50_v18 = vld [vmem:[%s1007_s2 + $0xa8] sm:$0xff]  ;;  %456 = vmatpush1.bf16.msra.mxu0 %v690_v6  ;;  %497 = vmatpush1.bf16.msra.mxu1 %v692_v10  ;;  %v700_v20 = vcombine.low %v38_v12, %v42_v13  ;;  %v35_v6 = vld [vmem:[%s1007_s2 + $0x30] sm:$0xff] }
   0x7   :  { %457 = vmatprep.subr.bf16.mxu0 %v699_v11  ;;  %v707_v21 = vcombine.high %v45_v14, %v49_v16  ;;  %498 = vmatprep.subr.bf16.mxu1 %v701_v15  ;;  %v709_v22 = vcombine.high %v46_v17, %v50_v18  ;;  %v53_v23 = vld [vmem:[%s1007_s2 + $0xc0] sm:$0xff]  ;;  %v54_v25 = vld [vmem:[%s1007_s2 + $0xc8] sm:$0xff]  ;;  %v706_v27 = vcombine.low %v45_v14, %v49_v16  ;;  %v36_v9 = vld [vmem:[%s1007_s2 + $0x38] sm:$0xff] }
   0x8   :  { %v57_v24 = vld [vmem:[%s1007_s2 + $0xe0] sm:$0xff]  ;;  %v58_v26 = vld [vmem:[%s1007_s2 + $0xe8] sm:$0xff]  ;;  %v708_v28 = vcombine.low %v46_v17, %v50_v18  ;;  %v695_v13 = vcombine.high %v31_v5, %v35_v6  ;;  %v697_v15 = vcombine.high %v32_v8, %v36_v9  ;;  %v39_v16 = vld [vmem:[%s1007_s2 + $0x50] sm:$0xff] }
   0x9   :  { %v715_v29 = vcombine.high %v53_v23, %v57_v24  ;;  %v717_v30 = vcombine.high %v54_v25, %v58_v26  ;;  %v61_v31 = vld [vmem:[%s1007_s2 + $0x100] sm:$0xff]  ;;  %v62_v34 = vld [vmem:[%s1007_s2 + $0x108] sm:$0xff]  ;;  %v714_v37 = vcombine.low %v53_v23, %v57_v24  ;;  %v716_v38 = vcombine.low %v54_v25, %v58_v26  ;;  %v43_v17 = vld [vmem:[%s1007_s2 + $0x70] sm:$0xff] }
   0xa   :  { %458 = vmatpush1.bf16.msra.mxu0 %v698_v19  ;;  %499 = vmatpush1.bf16.msra.mxu1 %v700_v20  ;;  %v65_v32 = vld [vmem:[%s1007_s2 + $0x120] sm:$0xff]  ;;  %v66_v35 = vld [vmem:[%s1007_s2 + $0x128] sm:$0xff]  ;;  %v40_v18 = vld [vmem:[%s1007_s2 + $0x58] sm:$0xff]  ;;  %v703_v23 = vcombine.high %v39_v16, %v43_v17 }
   0xb   :  { %459 = vmatprep.subr.bf16.mxu0 %v707_v21  ;;  %500 = vmatprep.subr.bf16.mxu1 %v709_v22  ;;  %v848_v33 = vld [vmem:[%s1008_s0] sm:$0xf]  ;;  %v723_v39 = vcombine.high %v61_v31, %v65_v32  ;;  %v725_v41 = vcombine.high %v62_v34, %v66_v35  ;;  %v70_v44 = vld [vmem:[%s1007_s2 + $0x148] sm:$0xff]  ;;  %v722_v47 = vcombine.low %v61_v31, %v65_v32  ;;  %v44_v19 = vld [vmem:[%s1007_s2 + $0x78] sm:$0xff] }
   0xc   :  { %v21_v36 = vrot.slane %v848_v33, 2  ;;  %v69_v42 = vld [vmem:[%s1007_s2 + $0x140] sm:$0xff]  ;;  %v74_v45 = vld [vmem:[%s1007_s2 + $0x168] sm:$0xff]  ;;  %v724_v48 = vcombine.low %v62_v34, %v66_v35  ;;  %v694_v21 = vcombine.low %v31_v5, %v35_v6  ;;  %v696_v22 = vcombine.low %v32_v8, %v36_v9  ;;  %v47_v25 = vld [vmem:[%s1007_s2 + $0x90] sm:$0xff] }
   0xd   :  { %v73_v43 = vld [vmem:[%s1007_s2 + $0x160] sm:$0xff]  ;;  %v733_v50 = vcombine.high %v70_v44, %v74_v45  ;;  %v78_v53 = vld [vmem:[%s1007_s2 + $0x188] sm:$0xff]  ;;  %v732_v56 = vcombine.low %v70_v44, %v74_v45  ;;  %v705_v24 = vcombine.high %v40_v18, %v44_v19  ;;  %v51_v26 = vld [vmem:[%s1007_s2 + $0xb0] sm:$0xff] }
   0xe   :  { %460 = vmatpush1.bf16.msra.mxu0 %v706_v27  ;;  %501 = vmatpush1.bf16.msra.mxu1 %v708_v28  ;;  %v23_v40 = vmul.f32 0.5, %v21_v36  ;;  %v731_v49 = vcombine.high %v69_v42, %v73_v43  ;;  %v77_v51 = vld [vmem:[%s1007_s2 + $0x180] sm:$0xff]  ;;  %v82_v54 = vld [vmem:[%s1007_s2 + $0x1a8] sm:$0xff]  ;;  %v730_v55 = vcombine.low %v69_v42, %v73_v43  ;;  %v48_v27 = vld [vmem:[%s1007_s2 + $0x98] sm:$0xff]  ;;  %v711_v31 = vcombine.high %v47_v25, %v51_v26 }
   0xf   :  { %461 = vmatprep.subr.bf16.mxu0 %v715_v29  ;;  %502 = vmatprep.subr.bf16.mxu1 %v717_v30  ;;  %v81_v52 = vld [vmem:[%s1007_s2 + $0x1a0] sm:$0xff]  ;;  %v741_v58 = vcombine.high %v78_v53, %v82_v54  ;;  %v86_v61 = vld [vmem:[%s1007_s2 + $0x1c8] sm:$0xff]  ;;  %v740_v0 = vcombine.low %v78_v53, %v82_v54  ;;  %v52_v28 = vld [vmem:[%s1007_s2 + $0xb8] sm:$0xff]  ;;  %v702_v29 = vcombine.low %v39_v16, %v43_v17  ;;  %v763_v17 = vmov 1966171168  }
  0x10   :  { %v24_v46 = vmul.f32 1.442695, %v23_v40  ;;  %v739_v57 = vcombine.high %v77_v51, %v81_v52  ;;  %v85_v59 = vld [vmem:[%s1007_s2 + $0x1c0] sm:$0xff]  ;;  %v90_v62 = vld [vmem:[%s1007_s2 + $0x1e8] sm:$0xff]  ;;  %v738_v63 = vcombine.low %v77_v51, %v81_v52  ;;  %v704_v30 = vcombine.low %v40_v18, %v44_v19  ;;  %v59_v34 = vld [vmem:[%s1007_s2 + $0xf0] sm:$0xff] }
  0x11   :  { %v89_v60 = vld [vmem:[%s1007_s2 + $0x1e0] sm:$0xff]  ;;  %v749_v4 = vcombine.high %v86_v61, %v90_v62  ;;  %v748_v12 = vcombine.low %v86_v61, %v90_v62  ;;  %v713_v32 = vcombine.high %v48_v27, %v52_v28  ;;  %v56_v35 = vld [vmem:[%s1007_s2 + $0xd8] sm:$0xff]  ;;  %v67_v42 = vld [vmem:[%s1007_s2 + $0x130] sm:$0xff]  ;;  %v640_v18 = vunpack.c.l.s4 %v763_v17 }
  0x12   :  { %462 = vmatpush1.bf16.msra.mxu0 %v714_v37  ;;  %503 = vmatpush1.bf16.msra.mxu1 %v716_v38  ;;  %760 = vpow2.f32 %v24_v46  ;;  %v747_v1 = vcombine.high %v85_v59, %v89_v60  ;;  %v19_v2 = vld [vmem:[%s1009_s1] sm:$0x3]  ;;  %v746_v10 = vcombine.low %v85_v59, %v89_v60  ;;  %v60_v36 = vld [vmem:[%s1007_s2 + $0xf8] sm:$0xff]  ;;  %v710_v37 = vcombine.low %v47_v25, %v51_v26 }
  0x13   :  { %463 = vmatprep.subr.bf16.mxu0 %v723_v39  ;;  %504 = vmatprep.subr.bf16.mxu1 %v725_v41  ;;  %v712_v38 = vcombine.low %v48_v27, %v52_v28  ;;  %v721_v40 = vcombine.high %v56_v35, %v60_v36  ;;  %v63_v41 = vld [vmem:[%s1007_s2 + $0x110] sm:$0xff]  ;;  %v68_v43 = vld [vmem:[%s1007_s2 + $0x138] sm:$0xff]  ;;  %v720_v45 = vcombine.low %v56_v35, %v60_v36 }
  0x14   :  { %v727_v46 = vcombine.high %v63_v41, %v67_v42  ;;  %v76_v51 = vld [vmem:[%s1007_s2 + $0x178] sm:$0xff]  ;;  %v726_v52 = vcombine.low %v63_v41, %v67_v42 }
  0x15   :  { %v84_v59 = vld [vmem:[%s1007_s2 + $0x1b8] sm:$0xff] }
  0x16   :  { %464 = vmatpush1.bf16.msra.mxu0 %v722_v47  ;;  %505 = vmatpush1.bf16.msra.mxu1 %v724_v48  ;;  %v71_v48 = vld [vmem:[%s1007_s2 + $0x150] sm:$0xff] }
  0x17   :  { %465 = vmatprep.subr.bf16.mxu0 %v731_v49  ;;  %506 = vmatprep.subr.bf16.mxu1 %v733_v50  ;;  %v75_v49 = vld [vmem:[%s1007_s2 + $0x170] sm:$0xff]  ;;  %v72_v50 = vld [vmem:[%s1007_s2 + $0x158] sm:$0xff] }
  0x18   :  { %v735_v54 = vcombine.high %v71_v48, %v75_v49  ;;  %v734_v60 = vcombine.low %v71_v48, %v75_v49  ;;  %v736_v61 = vcombine.low %v72_v50, %v76_v51 }
  0x1a   :  { %466 = vmatpush1.bf16.msra.mxu0 %v730_v55  ;;  %507 = vmatpush1.bf16.msra.mxu1 %v732_v56  ;;  %v737_v55 = vcombine.high %v72_v50, %v76_v51  ;;  %v79_v56 = vld [vmem:[%s1007_s2 + $0x190] sm:$0xff] }
  0x1b   :  { %467 = vmatprep.subr.bf16.mxu0 %v739_v57  ;;  %508 = vmatprep.subr.bf16.mxu1 %v741_v58  ;;  %v83_v57 = vld [vmem:[%s1007_s2 + $0x1b0] sm:$0xff]  ;;  %v80_v58 = vld [vmem:[%s1007_s2 + $0x198] sm:$0xff] }
  0x1c   :  { %v761_v7 = vpop.eup %760  ;;  %v743_v62 = vcombine.high %v79_v56, %v83_v57  ;;  %v742_v5 = vcombine.low %v79_v56, %v83_v57  ;;  %v744_v6 = vcombine.low %v80_v58, %v84_v59 }
  0x1d   :  { %v26_v11 = vmul.f32 %v761_v7, %v19_v2  ;;  %v88_v2 = vld [vmem:[%s1007_s2 + $0x1d8] sm:$0xff] }
  0x1e   :  { %468 = vmatpush1.bf16.msra.mxu0 %v738_v63  ;;  %509 = vmatpush1.bf16.msra.mxu1 %v740_v0  ;;  %v745_v63 = vcombine.high %v80_v58, %v84_v59  ;;  %v87_v0 = vld [vmem:[%s1007_s2 + $0x1d0] sm:$0xff] }
  0x1f   :  { %469 = vmatprep.subr.bf16.mxu0 %v747_v1  ;;  %510 = vmatprep.subr.bf16.mxu1 %v749_v4  ;;  %v27_v14 = vadd.f32 %v26_v11, %v848_v33  ;;  %v55_v33 = vld [vmem:[%s1007_s2 + $0xd0] sm:$0xff]  ;;  %v92_v4 = vld [vmem:[%s1007_s2 + $0x1f8] sm:$0xff]  ;;  %v95_v11 = vlaneseq }
  0x20   :  { %v719_v39 = vcombine.high %v55_v33, %v59_v34  ;;  %v718_v44 = vcombine.low %v55_v33, %v59_v34  ;;  %v91_v1 = vld [vmem:[%s1007_s2 + $0x1f0] sm:$0xff]  ;;  %v753_v8 = vcombine.high %v88_v2, %v92_v4 }
  0x21   :  { %v921_v20 = vpack.c.bf16 %v27_v14, %v27_v14  ;;  %v751_v7 = vcombine.high %v87_v0, %v91_v1  ;;  %v750_v9 = vcombine.low %v87_v0, %v91_v1  ;;  %v93_v14 = vld [vmem:[%s1010_s3] sm:$0xff] }
  0x22   :  { %470 = vmatpush1.bf16.msra.mxu0 %v746_v10  ;;  %511 = vmatpush1.bf16.msra.mxu1 %v748_v12  ;;  %v752_v10 = vcombine.low %v88_v2, %v92_v4  ;;  %v96_v12 = vshrl.u32 %v95_v11, 7 }
  0x23   :  { %537 = vmatprep.subr.bf16.mxu0 %v695_v13  ;;  %578 = vmatprep.subr.bf16.mxu1 %v697_v15 }
  0x24   :  { %v97_v13 = vsub.s32 0, %v96_v12  ;;  %v105_v15 = vsub.s32 2, %v96_v12  ;;  %v101_v16 = vsub.s32 1, %v96_v12  ;;  %v109_v19 = vsub.s32 3, %v96_v12 }
  0x25   :  { %488 = vmatmul.mubr.bf16.vlgmr.msra.gmra.mrb[0].mxu0 %v921_v20  ;;  %529 = vmatmul.mubr.bf16.vlgmr.msra.gmra.mrb[0].mxu1 %v921_v20 }
  0x26   :  { %538 = vmatpush1.bf16.msra.mxu0 %v694_v21  ;;  %579 = vmatpush1.bf16.msra.mxu1 %v696_v22  ;;  %v98_v21 = vrot.slane %v93_v14, %v97_v13  ;;  %v106_v22 = vrot.slane %v93_v14, %v105_v15  ;;  %v110_v25 = vrot.slane %v93_v14, %v109_v19 }
  0x27   :  { %539 = vmatprep.subr.bf16.mxu0 %v703_v23  ;;  %580 = vmatprep.subr.bf16.mxu1 %v705_v24  ;;  %v102_v23 = vrot.slane %v93_v14, %v101_v16  ;;  %v641_v24 = vunpack.c.0.s8 %v640_v18 }
  0x28   :  { %569 = vmatprep.mubr.bf16.mxu0 %v762_v3  ;;  %610 = vmatprep.mubr.bf16.mxu1 %v762_v3  ;;  %v64_v3 = vld [vmem:[%s1007_s2 + $0x118] sm:$0xff] }
  0x29   :  { %v729_v47 = vcombine.high %v64_v3, %v68_v43  ;;  %v728_v53 = vcombine.low %v64_v3, %v68_v43  ;;  %v113_v3 = vsub.s32 4, %v96_v12  ;;  %v121_v43 = vsub.s32 6, %v96_v12 }
  0x2a   :  { %540 = vmatpush1.bf16.msra.mxu0 %v702_v29  ;;  %581 = vmatpush1.bf16.msra.mxu1 %v704_v30 }
  0x2b   :  { %541 = vmatprep.subr.bf16.mxu0 %v711_v31  ;;  %582 = vmatprep.subr.bf16.mxu1 %v713_v32  ;;  %v644_v31 = vsub.s32 %v641_v24, %v96_v12 }
  0x2e   :  { %542 = vmatpush1.bf16.msra.mxu0 %v710_v37  ;;  %583 = vmatpush1.bf16.msra.mxu1 %v712_v38 }
  0x2f   :  { %543 = vmatprep.subr.bf16.mxu0 %v719_v39  ;;  %584 = vmatprep.subr.bf16.mxu1 %v721_v40 }
  0x32   :  { %544 = vmatpush1.bf16.msra.mxu0 %v718_v44  ;;  %585 = vmatpush1.bf16.msra.mxu1 %v720_v45  ;;  %v117_v44 = vsub.s32 5, %v96_v12  ;;  %v125_v45 = vsub.s32 7, %v96_v12 }
  0x33   :  { %545 = vmatprep.subr.bf16.mxu0 %v727_v46  ;;  %586 = vmatprep.subr.bf16.mxu1 %v729_v47  ;;  %v114_v46 = vrot.slane %v93_v14, %v113_v3  ;;  %v122_v47 = vrot.slane %v93_v14, %v121_v43 }
  0x34   :  { %v118_v48 = vrot.slane %v93_v14, %v117_v44  ;;  %v126_v49 = vrot.slane %v93_v14, %v125_v45 }
  0x36   :  { %546 = vmatpush1.bf16.msra.mxu0 %v726_v52  ;;  %587 = vmatpush1.bf16.msra.mxu1 %v728_v53 }
  0x37   :  { %547 = vmatprep.subr.bf16.mxu0 %v735_v54  ;;  %588 = vmatprep.subr.bf16.mxu1 %v737_v55 }
  0x3a   :  { %548 = vmatpush1.bf16.msra.mxu0 %v734_v60  ;;  %589 = vmatpush1.bf16.msra.mxu1 %v736_v61 }
  0x3b   :  { %549 = vmatprep.subr.bf16.mxu0 %v743_v62  ;;  %590 = vmatprep.subr.bf16.mxu1 %v745_v63 }
  0x3e   :  { %550 = vmatpush1.bf16.msra.mxu0 %v742_v5  ;;  %591 = vmatpush1.bf16.msra.mxu1 %v744_v6 }
  0x3f   :  { %551 = vmatprep.subr.bf16.mxu0 %v751_v7  ;;  %592 = vmatprep.subr.bf16.mxu1 %v753_v8 }
  0x42   :  { %552 = vmatpush1.bf16.msra.mxu0 %v750_v9  ;;  %593 = vmatpush1.bf16.msra.mxu1 %v752_v10 }
  0x45   :  { %570 = vmatmul.mubr.bf16.vlgmr.msra.gmra.mrb[4].mxu0 %v921_v20  ;;  %611 = vmatmul.mubr.bf16.vlgmr.msra.gmra.mrb[4].mxu1 %v921_v20 }
  0xf8   :  { %v489_v26 = vpop.f32.mrb[0].mxu0  ;;  %v530_v20 = vpop.f32.mrb[0].mxu1 }
  0xf9   :  { %v490_v27 = vadd.f32 %v489_v26, %v98_v21  ;;  %v491_v28 = vpop.f32.mrb[1].mxu0  ;;  %v531_v29 = vadd.f32 %v530_v20, %v106_v22  ;;  %v532_v32 = vpop.f32.mrb[1].mxu1 }
  0xfa   :  { %v492_v30 = vadd.f32 %v491_v28, %v102_v23  ;;  %v493_v33 = vpop.f32.mrb[2].mxu0  ;;  %v533_v34 = vadd.f32 %v532_v32, %v110_v25  ;;  %v534_v35 = vpop.f32.mrb[2].mxu1 }
  0xfb   :  { %v494_v36 = vpop.f32.mrb[3].mxu0  ;;  %v535_v38 = vpop.f32.mrb[3].mxu1 }
  0xfc   :  { %v754_v37 = vpack.c.bf16 %v492_v30, %v490_v27  ;;  %v755_v39 = vpack.c.bf16 %v533_v34, %v531_v29 }
  0xfe   :  { %v645_v40 = vrot.slane %v754_v37, %v644_v31  ;;  %v652_v41 = vrot.slane %v755_v39, %v644_v31 }
 0x100   :  { %v667_v42 = vcombine.low %v645_v40, %v652_v41 }
 0x102   :  { %v675_v4 = vrot.slane %v667_v42, %v644_v31 }
 0x118   :  { %v571_v50 = vpop.f32.mrb[4].mxu0  ;;  %v612_v52 = vpop.f32.mrb[4].mxu1 }
 0x119   :  { %v572_v51 = vadd.f32 %v571_v50, %v114_v46  ;;  %v573_v53 = vpop.f32.mrb[5].mxu0  ;;  %v613_v54 = vadd.f32 %v612_v52, %v122_v47  ;;  %v614_v56 = vpop.f32.mrb[5].mxu1 }
 0x11a   :  { %v574_v55 = vadd.f32 %v573_v53, %v118_v48  ;;  %v575_v57 = vpop.f32.mrb[6].mxu0  ;;  %v615_v58 = vadd.f32 %v614_v56, %v126_v49  ;;  %v616_v59 = vpop.f32.mrb[6].mxu1 }
 0x11b   :  { %v576_v60 = vpop.f32.mrb[7].mxu0  ;;  %v617_v62 = vpop.f32.mrb[7].mxu1 }
 0x11c   :  { %v756_v61 = vpack.c.bf16 %v574_v55, %v572_v51  ;;  %v757_v63 = vpack.c.bf16 %v615_v58, %v613_v54 }
 0x11e   :  { %v659_v0 = vrot.slane %v756_v61, %v644_v31  ;;  %v666_v1 = vrot.slane %v757_v63, %v644_v31 }
 0x120   :  { %v668_v2 = vcombine.low %v659_v0, %v666_v1 }
 0x122   :  { %v682_v5 = vrot.slane %v668_v2, %v644_v31 }
 0x124   :  { %v683_v6 = vcombine.low %v675_v4, %v682_v5 }
 0x126   :  { %685 = vst [vmem:[%s1011_s4] sm:$0xff] %v683_v6 }

// kernel: invoice_forgery_forward.9
= control target key start
LH: loop header
LB: loop body
LE: loop exit
PB: predicated region body
PF: predicated region fallthrough
CT: control target
= control target key end

     0   :  { %s1947_s12 = smov 0   ;;  %s1949_s13 = smov 0   ;;  %s2358_s0 = inlined_call_operand.vmem [shape: bf16[2,1024], index: 0, kind: input, shape index: {}]   ;;  %s2359_s1 = inlined_call_operand.vmem [shape: bf16[1024,256], index: 1, kind: input, shape index: {}]   ;;  %s2360_s2 = inlined_call_operand.vmem [shape: f32[1,256], index: 2, kind: input, shape index: {}]   ;;  %s2361_s3 = inlined_call_operand.vmem [shape: f32[2,256], index: 3, kind: output, shape index: {}]  }
   0x1   :  { %s1951_s14 = smov 0   ;;  %s1953_s15 = smov 0  }
   0x2   :  { %s1955_s16 = smov 0  }
   0x3 LB: > { %s25_s17 = sadd.s32 1, %s1919_s15  ;;  %p67_p1 = scmp.ne.s32.totalorder %s1911_s13, %s1907_s12  ;;  %s1923_s16 = sphi %s1955_s16, %s13_s16   ;;  %s1919_s15 = sphi %s1953_s15, %s2365_s15   ;;  %s1915_s14 = sphi %s1951_s14, %s2364_s14   ;;  %s1911_s13 = sphi %s1949_s13, %s2363_s13   ;;  %s1907_s12 = sphi %s1947_s12, %s2362_s12  }
   0x4   : > { %p27_p0 = scmp.ge.s32.totalorder %s25_s17, 2  ;;  %p68_p2 = scmp.eq.s32.totalorder %s1923_s16, 0 }
   0x5   : > { %s60_s19 = sadd.s32 1, %s1911_s13  ;;  %p1617_p5 = scmp.ge.s32.totalorder %s1923_s16, 2 }
   0x6   : > { %s2367_s17 = smov (%p27_p0, %s25_s17), 0  ;;  %p69_p3 = por %p68_p2, %p67_p1 }
   0x7   : > { %s56_s18 = ssub.s32 %s1919_s15, %s2367_s17  ;;  %153 = sbr.rel (%p1617_p5) target bundleno = 103 (0x67), region = 20 }
   0x8   : > { %p58_p4 = scmp.eq.s32.totalorder %s56_s18, 0 }
   0xa   : > { %s1982_s20 = scalar_select %p58_p4, %s1911_s13, %s60_s19  }
   0xe   : > { %156 = sbr.rel (!%p69_p3) target bundleno = 103 (0x67), region = 24  ;;  %s158_s21 = sand.u32 (%p69_p3), 1, %s1911_s13  }
   0xf   : > { %s1619_s22 = sshll.u32 (%p69_p3), %s1919_s15, 2  ;;  %s1618_s23 = sshll.u32 (%p69_p3), %s158_s21, 9 }
  0x10   : > { %s1990_s26 = scalar_lea.vmem (%p69_p3), %s2359_s1, %s1619_s22  ;;  %s1994_s27 = scalar_lea.vmem (%p69_p3), [#allocation3], %s1618_s23 }
  0x11   : > { %v181_v0 = vld [vmem:[%s1990_s26] sm:$0xf] (%p69_p3)  ;;  %v183_v1 = vld [vmem:[%s1990_s26 + $0x8] sm:$0xf] (%p69_p3)  ;;  %v185_v2 = vld [vmem:[%s1990_s26 + $0x10] sm:$0xf] (%p69_p3) }
  0x12   : > { %182 = vst [vmem:[%s1994_s27] sm:$0xf] (%p69_p3), %v181_v0  ;;  %184 = vst [vmem:[%s1994_s27 + $0x4] sm:$0xf] (%p69_p3), %v183_v1  ;;  %v187_v3 = vld [vmem:[%s1990_s26 + $0x18] sm:$0xf] (%p69_p3) }
  0x13   : > { %v189_v4 = vld [vmem:[%s1990_s26 + $0x20] sm:$0xf] (%p69_p3)  ;;  %186 = vst [vmem:[%s1994_s27 + $0x8] sm:$0xf] (%p69_p3), %v185_v2  ;;  %188 = vst [vmem:[%s1994_s27 + $0xc] sm:$0xf] (%p69_p3), %v187_v3 }
  0x14   : > { %190 = vst [vmem:[%s1994_s27 + $0x10] sm:$0xf] (%p69_p3), %v189_v4  ;;  %v191_v5 = vld [vmem:[%s1990_s26 + $0x28] sm:$0xf] (%p69_p3)  ;;  %v193_v6 = vld [vmem:[%s1990_s26 + $0x30] sm:$0xf] (%p69_p3) }
  0x15   : > { %v195_v7 = vld [vmem:[%s1990_s26 + $0x38] sm:$0xf]  ;;  %192 = vst [vmem:[%s1994_s27 + $0x14] sm:$0xf] %v191_v5  ;;  %194 = vst [vmem:[%s1994_s27 + $0x18] sm:$0xf] %v193_v6 }
  0x16   : > { %196 = vst [vmem:[%s1994_s27 + $0x1c] sm:$0xf] %v195_v7  ;;  %v197_v8 = vld [vmem:[%s1990_s26 + $0x40] sm:$0xf]  ;;  %v199_v9 = vld [vmem:[%s1990_s26 + $0x48] sm:$0xf] }
  0x17   : > { %v201_v10 = vld [vmem:[%s1990_s26 + $0x50] sm:$0xf]  ;;  %198 = vst [vmem:[%s1994_s27 + $0x20] sm:$0xf] %v197_v8  ;;  %200 = vst [vmem:[%s1994_s27 + $0x24] sm:$0xf] %v199_v9 }
  0x18   : > { %202 = vst [vmem:[%s1994_s27 + $0x28] sm:$0xf] %v201_v10  ;;  %v203_v11 = vld [vmem:[%s1990_s26 + $0x58] sm:$0xf]  ;;  %v205_v12 = vld [vmem:[%s1990_s26 + $0x60] sm:$0xf] }
  0x19   : > { %v207_v13 = vld [vmem:[%s1990_s26 + $0x68] sm:$0xf]  ;;  %204 = vst [vmem:[%s1994_s27 + $0x2c] sm:$0xf] %v203_v11  ;;  %206 = vst [vmem:[%s1994_s27 + $0x30] sm:$0xf] %v205_v12 }
  0x1a   : > { %208 = vst [vmem:[%s1994_s27 + $0x34] sm:$0xf] %v207_v13  ;;  %v209_v14 = vld [vmem:[%s1990_s26 + $0x70] sm:$0xf]  ;;  %v211_v15 = vld [vmem:[%s1990_s26 + $0x78] sm:$0xf] }
  0x1b   : > { %v213_v16 = vld [vmem:[%s1990_s26 + $0x80] sm:$0xf]  ;;  %210 = vst [vmem:[%s1994_s27 + $0x38] sm:$0xf] %v209_v14  ;;  %212 = vst [vmem:[%s1994_s27 + $0x3c] sm:$0xf] %v211_v15 }
  0x1c   : > { %214 = vst [vmem:[%s1994_s27 + $0x40] sm:$0xf] %v213_v16  ;;  %v215_v17 = vld [vmem:[%s1990_s26 + $0x88] sm:$0xf]  ;;  %v217_v18 = vld [vmem:[%s1990_s26 + $0x90] sm:$0xf] }
  0x1d   : > { %v219_v19 = vld [vmem:[%s1990_s26 + $0x98] sm:$0xf]  ;;  %216 = vst [vmem:[%s1994_s27 + $0x44] sm:$0xf] %v215_v17  ;;  %218 = vst [vmem:[%s1994_s27 + $0x48] sm:$0xf] %v217_v18 }
  0x1e   : > { %220 = vst [vmem:[%s1994_s27 + $0x4c] sm:$0xf] %v219_v19  ;;  %v221_v20 = vld [vmem:[%s1990_s26 + $0xa0] sm:$0xf]  ;;  %v223_v21 = vld [vmem:[%s1990_s26 + $0xa8] sm:$0xf] }
  0x1f   : > { %v225_v22 = vld [vmem:[%s1990_s26 + $0xb0] sm:$0xf]  ;;  %222 = vst [vmem:[%s1994_s27 + $0x50] sm:$0xf] %v221_v20  ;;  %224 = vst [vmem:[%s1994_s27 + $0x54] sm:$0xf] %v223_v21 }
  0x20   : > { %226 = vst [vmem:[%s1994_s27 + $0x58] sm:$0xf] %v225_v22  ;;  %v227_v23 = vld [vmem:[%s1990_s26 + $0xb8] sm:$0xf]  ;;  %v229_v24 = vld [vmem:[%s1990_s26 + $0xc0] sm:$0xf] }
  0x21   : > { %v231_v25 = vld [vmem:[%s1990_s26 + $0xc8] sm:$0xf]  ;;  %228 = vst [vmem:[%s1994_s27 + $0x5c] sm:$0xf] %v227_v23  ;;  %230 = vst [vmem:[%s1994_s27 + $0x60] sm:$0xf] %v229_v24 }
  0x22   : > { %232 = vst [vmem:[%s1994_s27 + $0x64] sm:$0xf] %v231_v25  ;;  %v233_v26 = vld [vmem:[%s1990_s26 + $0xd0] sm:$0xf]  ;;  %v235_v27 = vld [vmem:[%s1990_s26 + $0xd8] sm:$0xf] }
  0x23   : > { %v237_v28 = vld [vmem:[%s1990_s26 + $0xe0] sm:$0xf]  ;;  %234 = vst [vmem:[%s1994_s27 + $0x68] sm:$0xf] %v233_v26  ;;  %236 = vst [vmem:[%s1994_s27 + $0x6c] sm:$0xf] %v235_v27 }
  0x24   : > { %238 = vst [vmem:[%s1994_s27 + $0x70] sm:$0xf] %v237_v28  ;;  %v239_v29 = vld [vmem:[%s1990_s26 + $0xe8] sm:$0xf]  ;;  %v241_v30 = vld [vmem:[%s1990_s26 + $0xf0] sm:$0xf] }
  0x25   : > { %v243_v31 = vld [vmem:[%s1990_s26 + $0xf8] sm:$0xf]  ;;  %240 = vst [vmem:[%s1994_s27 + $0x74] sm:$0xf] %v239_v29  ;;  %242 = vst [vmem:[%s1994_s27 + $0x78] sm:$0xf] %v241_v30 }
  0x26   : > { %244 = vst [vmem:[%s1994_s27 + $0x7c] sm:$0xf] %v243_v31  ;;  %v245_v32 = vld [vmem:[%s1990_s26 + $0x100] sm:$0xf]  ;;  %v247_v33 = vld [vmem:[%s1990_s26 + $0x108] sm:$0xf] }
  0x27   : > { %v249_v34 = vld [vmem:[%s1990_s26 + $0x110] sm:$0xf]  ;;  %246 = vst [vmem:[%s1994_s27 + $0x80] sm:$0xf] %v245_v32  ;;  %248 = vst [vmem:[%s1994_s27 + $0x84] sm:$0xf] %v247_v33 }
  0x28   : > { %250 = vst [vmem:[%s1994_s27 + $0x88] sm:$0xf] %v249_v34  ;;  %v251_v35 = vld [vmem:[%s1990_s26 + $0x118] sm:$0xf]  ;;  %v253_v36 = vld [vmem:[%s1990_s26 + $0x120] sm:$0xf] }
  0x29   : > { %v255_v37 = vld [vmem:[%s1990_s26 + $0x128] sm:$0xf]  ;;  %252 = vst [vmem:[%s1994_s27 + $0x8c] sm:$0xf] %v251_v35  ;;  %254 = vst [vmem:[%s1994_s27 + $0x90] sm:$0xf] %v253_v36 }
  0x2a   : > { %256 = vst [vmem:[%s1994_s27 + $0x94] sm:$0xf] %v255_v37  ;;  %v257_v38 = vld [vmem:[%s1990_s26 + $0x130] sm:$0xf]  ;;  %v259_v39 = vld [vmem:[%s1990_s26 + $0x138] sm:$0xf] }
  0x2b   : > { %v261_v40 = vld [vmem:[%s1990_s26 + $0x140] sm:$0xf]  ;;  %258 = vst [vmem:[%s1994_s27 + $0x98] sm:$0xf] %v257_v38  ;;  %260 = vst [vmem:[%s1994_s27 + $0x9c] sm:$0xf] %v259_v39 }
  0x2c   : > { %262 = vst [vmem:[%s1994_s27 + $0xa0] sm:$0xf] %v261_v40  ;;  %v263_v41 = vld [vmem:[%s1990_s26 + $0x148] sm:$0xf]  ;;  %v265_v42 = vld [vmem:[%s1990_s26 + $0x150] sm:$0xf] }
  0x2d   : > { %v267_v43 = vld [vmem:[%s1990_s26 + $0x158] sm:$0xf]  ;;  %264 = vst [vmem:[%s1994_s27 + $0xa4] sm:$0xf] %v263_v41  ;;  %266 = vst [vmem:[%s1994_s27 + $0xa8] sm:$0xf] %v265_v42 }
  0x2e   : > { %268 = vst [vmem:[%s1994_s27 + $0xac] sm:$0xf] %v267_v43  ;;  %v269_v44 = vld [vmem:[%s1990_s26 + $0x160] sm:$0xf]  ;;  %v271_v45 = vld [vmem:[%s1990_s26 + $0x168] sm:$0xf] }
  0x2f   : > { %v273_v46 = vld [vmem:[%s1990_s26 + $0x170] sm:$0xf]  ;;  %270 = vst [vmem:[%s1994_s27 + $0xb0] sm:$0xf] %v269_v44  ;;  %272 = vst [vmem:[%s1994_s27 + $0xb4] sm:$0xf] %v271_v45 }
  0x30   : > { %274 = vst [vmem:[%s1994_s27 + $0xb8] sm:$0xf] %v273_v46  ;;  %v275_v47 = vld [vmem:[%s1990_s26 + $0x178] sm:$0xf]  ;;  %v277_v48 = vld [vmem:[%s1990_s26 + $0x180] sm:$0xf] }
  0x31   : > { %v279_v49 = vld [vmem:[%s1990_s26 + $0x188] sm:$0xf]  ;;  %276 = vst [vmem:[%s1994_s27 + $0xbc] sm:$0xf] %v275_v47  ;;  %278 = vst [vmem:[%s1994_s27 + $0xc0] sm:$0xf] %v277_v48 }
  0x32   : > { %280 = vst [vmem:[%s1994_s27 + $0xc4] sm:$0xf] %v279_v49  ;;  %v281_v50 = vld [vmem:[%s1990_s26 + $0x190] sm:$0xf]  ;;  %v283_v51 = vld [vmem:[%s1990_s26 + $0x198] sm:$0xf] }
  0x33   : > { %v285_v52 = vld [vmem:[%s1990_s26 + $0x1a0] sm:$0xf]  ;;  %282 = vst [vmem:[%s1994_s27 + $0xc8] sm:$0xf] %v281_v50  ;;  %284 = vst [vmem:[%s1994_s27 + $0xcc] sm:$0xf] %v283_v51 }
  0x34   : > { %286 = vst [vmem:[%s1994_s27 + $0xd0] sm:$0xf] %v285_v52  ;;  %v287_v53 = vld [vmem:[%s1990_s26 + $0x1a8] sm:$0xf]  ;;  %v289_v54 = vld [vmem:[%s1990_s26 + $0x1b0] sm:$0xf] }
  0x35   : > { %v291_v55 = vld [vmem:[%s1990_s26 + $0x1b8] sm:$0xf]  ;;  %288 = vst [vmem:[%s1994_s27 + $0xd4] sm:$0xf] %v287_v53  ;;  %290 = vst [vmem:[%s1994_s27 + $0xd8] sm:$0xf] %v289_v54 }
  0x36   : > { %292 = vst [vmem:[%s1994_s27 + $0xdc] sm:$0xf] %v291_v55  ;;  %v293_v56 = vld [vmem:[%s1990_s26 + $0x1c0] sm:$0xf]  ;;  %v295_v57 = vld [vmem:[%s1990_s26 + $0x1c8] sm:$0xf] }
  0x37   : > { %v297_v58 = vld [vmem:[%s1990_s26 + $0x1d0] sm:$0xf]  ;;  %294 = vst [vmem:[%s1994_s27 + $0xe0] sm:$0xf] %v293_v56  ;;  %296 = vst [vmem:[%s1994_s27 + $0xe4] sm:$0xf] %v295_v57 }
  0x38   : > { %298 = vst [vmem:[%s1994_s27 + $0xe8] sm:$0xf] %v297_v58  ;;  %v299_v59 = vld [vmem:[%s1990_s26 + $0x1d8] sm:$0xf]  ;;  %v301_v60 = vld [vmem:[%s1990_s26 + $0x1e0] sm:$0xf] }
  0x39   : > { %v303_v61 = vld [vmem:[%s1990_s26 + $0x1e8] sm:$0xf]  ;;  %300 = vst [vmem:[%s1994_s27 + $0xec] sm:$0xf] %v299_v59  ;;  %302 = vst [vmem:[%s1994_s27 + $0xf0] sm:$0xf] %v301_v60 }
  0x3a   : > { %304 = vst [vmem:[%s1994_s27 + $0xf4] sm:$0xf] %v303_v61  ;;  %v305_v62 = vld [vmem:[%s1990_s26 + $0x1f0] sm:$0xf]  ;;  %v307_v63 = vld [vmem:[%s1990_s26 + $0x1f8] sm:$0xf] }
  0x3b   : > { %v309_v0 = vld [vmem:[%s1990_s26 + $0x200] sm:$0xf]  ;;  %306 = vst [vmem:[%s1994_s27 + $0xf8] sm:$0xf] %v305_v62  ;;  %308 = vst [vmem:[%s1994_s27 + $0xfc] sm:$0xf] %v307_v63 }
  0x3c   : > { %310 = vst [vmem:[%s1994_s27 + $0x100] sm:$0xf] %v309_v0  ;;  %v311_v1 = vld [vmem:[%s1990_s26 + $0x208] sm:$0xf]  ;;  %v313_v2 = vld [vmem:[%s1990_s26 + $0x210] sm:$0xf] }
  0x3d   : > { %v315_v3 = vld [vmem:[%s1990_s26 + $0x218] sm:$0xf]  ;;  %312 = vst [vmem:[%s1994_s27 + $0x104] sm:$0xf] %v311_v1  ;;  %314 = vst [vmem:[%s1994_s27 + $0x108] sm:$0xf] %v313_v2 }
  0x3e   : > { %316 = vst [vmem:[%s1994_s27 + $0x10c] sm:$0xf] %v315_v3  ;;  %v317_v4 = vld [vmem:[%s1990_s26 + $0x220] sm:$0xf]  ;;  %v319_v5 = vld [vmem:[%s1990_s26 + $0x228] sm:$0xf] }
  0x3f   : > { %v321_v6 = vld [vmem:[%s1990_s26 + $0x230] sm:$0xf]  ;;  %318 = vst [vmem:[%s1994_s27 + $0x110] sm:$0xf] %v317_v4  ;;  %320 = vst [vmem:[%s1994_s27 + $0x114] sm:$0xf] %v319_v5 }
  0x40   : > { %322 = vst [vmem:[%s1994_s27 + $0x118] sm:$0xf] %v321_v6  ;;  %v323_v7 = vld [vmem:[%s1990_s26 + $0x238] sm:$0xf]  ;;  %v325_v8 = vld [vmem:[%s1990_s26 + $0x240] sm:$0xf] }
  0x41   : > { %v327_v9 = vld [vmem:[%s1990_s26 + $0x248] sm:$0xf]  ;;  %324 = vst [vmem:[%s1994_s27 + $0x11c] sm:$0xf] %v323_v7  ;;  %326 = vst [vmem:[%s1994_s27 + $0x120] sm:$0xf] %v325_v8 }
  0x42   : > { %328 = vst [vmem:[%s1994_s27 + $0x124] sm:$0xf] %v327_v9  ;;  %v329_v10 = vld [vmem:[%s1990_s26 + $0x250] sm:$0xf]  ;;  %v331_v11 = vld [vmem:[%s1990_s26 + $0x258] sm:$0xf] }
  0x43   : > { %v333_v12 = vld [vmem:[%s1990_s26 + $0x260] sm:$0xf]  ;;  %330 = vst [vmem:[%s1994_s27 + $0x128] sm:$0xf] %v329_v10  ;;  %332 = vst [vmem:[%s1994_s27 + $0x12c] sm:$0xf] %v331_v11 }
  0x44   : > { %334 = vst [vmem:[%s1994_s27 + $0x130] sm:$0xf] %v333_v12  ;;  %v335_v13 = vld [vmem:[%s1990_s26 + $0x268] sm:$0xf]  ;;  %v337_v14 = vld [vmem:[%s1990_s26 + $0x270] sm:$0xf] }
  0x45   : > { %v339_v15 = vld [vmem:[%s1990_s26 + $0x278] sm:$0xf]  ;;  %336 = vst [vmem:[%s1994_s27 + $0x134] sm:$0xf] %v335_v13  ;;  %338 = vst [vmem:[%s1994_s27 + $0x138] sm:$0xf] %v337_v14 }
  0x46   : > { %340 = vst [vmem:[%s1994_s27 + $0x13c] sm:$0xf] %v339_v15  ;;  %v341_v16 = vld [vmem:[%s1990_s26 + $0x280] sm:$0xf]  ;;  %v343_v17 = vld [vmem:[%s1990_s26 + $0x288] sm:$0xf] }
  0x47   : > { %v345_v18 = vld [vmem:[%s1990_s26 + $0x290] sm:$0xf]  ;;  %342 = vst [vmem:[%s1994_s27 + $0x140] sm:$0xf] %v341_v16  ;;  %344 = vst [vmem:[%s1994_s27 + $0x144] sm:$0xf] %v343_v17 }
  0x48   : > { %346 = vst [vmem:[%s1994_s27 + $0x148] sm:$0xf] %v345_v18  ;;  %v347_v19 = vld [vmem:[%s1990_s26 + $0x298] sm:$0xf]  ;;  %v349_v20 = vld [vmem:[%s1990_s26 + $0x2a0] sm:$0xf] }
  0x49   : > { %v351_v21 = vld [vmem:[%s1990_s26 + $0x2a8] sm:$0xf]  ;;  %348 = vst [vmem:[%s1994_s27 + $0x14c] sm:$0xf] %v347_v19  ;;  %350 = vst [vmem:[%s1994_s27 + $0x150] sm:$0xf] %v349_v20 }
  0x4a   : > { %352 = vst [vmem:[%s1994_s27 + $0x154] sm:$0xf] %v351_v21  ;;  %v353_v22 = vld [vmem:[%s1990_s26 + $0x2b0] sm:$0xf]  ;;  %v355_v23 = vld [vmem:[%s1990_s26 + $0x2b8] sm:$0xf] }
  0x4b   : > { %v357_v24 = vld [vmem:[%s1990_s26 + $0x2c0] sm:$0xf]  ;;  %354 = vst [vmem:[%s1994_s27 + $0x158] sm:$0xf] %v353_v22  ;;  %356 = vst [vmem:[%s1994_s27 + $0x15c] sm:$0xf] %v355_v23 }
  0x4c   : > { %358 = vst [vmem:[%s1994_s27 + $0x160] sm:$0xf] %v357_v24  ;;  %v359_v25 = vld [vmem:[%s1990_s26 + $0x2c8] sm:$0xf]  ;;  %v361_v26 = vld [vmem:[%s1990_s26 + $0x2d0] sm:$0xf] }
  0x4d   : > { %v363_v27 = vld [vmem:[%s1990_s26 + $0x2d8] sm:$0xf]  ;;  %360 = vst [vmem:[%s1994_s27 + $0x164] sm:$0xf] %v359_v25  ;;  %362 = vst [vmem:[%s1994_s27 + $0x168] sm:$0xf] %v361_v26 }
  0x4e   : > { %364 = vst [vmem:[%s1994_s27 + $0x16c] sm:$0xf] %v363_v27  ;;  %v365_v28 = vld [vmem:[%s1990_s26 + $0x2e0] sm:$0xf]  ;;  %v367_v29 = vld [vmem:[%s1990_s26 + $0x2e8] sm:$0xf] }
  0x4f   : > { %v369_v30 = vld [vmem:[%s1990_s26 + $0x2f0] sm:$0xf]  ;;  %366 = vst [vmem:[%s1994_s27 + $0x170] sm:$0xf] %v365_v28  ;;  %368 = vst [vmem:[%s1994_s27 + $0x174] sm:$0xf] %v367_v29 }
  0x50   : > { %370 = vst [vmem:[%s1994_s27 + $0x178] sm:$0xf] %v369_v30  ;;  %v371_v31 = vld [vmem:[%s1990_s26 + $0x2f8] sm:$0xf]  ;;  %v373_v32 = vld [vmem:[%s1990_s26 + $0x300] sm:$0xf] }
  0x51   : > { %v375_v33 = vld [vmem:[%s1990_s26 + $0x308] sm:$0xf]  ;;  %372 = vst [vmem:[%s1994_s27 + $0x17c] sm:$0xf] %v371_v31  ;;  %374 = vst [vmem:[%s1994_s27 + $0x180] sm:$0xf] %v373_v32 }
  0x52   : > { %376 = vst [vmem:[%s1994_s27 + $0x184] sm:$0xf] %v375_v33  ;;  %v377_v34 = vld [vmem:[%s1990_s26 + $0x310] sm:$0xf]  ;;  %v379_v35 = vld [vmem:[%s1990_s26 + $0x318] sm:$0xf] }
  0x53   : > { %v381_v36 = vld [vmem:[%s1990_s26 + $0x320] sm:$0xf]  ;;  %378 = vst [vmem:[%s1994_s27 + $0x188] sm:$0xf] %v377_v34  ;;  %380 = vst [vmem:[%s1994_s27 + $0x18c] sm:$0xf] %v379_v35 }
  0x54   : > { %382 = vst [vmem:[%s1994_s27 + $0x190] sm:$0xf] %v381_v36  ;;  %v383_v37 = vld [vmem:[%s1990_s26 + $0x328] sm:$0xf]  ;;  %v385_v38 = vld [vmem:[%s1990_s26 + $0x330] sm:$0xf] }
  0x55   : > { %v387_v39 = vld [vmem:[%s1990_s26 + $0x338] sm:$0xf]  ;;  %384 = vst [vmem:[%s1994_s27 + $0x194] sm:$0xf] %v383_v37  ;;  %386 = vst [vmem:[%s1994_s27 + $0x198] sm:$0xf] %v385_v38 }
  0x56   : > { %388 = vst [vmem:[%s1994_s27 + $0x19c] sm:$0xf] %v387_v39  ;;  %v389_v40 = vld [vmem:[%s1990_s26 + $0x340] sm:$0xf]  ;;  %v391_v41 = vld [vmem:[%s1990_s26 + $0x348] sm:$0xf] }
  0x57   : > { %v393_v42 = vld [vmem:[%s1990_s26 + $0x350] sm:$0xf]  ;;  %390 = vst [vmem:[%s1994_s27 + $0x1a0] sm:$0xf] %v389_v40  ;;  %392 = vst [vmem:[%s1994_s27 + $0x1a4] sm:$0xf] %v391_v41 }
  0x58   : > { %394 = vst [vmem:[%s1994_s27 + $0x1a8] sm:$0xf] %v393_v42  ;;  %v395_v43 = vld [vmem:[%s1990_s26 + $0x358] sm:$0xf]  ;;  %v397_v44 = vld [vmem:[%s1990_s26 + $0x360] sm:$0xf] }
  0x59   : > { %v399_v45 = vld [vmem:[%s1990_s26 + $0x368] sm:$0xf]  ;;  %396 = vst [vmem:[%s1994_s27 + $0x1ac] sm:$0xf] %v395_v43  ;;  %398 = vst [vmem:[%s1994_s27 + $0x1b0] sm:$0xf] %v397_v44 }
  0x5a   : > { %400 = vst [vmem:[%s1994_s27 + $0x1b4] sm:$0xf] %v399_v45  ;;  %v401_v46 = vld [vmem:[%s1990_s26 + $0x370] sm:$0xf]  ;;  %v403_v47 = vld [vmem:[%s1990_s26 + $0x378] sm:$0xf] }
  0x5b   : > { %v405_v48 = vld [vmem:[%s1990_s26 + $0x380] sm:$0xf]  ;;  %402 = vst [vmem:[%s1994_s27 + $0x1b8] sm:$0xf] %v401_v46  ;;  %404 = vst [vmem:[%s1994_s27 + $0x1bc] sm:$0xf] %v403_v47 }
  0x5c   : > { %406 = vst [vmem:[%s1994_s27 + $0x1c0] sm:$0xf] %v405_v48  ;;  %v407_v49 = vld [vmem:[%s1990_s26 + $0x388] sm:$0xf]  ;;  %v409_v50 = vld [vmem:[%s1990_s26 + $0x390] sm:$0xf] }
  0x5d   : > { %v411_v51 = vld [vmem:[%s1990_s26 + $0x398] sm:$0xf]  ;;  %408 = vst [vmem:[%s1994_s27 + $0x1c4] sm:$0xf] %v407_v49  ;;  %410 = vst [vmem:[%s1994_s27 + $0x1c8] sm:$0xf] %v409_v50 }
  0x5e   : > { %412 = vst [vmem:[%s1994_s27 + $0x1cc] sm:$0xf] %v411_v51  ;;  %v413_v52 = vld [vmem:[%s1990_s26 + $0x3a0] sm:$0xf]  ;;  %v415_v53 = vld [vmem:[%s1990_s26 + $0x3a8] sm:$0xf] }
  0x5f   : > { %v417_v54 = vld [vmem:[%s1990_s26 + $0x3b0] sm:$0xf]  ;;  %414 = vst [vmem:[%s1994_s27 + $0x1d0] sm:$0xf] %v413_v52  ;;  %416 = vst [vmem:[%s1994_s27 + $0x1d4] sm:$0xf] %v415_v53 }
  0x60   : > { %418 = vst [vmem:[%s1994_s27 + $0x1d8] sm:$0xf] %v417_v54  ;;  %v419_v55 = vld [vmem:[%s1990_s26 + $0x3b8] sm:$0xf]  ;;  %v421_v56 = vld [vmem:[%s1990_s26 + $0x3c0] sm:$0xf] }
  0x61   : > { %v423_v57 = vld [vmem:[%s1990_s26 + $0x3c8] sm:$0xf]  ;;  %420 = vst [vmem:[%s1994_s27 + $0x1dc] sm:$0xf] %v419_v55  ;;  %422 = vst [vmem:[%s1994_s27 + $0x1e0] sm:$0xf] %v421_v56 }
  0x62   : > { %424 = vst [vmem:[%s1994_s27 + $0x1e4] sm:$0xf] %v423_v57  ;;  %v425_v58 = vld [vmem:[%s1990_s26 + $0x3d0] sm:$0xf]  ;;  %v427_v59 = vld [vmem:[%s1990_s26 + $0x3d8] sm:$0xf] }
  0x63   : > { %v429_v60 = vld [vmem:[%s1990_s26 + $0x3e0] sm:$0xf]  ;;  %426 = vst [vmem:[%s1994_s27 + $0x1e8] sm:$0xf] %v425_v58  ;;  %428 = vst [vmem:[%s1994_s27 + $0x1ec] sm:$0xf] %v427_v59 }
  0x64   : > { %430 = vst [vmem:[%s1994_s27 + $0x1f0] sm:$0xf] %v429_v60  ;;  %v431_v61 = vld [vmem:[%s1990_s26 + $0x3e8] sm:$0xf]  ;;  %v433_v62 = vld [vmem:[%s1990_s26 + $0x3f0] sm:$0xf] }
  0x65   : > { %v435_v63 = vld [vmem:[%s1990_s26 + $0x3f8] sm:$0xf]  ;;  %432 = vst [vmem:[%s1994_s27 + $0x1f4] sm:$0xf] %v431_v61  ;;  %434 = vst [vmem:[%s1994_s27 + $0x1f8] sm:$0xf] %v433_v62 }
  0x66   : > { %436 = vst [vmem:[%s1994_s27 + $0x1fc] sm:$0xf] %v435_v63 }
  0x67 PF: > { %p1620_p6 = scmp.ge.s32.totalorder %s1923_s16, 1  ;;  %p720_p7 = scmp.lt.s32.totalorder %s1923_s16, 3 }
  0x69   : > { %p721_p8 = pnand %p1620_p6, %p720_p7 }
  0x6a   : > { %s727_s28 = sand.u32 (!%p721_p8), 1, %s1907_s12   ;;  %v910_v0 = vlaneseq (!%p721_p8)  ;;  %v1925_v1 = vmov (!%p721_p8), 1966171168   ;;  %v776_v3 = vld [vmem:[%s2358_s0] sm:$0xff] (!%p721_p8)  ;;  %p762_p9 = scmp.lt.s32.totalorder (!%p721_p8), %s1915_s14, 1 }
  0x6b   : > { %724 = sbr.rel (%p721_p8) target bundleno = 407 (0x197), region = 69  ;;  %s1621_s29 = sshll.u32 (!%p721_p8), %s727_s28, 9  ;;  %v908_v2 = vunpack.c.l.s4 (!%p721_p8), %v1925_v1  ;;  %v906_v30 = vcombine.high (!%p721_p8), %v776_v3, %v776_v3 }
  0x6c   : > { %v911_v4 = vshrl.u32 (!%p721_p8), %v910_v0, 7  ;;  %s2256_s5 = scalar_lea.vmem (!%p721_p8), [#allocation3], %s1621_s29 }
  0x6d   : > { %v1820_v5 = vld [vmem:[%s2256_s5 + $0x40] sm:$0xff] (!%p721_p8)   ;;  %v909_v6 = vunpack.c.0.s8 (!%p721_p8), %v908_v2  ;;  %v1824_v11 = vld [vmem:[%s2256_s5 + $0x48] sm:$0xff] (!%p721_p8)   ;;  %v1828_v17 = vld [vmem:[%s2256_s5 + $0x50] sm:$0xff] (!%p721_p8)  }
  0x6e   : > { %v1821_v7 = vld [vmem:[%s2256_s5 + $0xc0] sm:$0xff] (!%p721_p8)   ;;  %1690 = vmatprep.subr.bf16.mxu0 (!%p721_p8), %v1820_v5  ;;  %v1825_v13 = vld [vmem:[%s2256_s5 + $0xc8] sm:$0xff] (!%p721_p8)   ;;  %v1829_v19 = vld [vmem:[%s2256_s5 + $0xd0] sm:$0xff] (!%p721_p8)  }
  0x6f   : > { %v1822_v8 = vld [vmem:[%s2256_s5] sm:$0xff] (!%p721_p8)   ;;  %v2261_v9 = vsub.s32 (!%p721_p8), %v909_v6, %v911_v4  ;;  %1712 = vmatprep.subr.bf16.mxu1 (!%p721_p8), %v1821_v7  ;;  %v1826_v14 = vld [vmem:[%s2256_s5 + $0x8] sm:$0xff] (!%p721_p8)   ;;  %v1830_v20 = vld [vmem:[%s2256_s5 + $0x10] sm:$0xff] (!%p721_p8)  }
  0x70   : > { %v1823_v10 = vld [vmem:[%s2256_s5 + $0x80] sm:$0xff] (!%p721_p8)   ;;  %1691 = vmatpush3.bf16.msra.mxu0 (!%p721_p8), %v1822_v8  ;;  %v1827_v16 = vld [vmem:[%s2256_s5 + $0x88] sm:$0xff] (!%p721_p8)   ;;  %v1831_v22 = vld [vmem:[%s2256_s5 + $0x90] sm:$0xff] (!%p721_p8)  }
  0x71   : > { %v913_v12 = vrot.slane (!%p721_p8), %v776_v3, %v2261_v9  ;;  %1713 = vmatpush3.bf16.msra.mxu1 (!%p721_p8), %v1823_v10  ;;  %1692 = vmatprep.subr.bf16.mxu0 (!%p721_p8), %v1824_v11  ;;  %v1832_v23 = vld [vmem:[%s2256_s5 + $0x58] sm:$0xff] (!%p721_p8)   ;;  %v1836_v27 = vld [vmem:[%s2256_s5 + $0x60] sm:$0xff] (!%p721_p8)   ;;  %v1840_v32 = vld [vmem:[%s2256_s5 + $0x68] sm:$0xff] (!%p721_p8)   ;;  %v2286_v35 = vrot.slane (!%p721_p8), %v906_v30, %v2261_v9 }
  0x72   : > { %1714 = vmatprep.subr.bf16.mxu1 %v1825_v13  ;;  %v1833_v24 = vld [vmem:[%s2256_s5 + $0xd8] sm:$0xff]   ;;  %v1837_v28 = vld [vmem:[%s2256_s5 + $0xe0] sm:$0xff]   ;;  %v1841_v33 = vld [vmem:[%s2256_s5 + $0xe8] sm:$0xff]   ;;  %s2369_s14 = smov (!%p762_p9, %s1915_s14), 1 }
  0x73   : > { %v921_v15 = vcombine.high %v913_v12, %v913_v12  ;;  %v1834_v25 = vld [vmem:[%s2256_s5 + $0x18] sm:$0xff]   ;;  %v1838_v29 = vld [vmem:[%s2256_s5 + $0x20] sm:$0xff]   ;;  %v1842_v34 = vld [vmem:[%s2256_s5 + $0x28] sm:$0xff]   ;;  %v922_v40 = vcombine.high %v2286_v35, %v2286_v35  ;;  %v929_v43 = vrot.slane %v913_v12, %v2261_v9  ;;  %s764_s8 = scalar_lea.vmem %s2360_s2, %s2369_s14  ;;  %s1622_s9 = sshll.u32 %s2369_s14, 1 }
  0x74   : > { %1693 = vmatpush3.bf16.msra.mxu0 %v1826_v14  ;;  %v1835_v26 = vld [vmem:[%s2256_s5 + $0x98] sm:$0xff]   ;;  %v1839_v31 = vld [vmem:[%s2256_s5 + $0xa0] sm:$0xff]   ;;  %v1843_v36 = vld [vmem:[%s2256_s5 + $0xa8] sm:$0xff]   ;;  %s768_s12 = scalar_lea.vmem %s2361_s3, %s1622_s9 }
  0x75   : > { %v943_v18 = vrot.slane %v921_v15, %v2261_v9  ;;  %1715 = vmatpush3.bf16.msra.mxu1 %v1827_v16  ;;  %1694 = vmatprep.subr.bf16.mxu0 %v1828_v17  ;;  %v1844_v37 = vld [vmem:[%s2256_s5 + $0x70] sm:$0xff]   ;;  %v1848_v42 = vld [vmem:[%s2256_s5 + $0x78] sm:$0xff]   ;;  %v950_v46 = vrot.slane %v922_v40, %v2261_v9  ;;  %v951_v48 = vcombine.high %v929_v43, %v929_v43  ;;  %v1853_v49 = vld [vmem:[%s2256_s5 + $0x140] sm:$0xff]  }
  0x76   : > { %1716 = vmatprep.subr.bf16.mxu1 %v1829_v19  ;;  %v1845_v38 = vld [vmem:[%s2256_s5 + $0xf0] sm:$0xff]   ;;  %v1849_v44 = vld [vmem:[%s2256_s5 + $0xf8] sm:$0xff]   ;;  %v1854_v50 = vld [vmem:[%s2256_s5 + $0x1c0] sm:$0xff]   ;;  %v936_v16 = vrot.slane %v2286_v35, %v2261_v9 }
  0x77   : > { %1379 = vmatprep.mubr.bf16.mxu0 %v943_v18  ;;  %v953_v21 = vcombine.high %v943_v18, %v943_v18  ;;  %v1846_v39 = vld [vmem:[%s2256_s5 + $0x30] sm:$0xff]   ;;  %v1850_v45 = vld [vmem:[%s2256_s5 + $0x38] sm:$0xff]   ;;  %v1855_v51 = vld [vmem:[%s2256_s5 + $0x100] sm:$0xff]   ;;  %v954_v52 = vcombine.high %v950_v46, %v950_v46 }
  0x78   : > { %1695 = vmatpush3.bf16.msra.mxu0 %v1830_v20  ;;  %v1847_v41 = vld [vmem:[%s2256_s5 + $0xb0] sm:$0xff]   ;;  %v1851_v47 = vld [vmem:[%s2256_s5 + $0xb8] sm:$0xff]   ;;  %v1856_v53 = vld [vmem:[%s2256_s5 + $0x180] sm:$0xff]   ;;  %v952_v20 = vcombine.high %v936_v16, %v936_v16 }
  0x79   : > { %1419 = vmatprep.mubr.bf16.mxu1 %v953_v21  ;;  %1717 = vmatpush3.bf16.msra.mxu1 %v1831_v22  ;;  %v1857_v54 = vld [vmem:[%s2256_s5 + $0x148] sm:$0xff]   ;;  %v1861_v58 = vld [vmem:[%s2256_s5 + $0x150] sm:$0xff]   ;;  %v1865_v62 = vld [vmem:[%s2256_s5 + $0x158] sm:$0xff]   ;;  %v1926_v21 = vmov 0.0  }
  0x7a   : > { %1696 = vmatprep.subr.bf16.mxu0 %v1832_v23  ;;  %1718 = vmatprep.subr.bf16.mxu1 %v1833_v24  ;;  %v1858_v55 = vld [vmem:[%s2256_s5 + $0x1c8] sm:$0xff]   ;;  %v1862_v59 = vld [vmem:[%s2256_s5 + $0x1d0] sm:$0xff]   ;;  %v1866_v63 = vld [vmem:[%s2256_s5 + $0x1d8] sm:$0xff]   ;;  %774 = vst [vmem:[#allocation2] sm:$0x3] %v1926_v21 }
  0x7b   : > { %v1859_v56 = vld [vmem:[%s2256_s5 + $0x108] sm:$0xff]   ;;  %v1863_v60 = vld [vmem:[%s2256_s5 + $0x110] sm:$0xff]   ;;  %v1867_v0 = vld [vmem:[%s2256_s5 + $0x118] sm:$0xff]  }
  0x7c   : > { %1697 = vmatpush3.bf16.msra.mxu0 %v1834_v25  ;;  %v1860_v57 = vld [vmem:[%s2256_s5 + $0x188] sm:$0xff]   ;;  %v1864_v61 = vld [vmem:[%s2256_s5 + $0x190] sm:$0xff]   ;;  %v1868_v1 = vld [vmem:[%s2256_s5 + $0x198] sm:$0xff]  }
  0x7d   : > { %1719 = vmatpush3.bf16.msra.mxu1 %v1835_v26  ;;  %1698 = vmatprep.subr.bf16.mxu0 %v1836_v27  ;;  %v1869_v2 = vld [vmem:[%s2256_s5 + $0x160] sm:$0xff]   ;;  %v1873_v6 = vld [vmem:[%s2256_s5 + $0x168] sm:$0xff]   ;;  %v1877_v11 = vld [vmem:[%s2256_s5 + $0x170] sm:$0xff]  }
  0x7e   : > { %1720 = vmatprep.subr.bf16.mxu1 %v1837_v28  ;;  %v1870_v3 = vld [vmem:[%s2256_s5 + $0x1e0] sm:$0xff]   ;;  %v1874_v7 = vld [vmem:[%s2256_s5 + $0x1e8] sm:$0xff]   ;;  %v1878_v12 = vld [vmem:[%s2256_s5 + $0x1f0] sm:$0xff]  }
  0x7f   : > { %v1871_v4 = vld [vmem:[%s2256_s5 + $0x120] sm:$0xff]   ;;  %v1875_v8 = vld [vmem:[%s2256_s5 + $0x128] sm:$0xff]   ;;  %v1879_v13 = vld [vmem:[%s2256_s5 + $0x130] sm:$0xff]  }
  0x80   : > { %1699 = vmatpush3.bf16.msra.mxu0 %v1838_v29  ;;  %v1872_v5 = vld [vmem:[%s2256_s5 + $0x1a0] sm:$0xff]   ;;  %v1876_v10 = vld [vmem:[%s2256_s5 + $0x1a8] sm:$0xff]   ;;  %v1880_v14 = vld [vmem:[%s2256_s5 + $0x1b0] sm:$0xff]  }
  0x81   : > { %1721 = vmatpush3.bf16.msra.mxu1 %v1839_v31  ;;  %1700 = vmatprep.subr.bf16.mxu0 %v1840_v32  ;;  %v1881_v15 = vld [vmem:[%s2256_s5 + $0x178] sm:$0xff]  }
  0x82   : > { %1722 = vmatprep.subr.bf16.mxu1 %v1841_v33  ;;  %v1882_v17 = vld [vmem:[%s2256_s5 + $0x1f8] sm:$0xff]  }
  0x83   : > { %v1883_v18 = vld [vmem:[%s2256_s5 + $0x138] sm:$0xff]  }
  0x84   : > { %1701 = vmatpush3.bf16.msra.mxu0 %v1842_v34  ;;  %v1884_v19 = vld [vmem:[%s2256_s5 + $0x1b8] sm:$0xff]  }
  0x85   : > { %1723 = vmatpush3.bf16.msra.mxu1 %v1843_v36  ;;  %1702 = vmatprep.subr.bf16.mxu0 %v1844_v37 }
  0x86   : > { %1724 = vmatprep.subr.bf16.mxu1 %v1845_v38 }
  0x88   : > { %1703 = vmatpush3.bf16.msra.mxu0 %v1846_v39 }
  0x89   : > { %1725 = vmatpush3.bf16.msra.mxu1 %v1847_v41  ;;  %1704 = vmatprep.subr.bf16.mxu0 %v1848_v42 }
  0x8a   : > { %1726 = vmatprep.subr.bf16.mxu1 %v1849_v44 }
  0x8c   : > { %1705 = vmatpush3.bf16.msra.mxu0 %v1850_v45 }
  0x8d   : > { %1727 = vmatpush3.bf16.msra.mxu1 %v1851_v47  ;;  %1734 = vmatprep.subr.bf16.mxu0 %v1853_v49 }
  0x8e   : > { %1756 = vmatprep.subr.bf16.mxu1 %v1854_v50 }
  0x8f   : > { %1380 = vmatmul.mubr.bf16.vlgmr.msra.gmra.mrb[0].mxu0 %v929_v43  ;;  %v775_v43 = vld [vmem:[#allocation2] sm:$0x3] }
  0x90   : > { %1420 = vmatmul.mubr.bf16.vlgmr.msra.gmra.mrb[0].mxu1 %v951_v48  ;;  %1735 = vmatpush3.bf16.msra.mxu0 %v1855_v51 }
  0x91   : > { %1757 = vmatpush3.bf16.msra.mxu1 %v1856_v53  ;;  %1459 = vmatprep.mubr.bf16.mxu0 %v950_v46  ;;  %v1687_v46 = vld [vmem:[%s764_s8] ss:$0 sm:$0xff] }
  0x92   : > { %1736 = vmatprep.subr.bf16.mxu0 %v1857_v54  ;;  %1499 = vmatprep.mubr.bf16.mxu1 %v954_v52 }
  0x93   : > { %1758 = vmatprep.subr.bf16.mxu1 %v1858_v55 }
  0x94   : > { %1737 = vmatpush3.bf16.msra.mxu0 %v1859_v56 }
  0x95   : > { %1759 = vmatpush3.bf16.msra.mxu1 %v1860_v57  ;;  %1738 = vmatprep.subr.bf16.mxu0 %v1861_v58 }
  0x96   : > { %1760 = vmatprep.subr.bf16.mxu1 %v1862_v59 }
  0x98   : > { %1739 = vmatpush3.bf16.msra.mxu0 %v1863_v60 }
  0x99   : > { %1761 = vmatpush3.bf16.msra.mxu1 %v1864_v61  ;;  %1740 = vmatprep.subr.bf16.mxu0 %v1865_v62 }
  0x9a   : > { %1762 = vmatprep.subr.bf16.mxu1 %v1866_v63 }
  0x9c   : > { %1741 = vmatpush3.bf16.msra.mxu0 %v1867_v0 }
  0x9d   : > { %1763 = vmatpush3.bf16.msra.mxu1 %v1868_v1  ;;  %1742 = vmatprep.subr.bf16.mxu0 %v1869_v2 }
  0x9e   : > { %1764 = vmatprep.subr.bf16.mxu1 %v1870_v3 }
  0xa0   : > { %1743 = vmatpush3.bf16.msra.mxu0 %v1871_v4 }
  0xa1   : > { %1765 = vmatpush3.bf16.msra.mxu1 %v1872_v5  ;;  %1744 = vmatprep.subr.bf16.mxu0 %v1873_v6 }
  0xa2   : > { %1766 = vmatprep.subr.bf16.mxu1 %v1874_v7 }
  0xa4   : > { %1745 = vmatpush3.bf16.msra.mxu0 %v1875_v8 }
  0xa5   : > { %1767 = vmatpush3.bf16.msra.mxu1 %v1876_v10  ;;  %1746 = vmatprep.subr.bf16.mxu0 %v1877_v11 }
  0xa6   : > { %1768 = vmatprep.subr.bf16.mxu1 %v1878_v12 }
  0xa8   : > { %1747 = vmatpush3.bf16.msra.mxu0 %v1879_v13 }
  0xa9   : > { %1769 = vmatpush3.bf16.msra.mxu1 %v1880_v14  ;;  %1748 = vmatprep.subr.bf16.mxu0 %v1881_v15 }
  0xaa   : > { %1770 = vmatprep.subr.bf16.mxu1 %v1882_v17 }
  0xac   : > { %1749 = vmatpush3.bf16.msra.mxu0 %v1883_v18 }
  0xad   : > { %1771 = vmatpush3.bf16.msra.mxu1 %v1884_v19 }
  0xaf   : > { %1460 = vmatmul.mubr.bf16.vlgmr.msra.gmra.mrb[4].mxu0 %v936_v16 }
  0xb0   : > { %1500 = vmatmul.mubr.bf16.vlgmr.msra.gmra.mrb[4].mxu1 %v952_v20 }
 0x162   : > { %v1706_v22 = vpop.f32.mrb[0].mxu0 }
 0x163   : > { %v1728_v23 = vpop.f32.mrb[0].mxu1  ;;  %v1707_v24 = vpop.f32.mrb[1].mxu0 }
 0x164   : > { %v1708_v25 = vadd.f32 %v1707_v24, %v1706_v22  ;;  %v1729_v26 = vpop.f32.mrb[1].mxu1  ;;  %v1709_v27 = vpop.f32.mrb[2].mxu0 }
 0x165   : > { %v1730_v9 = vadd.f32 %v1729_v26, %v1728_v23  ;;  %v1731_v28 = vpop.f32.mrb[2].mxu1  ;;  %v1710_v29 = vpop.f32.mrb[3].mxu0 }
 0x166   : > { %v1732_v30 = vpop.f32.mrb[3].mxu1 }
 0x167   : > { %v1422_v31 = vadd.f32 %v1730_v9, %v1708_v25 }
 0x182   : > { %v1750_v32 = vpop.f32.mrb[4].mxu0 }
 0x183   : > { %v1772_v33 = vpop.f32.mrb[4].mxu1  ;;  %v1751_v34 = vpop.f32.mrb[5].mxu0 }
 0x184   : > { %v1752_v35 = vadd.f32 %v1751_v34, %v1750_v32  ;;  %v1773_v36 = vpop.f32.mrb[5].mxu1  ;;  %v1753_v37 = vpop.f32.mrb[6].mxu0 }
 0x185   : > { %v1774_v38 = vadd.f32 %v1773_v36, %v1772_v33  ;;  %v1775_v39 = vpop.f32.mrb[6].mxu1  ;;  %v1754_v40 = vpop.f32.mrb[7].mxu0 }
 0x186   : > { %v1462_v41 = vadd.f32 %v1752_v35, %v1422_v31  ;;  %v1776_v42 = vpop.f32.mrb[7].mxu1 }
 0x188   : > { %v1502_v44 = vadd.f32 %v1774_v38, %v1462_v41 }
 0x18a   : > { %v1507_v45 = vadd.f32 %v1502_v44, %v775_v43 }
 0x18c   : > { %1508 = vst [vmem:[#allocation2] sm:$0x3] %v1507_v45 }
 0x193   : > { %v1512_v47 = vld [vmem:[#allocation2] sm:$0x3] }
 0x194   : > { %v1520_v48 = vadd.f32 %v1687_v46, %v1512_v47 }
 0x196   : > { %1521 = vst [vmem:[%s768_s12] sm:$0x3] %v1520_v48 }
 0x197 PF: > { %s13_s16 = sadd.s32 1, %s1923_s16   ;;  %s2362_s12 = smov %s1911_s13 }
 0x198   : > { %p10_p10 = scmp.ge.s32.totalorder %s13_s16, 4   ;;  %s2363_s13 = smov %s1982_s20 }
 0x199   : > { %s2364_s14 = smov %s1919_s15  ;;  %s2365_s15 = smov %s2367_s17 }
 0x19a   :  { %12 = sbr.rel (!%p10_p10) target bundleno = 3 (0x3), region = 122 }

// kernel: tile.13
= control target key start
LH: loop header
LB: loop body
LE: loop exit
PB: predicated region body
PF: predicated region fallthrough
CT: control target
= control target key end

     0   :  { %s22_s0 = inlined_call_operand.vmem [shape: f32[32], index: 0, kind: input, shape index: {}]   ;;  %s23_s1 = inlined_call_operand.vmem [shape: f32[4,32], index: 1, kind: output, shape index: {}]  }
   0x1   :  { %v4_v0 = vld [vmem:[%s22_s0] ss:$0 sm:$0xff] }
   0x2   :  { %5 = vst [vmem:[%s23_s1] sm:$0xf] %v4_v0 }

// kernel: tile.14
= control target key start
LH: loop header
LB: loop body
LE: loop exit
PB: predicated region body
PF: predicated region fallthrough
CT: control target
= control target key end

     0   :  { %vm7_vm0 = vcmask 261120   ;;  %s37_s8 = smov 32   ;;  %s38_s9 = smov 64   ;;  %vm13_vm1 = vcmask 1048320   ;;  %vm19_vm2 = vcmask 785920   ;;  %vm25_vm3 = vcmask 523520   ;;  %s55_s0 = inlined_call_operand.vmem [shape: f32[4,32], index: 0, kind: input, shape index: {}]   ;;  %s56_s1 = inlined_call_operand.vmem [shape: f32[1,128], index: 1, kind: output, shape index: {}]  }
   0x1   :  { %v4_v0 = vld [vmem:[%s55_s0] sm:$0xf]  ;;  %s36_s0 = smov 96  }
   0x2   :  { %5 = vst [vmem:[#allocation1] sm:$0xf] %v4_v0 }
   0x9   :  { %v10_v1 = vld [vmem:[#allocation1 + $0x3] sm:$0x1]   ;;  %v22_v2 = vld [vmem:[#allocation1 + $0x1] sm:$0x1]   ;;  %v6_v3 = vld [vmem:[#allocation1] sm:$0x1]  }
   0xa   :  { %11 = vrot.lane.b32.xlu0 %v10_v1, %s36_s0  ;;  %23 = vrot.lane.b32.xlu1 %v22_v2, %s37_s8  ;;  %v16_v4 = vld [vmem:[#allocation1 + $0x2] sm:$0x1]   ;;  %8 = vst.msk [vmem:[#allocation0] sm:$0x1] %vm7_vm0, %v6_v3  }
   0xe   :  { %17 = vrot.lane.b32.xlu0 %v16_v4, %s38_s9 }
  0x7c   :  { %v12_v5 = vpop.permute.xlu0 %11   ;;  %v24_v6 = vpop.permute.xlu1 %23  }
  0x7d   :  { %14 = vst.msk [vmem:[#allocation0] sm:$0x1] %vm13_vm1, %v12_v5  }
  0x80   :  { %v18_v7 = vpop.permute.xlu0 %17  }
  0x81   :  { %20 = vst.msk [vmem:[#allocation0] sm:$0x1] %vm19_vm2, %v18_v7  }
  0x82   :  { %26 = vst.msk [vmem:[#allocation0] sm:$0x1] %vm25_vm3, %v24_v6  }
  0x89   :  { %v30_v8 = vld [vmem:[#allocation0] sm:$0x1] }
  0x8a   :  { %32 = vst [vmem:[%s56_s1] sm:$0x1] %v30_v8 }

// kernel: invoice_forgery_forward.11
= control target key start
LH: loop header
LB: loop body
LE: loop exit
PB: predicated region body
PF: predicated region fallthrough
CT: control target
= control target key end

     0   :  { %vm377_vm0 = vcmask 523264   ;;  %s944_s1 = inlined_call_operand.vmem [shape: bf16[576,128], index: 1, kind: input, shape index: {}]   ;;  %s945_s0 = inlined_call_operand.vmem [shape: bf16[32,576], index: 0, kind: input, shape index: {}]   ;;  %s946_s2 = inlined_call_operand.vmem [shape: f32[1,128], index: 2, kind: input, shape index: {}]   ;;  %s947_s3 = inlined_call_operand.vmem [shape: bf16[32,128], index: 3, kind: output, shape index: {}]  }
   0x1   :  { %v727_v0 = vld [vmem:[%s944_s1 + $0x40] sm:$0xff]   ;;  %v731_v4 = vld [vmem:[%s944_s1 + $0x48] sm:$0xff]   ;;  %v735_v8 = vld [vmem:[%s944_s1 + $0x50] sm:$0xff]  }
   0x2   :  { %v728_v1 = vld [vmem:[%s944_s1 + $0xc0] sm:$0xff]   ;;  %653 = vmatprep.subr.bf16.mxu0 %v727_v0  ;;  %v732_v5 = vld [vmem:[%s944_s1 + $0xc8] sm:$0xff]   ;;  %v736_v9 = vld [vmem:[%s944_s1 + $0xd0] sm:$0xff]  }
   0x3   :  { %v729_v2 = vld [vmem:[%s944_s1] sm:$0xff]   ;;  %681 = vmatprep.subr.bf16.mxu1 %v728_v1  ;;  %v733_v6 = vld [vmem:[%s944_s1 + $0x8] sm:$0xff]   ;;  %v737_v10 = vld [vmem:[%s944_s1 + $0x10] sm:$0xff]  }
   0x4   :  { %v730_v3 = vld [vmem:[%s944_s1 + $0x80] sm:$0xff]   ;;  %654 = vmatpush3.bf16.msra.mxu0 %v729_v2  ;;  %v734_v7 = vld [vmem:[%s944_s1 + $0x88] sm:$0xff]   ;;  %v738_v11 = vld [vmem:[%s944_s1 + $0x90] sm:$0xff]  }
   0x5   :  { %682 = vmatpush3.bf16.msra.mxu1 %v730_v3  ;;  %655 = vmatprep.subr.bf16.mxu0 %v731_v4  ;;  %v739_v12 = vld [vmem:[%s944_s1 + $0x58] sm:$0xff]   ;;  %v743_v16 = vld [vmem:[%s944_s1 + $0x60] sm:$0xff]   ;;  %v747_v20 = vld [vmem:[%s944_s1 + $0x68] sm:$0xff]  }
   0x6   :  { %683 = vmatprep.subr.bf16.mxu1 %v732_v5  ;;  %v740_v13 = vld [vmem:[%s944_s1 + $0xd8] sm:$0xff]   ;;  %v744_v17 = vld [vmem:[%s944_s1 + $0xe0] sm:$0xff]   ;;  %v748_v21 = vld [vmem:[%s944_s1 + $0xe8] sm:$0xff]  }
   0x7   :  { %v741_v14 = vld [vmem:[%s944_s1 + $0x18] sm:$0xff]   ;;  %v745_v18 = vld [vmem:[%s944_s1 + $0x20] sm:$0xff]   ;;  %v749_v22 = vld [vmem:[%s944_s1 + $0x28] sm:$0xff]  }
   0x8   :  { %656 = vmatpush3.bf16.msra.mxu0 %v733_v6  ;;  %v742_v15 = vld [vmem:[%s944_s1 + $0x98] sm:$0xff]   ;;  %v746_v19 = vld [vmem:[%s944_s1 + $0xa0] sm:$0xff]   ;;  %v750_v23 = vld [vmem:[%s944_s1 + $0xa8] sm:$0xff]  }
   0x9   :  { %684 = vmatpush3.bf16.msra.mxu1 %v734_v7  ;;  %657 = vmatprep.subr.bf16.mxu0 %v735_v8  ;;  %v751_v24 = vld [vmem:[%s944_s1 + $0x70] sm:$0xff]   ;;  %v755_v28 = vld [vmem:[%s944_s1 + $0x78] sm:$0xff]   ;;  %v764_v35 = vld [vmem:[%s945_s0 + $0xc] ss:$20 sps:$4 sm:$0xff]  }
   0xa   :  { %685 = vmatprep.subr.bf16.mxu1 %v736_v9  ;;  %v752_v25 = vld [vmem:[%s944_s1 + $0xf0] sm:$0xff]   ;;  %v756_v29 = vld [vmem:[%s944_s1 + $0xf8] sm:$0xff]   ;;  %v765_v36 = vld [vmem:[%s944_s1 + $0x100] sm:$0xff]   ;;  %465 = vmatprep.mubr.bf16.mxu1 %v764_v35 }
   0xb   :  { %v753_v26 = vld [vmem:[%s944_s1 + $0x30] sm:$0xff]   ;;  %v757_v30 = vld [vmem:[%s944_s1 + $0x38] sm:$0xff]   ;;  %v766_v37 = vld [vmem:[%s944_s1 + $0x108] sm:$0xff]  }
   0xc   :  { %658 = vmatpush3.bf16.msra.mxu0 %v737_v10  ;;  %v754_v27 = vld [vmem:[%s944_s1 + $0xb0] sm:$0xff]   ;;  %v758_v31 = vld [vmem:[%s944_s1 + $0xb8] sm:$0xff]   ;;  %v767_v38 = vld [vmem:[%s945_s0 + $0x2c] ss:$20 sps:$4 sm:$0xff]  }
   0xd   :  { %686 = vmatpush3.bf16.msra.mxu1 %v738_v11  ;;  %659 = vmatprep.subr.bf16.mxu0 %v739_v12  ;;  %v759_v32 = vld [vmem:[%s945_s0] ss:$20 sps:$4 sm:$0xff]   ;;  %v761_v33 = vld [vmem:[%s945_s0 + $0x4] ss:$20 sps:$4 sm:$0xff]   ;;  %v762_v34 = vld [vmem:[%s945_s0 + $0x8] ss:$20 sps:$4 sm:$0xff]  }
   0xe   :  { %687 = vmatprep.subr.bf16.mxu1 %v740_v13  ;;  %416 = vmatprep.mubr.bf16.mxu0 %v761_v33  ;;  %v769_v39 = vld [vmem:[%s945_s0 + $0x34] ss:$20 sps:$4 sm:$0xff]   ;;  %v772_v42 = vld [vmem:[%s945_s0 + $0x30] ss:$20 sps:$4 sm:$0xff]   ;;  %v774_v44 = vld [vmem:[%s944_s1 + $0x118] sm:$0xff]  }
   0xf   :  { %v771_v40 = vld [vmem:[%s945_s0 + $0x28] ss:$20 sps:$4 sm:$0xff]   ;;  %v773_v41 = vld [vmem:[%s944_s1 + $0x110] sm:$0xff]   ;;  %v776_v45 = vld [vmem:[%s945_s0 + $0x38] ss:$20 sps:$4 sm:$0xff]  }
  0x10   :  { %660 = vmatpush3.bf16.msra.mxu0 %v741_v14  ;;  %v775_v43 = vld [vmem:[%s945_s0 + $0x10] ss:$20 sps:$4 sm:$0xff]   ;;  %v633_v11 = vld [vmem:[%s946_s2] ss:$0 sm:$0xff] }
  0x11   :  { %688 = vmatpush3.bf16.msra.mxu1 %v742_v15  ;;  %661 = vmatprep.subr.bf16.mxu0 %v743_v16 }
  0x12   :  { %689 = vmatprep.subr.bf16.mxu1 %v744_v17 }
  0x14   :  { %662 = vmatpush3.bf16.msra.mxu0 %v745_v18 }
  0x15   :  { %690 = vmatpush3.bf16.msra.mxu1 %v746_v19  ;;  %663 = vmatprep.subr.bf16.mxu0 %v747_v20 }
  0x16   :  { %691 = vmatprep.subr.bf16.mxu1 %v748_v21 }
  0x18   :  { %664 = vmatpush3.bf16.msra.mxu0 %v749_v22 }
  0x19   :  { %692 = vmatpush3.bf16.msra.mxu1 %v750_v23  ;;  %665 = vmatprep.subr.bf16.mxu0 %v751_v24 }
  0x1a   :  { %693 = vmatprep.subr.bf16.mxu1 %v752_v25 }
  0x1c   :  { %666 = vmatpush3.bf16.msra.mxu0 %v753_v26 }
  0x1d   :  { %694 = vmatpush3.bf16.msra.mxu1 %v754_v27  ;;  %667 = vmatprep.subr.bf16.mxu0 %v755_v28 }
  0x1e   :  { %695 = vmatprep.subr.bf16.mxu1 %v756_v29 }
  0x20   :  { %668 = vmatpush3.bf16.msra.mxu0 %v757_v30 }
  0x21   :  { %696 = vmatpush3.bf16.msra.mxu1 %v758_v31  ;;  %715 = vmatprep.subr.bf16.mxu0 %v765_v36 }
  0x23   :  { %417 = vmatmul.mubr.bf16.vlgmr.msra.gmra.mrb[0].mxu0 %v759_v32 }
  0x24   :  { %466 = vmatmul.mubr.bf16.vlgmr.msra.gmra.mrb[0].mxu1 %v762_v34  ;;  %716 = vmatpush3.bf16.msra.mxu0 %v765_v36 }
  0x25   :  { %717 = vmatprep.subr.bf16.mxu0 %v766_v37  ;;  %424 = vmatprep.mubr.bf16.mxu0 %v767_v38 }
  0x26   :  { %473 = vmatprep.mubr.bf16.mxu1 %v769_v39 }
  0x28   :  { %718 = vmatpush3.bf16.msra.mxu0 %v766_v37 }
  0x29   :  { %719 = vmatprep.subr.bf16.mxu0 %v773_v41 }
  0x2b   :  { %425 = vmatmul.mubr.bf16.gmra.mrb[4].mxu0 %v771_v40 }
  0x2c   :  { %474 = vmatmul.mubr.bf16.gmra.mrb[4].mxu1 %v772_v42  ;;  %723 = vmatprep.mubr.msk.bf16.mxu0 %vm377_vm0, %v775_v43 }
  0x2d   :  { %720 = vmatpush3.bf16.msra.mxu0 %v773_v41 }
  0x2e   :  { %721 = vmatprep.subr.bf16.mxu0 %v774_v44 }
  0x31   :  { %722 = vmatpush3.bf16.msra.mxu0 %v774_v44 }
  0x34   :  { %724 = vmatmul.mubr.msk.bf16.vlgmr.msra.gmra.mrb[8].mxu0 %vm377_vm0, %v776_v45 }
  0xf6   :  { %v669_v46 = vpop.f32.mrb[0].mxu0 }
  0xf7   :  { %v697_v47 = vpop.f32.mrb[0].mxu1  ;;  %v670_v48 = vpop.f32.mrb[1].mxu0 }
  0xf8   :  { %v671_v49 = vadd.f32 %v670_v48, %v669_v46  ;;  %v698_v50 = vpop.f32.mrb[1].mxu1  ;;  %v672_v51 = vpop.f32.mrb[2].mxu0 }
  0xf9   :  { %v699_v52 = vadd.f32 %v698_v50, %v697_v47  ;;  %v700_v53 = vpop.f32.mrb[2].mxu1  ;;  %v673_v54 = vpop.f32.mrb[3].mxu0 }
  0xfa   :  { %v674_v55 = vadd.f32 %v673_v54, %v672_v51  ;;  %v701_v56 = vpop.f32.mrb[3].mxu1 }
  0xfb   :  { %v702_v57 = vadd.f32 %v701_v56, %v700_v53  ;;  %v468_v58 = vadd.f32 %v699_v52, %v671_v49 }
  0xfd   :  { %v471_v59 = vadd.f32 %v702_v57, %v674_v55 }
  0xfe   :  { %v675_v60 = vpop.f32.mrb[4].mxu0 }
  0xff   :  { %v703_v61 = vpop.f32.mrb[4].mxu1  ;;  %v676_v62 = vpop.f32.mrb[5].mxu0 }
 0x100   :  { %v677_v63 = vadd.f32 %v676_v62, %v675_v60  ;;  %v704_v0 = vpop.f32.mrb[5].mxu1  ;;  %v678_v1 = vpop.f32.mrb[6].mxu0 }
 0x101   :  { %v705_v2 = vadd.f32 %v704_v0, %v703_v61  ;;  %v706_v3 = vpop.f32.mrb[6].mxu1  ;;  %v679_v4 = vpop.f32.mrb[7].mxu0 }
 0x102   :  { %v680_v5 = vadd.f32 %v679_v4, %v678_v1  ;;  %v707_v6 = vpop.f32.mrb[7].mxu1 }
 0x103   :  { %v708_v7 = vadd.f32 %v707_v6, %v706_v3  ;;  %v476_v8 = vadd.f32 %v705_v2, %v677_v63 }
 0x105   :  { %v479_v9 = vadd.f32 %v708_v7, %v680_v5 }
 0x107   :  { %v725_v10 = vpop.f32.mrb[8].mxu0 }
 0x108   :  { %v525_v12 = vadd.f32 %v725_v10, %v476_v8  ;;  %v516_v13 = vpop.f32.mrb[9].mxu0 }
 0x109   :  { %v517_v14 = vadd.f32 %v516_v13, %v468_v58  ;;  %v726_v15 = vpop.f32.mrb[10].mxu0 }
 0x10a   :  { %v555_v16 = vadd.f32 %v633_v11, %v525_v12  ;;  %v528_v17 = vadd.f32 %v726_v15, %v479_v9  ;;  %v519_v18 = vpop.f32.mrb[11].mxu0 }
 0x10b   :  { %v553_v19 = vadd.f32 %v633_v11, %v517_v14  ;;  %v520_v20 = vadd.f32 %v519_v18, %v471_v59 }
 0x10c   :  { %v556_v21 = vadd.f32 %v633_v11, %v528_v17  ;;  %v559_v23 = vmax.f32 %v555_v16, 0.0 }
 0x10d   :  { %v554_v22 = vadd.f32 %v633_v11, %v520_v20  ;;  %v557_v25 = vmax.f32 %v553_v19, 0.0 }
 0x10e   :  { %v560_v24 = vmax.f32 %v556_v21, 0.0 }
 0x10f   :  { %v558_v26 = vmax.f32 %v554_v22, 0.0 }
 0x110   :  { %v650_v27 = vpack.c.bf16 %v560_v24, %v559_v23 }
 0x111   :  { %v645_v28 = vpack.c.bf16 %v558_v26, %v557_v25 }
 0x112   :  { %652 = vst [vmem:[%s947_s3 + $0x8] sm:$0xff] %v650_v27  }
 0x113   :  { %646 = vst [vmem:[%s947_s3] sm:$0xff] %v645_v28  }

// kernel: invoice_forgery_forward.12
= control target key start
LH: loop header
LB: loop body
LE: loop exit
PB: predicated region body
PF: predicated region fallthrough
CT: control target
= control target key end

     0   :  { %vm348_vm0 = vcmask 261120   ;;  %vm19_vm1 = vcmask 31744   ;;  %v1050_v42 = vmov 0.0   ;;  %s1337_s1 = inlined_call_operand.vmem [shape: bf16[288,4], index: 1, kind: input, shape index: {}]   ;;  %s1338_s0 = inlined_call_operand.vmem [shape: bf16[128,288], index: 0, kind: input, shape index: {}]   ;;  %s1339_s2 = inlined_call_operand.vmem [shape: f32[1,4], index: 2, kind: input, shape index: {}]   ;;  %s1340_s3 = inlined_call_operand.vmem [shape: f32[128,4], index: 3, kind: output, shape index: {}]  }
   0x1   :  { %v936_v0 = vld [vmem:[%s1337_s1 + $0x40] sm:$0xff]   ;;  %v938_v2 = vld [vmem:[%s1337_s1 + $0x48] sm:$0xff]   ;;  %v940_v4 = vld [vmem:[%s1337_s1 + $0x50] sm:$0xff]   ;;  %22 = vst.msk [vmem:[#allocation2 + $0x10] sm:$0xff] %vm19_vm1, %v1050_v42 }
   0x2   :  { %v937_v1 = vld [vmem:[%s1337_s1] sm:$0xff]   ;;  %825 = vmatprep.subr.bf16.mxu0 %v936_v0  ;;  %919 = vmatprep.subr.bf16.mxu1 %v936_v0  ;;  %v939_v3 = vld [vmem:[%s1337_s1 + $0x8] sm:$0xff]   ;;  %v941_v5 = vld [vmem:[%s1337_s1 + $0x10] sm:$0xff]   ;;  %20 = vst.msk [vmem:[#allocation2] sm:$0xff] %vm19_vm1, %v1050_v42 }
   0x3   :  { %826 = vmatpush3.bf16.msra.mxu0 %v937_v1  ;;  %927 = vmatpush3.bf16.msra.mxu1 %v937_v1  ;;  %v942_v6 = vld [vmem:[%s1337_s1 + $0x58] sm:$0xff]   ;;  %v944_v8 = vld [vmem:[%s1337_s1 + $0x60] sm:$0xff]   ;;  %v946_v10 = vld [vmem:[%s1337_s1 + $0x68] sm:$0xff]   ;;  %21 = vst.msk [vmem:[#allocation2 + $0x8] sm:$0xff] %vm19_vm1, %v1050_v42 }
   0x4   :  { %827 = vmatprep.subr.bf16.mxu0 %v938_v2  ;;  %920 = vmatprep.subr.bf16.mxu1 %v938_v2  ;;  %v943_v7 = vld [vmem:[%s1337_s1 + $0x18] sm:$0xff]   ;;  %v945_v9 = vld [vmem:[%s1337_s1 + $0x20] sm:$0xff]   ;;  %v947_v13 = vld [vmem:[%s1337_s1 + $0x28] sm:$0xff]   ;;  %23 = vst.msk [vmem:[#allocation2 + $0x18] sm:$0xff] %vm19_vm1, %v1050_v42 }
   0x5   :  { %v954_v11 = vld [vmem:[%s1338_s0 + $0x4] ss:$12 sps:$4 sm:$0xff]   ;;  %v957_v12 = vld [vmem:[%s1338_s0 + $0x94] ss:$12 sps:$4 sm:$0xff]   ;;  %v950_v16 = vld [vmem:[%s1337_s1 + $0x78] sm:$0xff]   ;;  %24 = vst.msk [vmem:[#allocation2 + $0x20] sm:$0xff] %vm19_vm1, %v1050_v42 }
   0x6   :  { %v948_v14 = vld [vmem:[%s1337_s1 + $0x70] sm:$0xff]   ;;  %405 = vmatprep.mubr.bf16.mxu0 %v954_v11  ;;  %453 = vmatprep.mubr.bf16.mxu1 %v957_v12  ;;  %v951_v17 = vld [vmem:[%s1337_s1 + $0x38] sm:$0xff]   ;;  %v952_v18 = vld [vmem:[%s1338_s0] ss:$12 sps:$4 sm:$0xff]   ;;  %25 = vst.msk [vmem:[#allocation2 + $0x28] sm:$0xff] %vm19_vm1, %v1050_v42 }
   0x7   :  { %828 = vmatpush3.bf16.msra.mxu0 %v939_v3  ;;  %928 = vmatpush3.bf16.msra.mxu1 %v939_v3  ;;  %v949_v15 = vld [vmem:[%s1337_s1 + $0x30] sm:$0xff]   ;;  %v958_v19 = vld [vmem:[%s1337_s1 + $0x80] sm:$0xff]   ;;  %v959_v21 = vld [vmem:[%s1338_s0 + $0x1c] ss:$12 sps:$4 sm:$0xff]   ;;  %26 = vst.msk [vmem:[#allocation2 + $0x30] sm:$0xff] %vm19_vm1, %v1050_v42 }
   0x8   :  { %829 = vmatprep.subr.bf16.mxu0 %v940_v4  ;;  %921 = vmatprep.subr.bf16.mxu1 %v940_v4  ;;  %v955_v20 = vld [vmem:[%s1338_s0 + $0x90] ss:$12 sps:$4 sm:$0xff]   ;;  %v961_v22 = vld [vmem:[%s1338_s0 + $0xac] ss:$12 sps:$4 sm:$0xff]   ;;  %v964_v25 = vld [vmem:[%s1338_s0 + $0xa8] ss:$12 sps:$4 sm:$0xff]  }
   0x9   :  { %v965_v23 = vld [vmem:[%s1337_s1 + $0x88] sm:$0xff]   ;;  %v963_v24 = vld [vmem:[%s1338_s0 + $0x18] ss:$12 sps:$4 sm:$0xff]   ;;  %v966_v26 = vld [vmem:[%s1338_s0 + $0x34] ss:$12 sps:$4 sm:$0xff]   ;;  %27 = vst.msk [vmem:[#allocation2 + $0x38] sm:$0xff] %vm19_vm1, %v1050_v42 }
   0xa   :  { %v968_v27 = vld [vmem:[%s1338_s0 + $0x8] ss:$12 sps:$4 sm:$0xff]   ;;  %v969_v28 = vld [vmem:[%s1338_s0 + $0x30] ss:$12 sps:$4 sm:$0xff]   ;;  %v970_v29 = vld [vmem:[%s1338_s0 + $0x20] ss:$12 sps:$4 sm:$0xff]  }
   0xb   :  { %830 = vmatpush3.bf16.msra.mxu0 %v941_v5  ;;  %929 = vmatpush3.bf16.msra.mxu1 %v941_v5  ;;  %v971_v30 = vld [vmem:[%s1338_s0 + $0x4c] ss:$12 sps:$4 sm:$0xff]   ;;  %v974_v32 = vld [vmem:[%s1338_s0 + $0x48] ss:$12 sps:$4 sm:$0xff]   ;;  %v975_v33 = vld [vmem:[%s1338_s0 + $0x50] ss:$12 sps:$4 sm:$0xff]  }
   0xc   :  { %831 = vmatprep.subr.bf16.mxu0 %v942_v6  ;;  %922 = vmatprep.subr.bf16.mxu1 %v942_v6  ;;  %v973_v31 = vld [vmem:[%s1338_s0 + $0x38] ss:$12 sps:$4 sm:$0xff]   ;;  %v978_v35 = vld [vmem:[%s1338_s0 + $0x68] ss:$12 sps:$4 sm:$0xff]   ;;  %v979_v36 = vld [vmem:[%s1338_s0 + $0x60] ss:$12 sps:$4 sm:$0xff]  }
   0xd   :  { %v976_v34 = vld [vmem:[%s1338_s0 + $0x64] ss:$12 sps:$4 sm:$0xff]   ;;  %v980_v37 = vld [vmem:[%s1338_s0 + $0x80] ss:$12 sps:$4 sm:$0xff]   ;;  %v981_v38 = vld [vmem:[%s1338_s0 + $0x7c] ss:$12 sps:$4 sm:$0xff]  }
   0xe   :  { %v983_v39 = vld [vmem:[%s1338_s0 + $0x98] ss:$12 sps:$4 sm:$0xff]   ;;  %v985_v41 = vld [vmem:[%s1338_s0 + $0xb0] ss:$12 sps:$4 sm:$0xff]   ;;  %28 = vst.msk [vmem:[#allocation2 + $0x40] sm:$0xff] %vm19_vm1, %v1050_v42  ;;  %29 = vst.msk [vmem:[#allocation2 + $0x48] sm:$0xff] %vm19_vm1, %v1050_v42 }
   0xf   :  { %832 = vmatpush3.bf16.msra.mxu0 %v943_v7  ;;  %930 = vmatpush3.bf16.msra.mxu1 %v943_v7  ;;  %v984_v40 = vld [vmem:[%s1338_s0 + $0x78] ss:$12 sps:$4 sm:$0xff]   ;;  %30 = vst.msk [vmem:[#allocation2 + $0x50] sm:$0xff] %vm19_vm1, %v1050_v42  ;;  %31 = vst.msk [vmem:[#allocation2 + $0x58] sm:$0xff] %vm19_vm1, %v1050_v42  ;;  %v38_v4 = vld [vmem:[#allocation2 + $0x10] sm:$0xff] }
  0x10   :  { %833 = vmatprep.subr.bf16.mxu0 %v944_v8  ;;  %923 = vmatprep.subr.bf16.mxu1 %v944_v8  ;;  %32 = vst.msk [vmem:[#allocation2 + $0x60] sm:$0xff] %vm19_vm1, %v1050_v42  ;;  %33 = vst.msk [vmem:[#allocation2 + $0x68] sm:$0xff] %vm19_vm1, %v1050_v42  ;;  %v36_v8 = vld [vmem:[#allocation2] sm:$0xff] }
  0x11   :  { %34 = vst.msk [vmem:[#allocation2 + $0x70] sm:$0xff] %vm19_vm1, %v1050_v42  ;;  %35 = vst.msk [vmem:[#allocation2 + $0x78] sm:$0xff] %vm19_vm1, %v1050_v42 }
  0x13   :  { %834 = vmatpush3.bf16.msra.mxu0 %v945_v9  ;;  %931 = vmatpush3.bf16.msra.mxu1 %v945_v9 }
  0x14   :  { %835 = vmatprep.subr.bf16.mxu0 %v946_v10  ;;  %924 = vmatprep.subr.bf16.mxu1 %v946_v10 }
  0x17   :  { %836 = vmatpush3.bf16.msra.mxu0 %v947_v13  ;;  %932 = vmatpush3.bf16.msra.mxu1 %v947_v13  ;;  %v39_v13 = vld [vmem:[#allocation2 + $0x18] sm:$0xff] }
  0x18   :  { %837 = vmatprep.subr.bf16.mxu0 %v948_v14  ;;  %925 = vmatprep.subr.bf16.mxu1 %v948_v14 }
  0x1b   :  { %838 = vmatpush3.bf16.msra.mxu0 %v949_v15  ;;  %933 = vmatpush3.bf16.msra.mxu1 %v949_v15 }
  0x1c   :  { %839 = vmatprep.subr.bf16.mxu0 %v950_v16  ;;  %926 = vmatprep.subr.bf16.mxu1 %v950_v16 }
  0x1f   :  { %840 = vmatpush3.bf16.msra.mxu0 %v951_v17  ;;  %934 = vmatpush3.bf16.msra.mxu1 %v951_v17 }
  0x20   :  { %899 = vmatprep.subr.bf16.mxu1 %v958_v19 }
  0x22   :  { %406 = vmatmul.mubr.bf16.vlgmr.msra.gmra.mrb[0].mxu0 %v952_v18  ;;  %454 = vmatmul.mubr.bf16.vlgmr.msra.gmra.mrb[0].mxu1 %v955_v20  ;;  %v37_v18 = vld [vmem:[#allocation2 + $0x8] sm:$0xff] }
  0x23   :  { %900 = vmatpush3.bf16.msra.mxu1 %v958_v19  ;;  %413 = vmatprep.mubr.bf16.mxu0 %v959_v21 }
  0x24   :  { %461 = vmatprep.mubr.bf16.mxu1 %v961_v22  ;;  %901 = vmatprep.subr.bf16.mxu1 %v965_v23 }
  0x27   :  { %902 = vmatpush3.bf16.msra.mxu1 %v965_v23 }
  0x2a   :  { %414 = vmatmul.mubr.bf16.gmra.mrb[4].mxu0 %v963_v24  ;;  %462 = vmatmul.mubr.bf16.gmra.mrb[4].mxu1 %v964_v25 }
  0x2b   :  { %421 = vmatprep.mubr.bf16.mxu0 %v966_v26  ;;  %903 = vmatprep.mubr.msk.bf16.mxu1 %vm348_vm0, %v968_v27 }
  0x32   :  { %422 = vmatmul.mubr.bf16.gmra.mrb[8].mxu0 %v969_v28  ;;  %904 = vmatmul.mubr.msk.bf16.vlgmr.msra.gmra.mrb[8].mxu1 %vm348_vm0, %v970_v29  ;;  %v40_v28 = vld [vmem:[#allocation2 + $0x20] sm:$0xff] }
  0x33   :  { %429 = vmatprep.mubr.bf16.mxu0 %v971_v30  ;;  %907 = vmatprep.mubr.msk.bf16.mxu1 %vm348_vm0, %v973_v31  ;;  %v1236_v30 = vld [vmem:[%s1339_s2] ss:$0 sm:$0xff] }
  0x3a   :  { %430 = vmatmul.mubr.bf16.gmra.mrb[12].mxu0 %v974_v32  ;;  %908 = vmatmul.mubr.msk.bf16.gmra.mrb[12].mxu1 %vm348_vm0, %v975_v33 }
  0x3b   :  { %437 = vmatprep.mubr.bf16.mxu0 %v976_v34  ;;  %911 = vmatprep.mubr.msk.bf16.mxu1 %vm348_vm0, %v978_v35  ;;  %v42_v35 = vld [vmem:[#allocation2 + $0x30] sm:$0xff] }
  0x42   :  { %438 = vmatmul.mubr.bf16.gmra.mrb[16].mxu0 %v979_v36  ;;  %912 = vmatmul.mubr.msk.bf16.gmra.mrb[16].mxu1 %vm348_vm0, %v980_v37  ;;  %v41_v37 = vld [vmem:[#allocation2 + $0x28] sm:$0xff] }
  0x43   :  { %445 = vmatprep.mubr.bf16.mxu0 %v981_v38  ;;  %915 = vmatprep.mubr.msk.bf16.mxu1 %vm348_vm0, %v983_v39 }
  0x4a   :  { %446 = vmatmul.mubr.bf16.gmra.mrb[20].mxu0 %v984_v40  ;;  %916 = vmatmul.mubr.msk.bf16.gmra.mrb[20].mxu1 %vm348_vm0, %v985_v41 }
  0xf5   :  { %v841_v43 = vpop.f32.mrb[0].mxu0  ;;  %v877_v44 = vpop.f32.mrb[0].mxu1 }
  0xf6   :  { %v842_v45 = vpop.f32.mrb[1].mxu0  ;;  %v878_v46 = vpop.f32.mrb[1].mxu1 }
  0xf7   :  { %v843_v47 = vadd.f32 %v842_v45, %v841_v43  ;;  %v1221_v48 = vadd.f32 %v878_v46, %v877_v44  ;;  %v844_v49 = vpop.f32.mrb[2].mxu0  ;;  %v880_v50 = vpop.f32.mrb[2].mxu1  ;;  %v43_v46 = vld [vmem:[#allocation2 + $0x38] sm:$0xff] }
  0xf8   :  { %v845_v51 = vpop.f32.mrb[3].mxu0  ;;  %v881_v52 = vpop.f32.mrb[3].mxu1 }
  0xf9   :  { %v846_v53 = vadd.f32 %v845_v51, %v844_v49  ;;  %v1223_v54 = vadd.f32 %v881_v52, %v880_v50 }
  0xfd   :  { %v847_v55 = vpop.f32.mrb[4].mxu0  ;;  %v883_v56 = vpop.f32.mrb[4].mxu1 }
  0xfe   :  { %v848_v57 = vpop.f32.mrb[5].mxu0  ;;  %v884_v58 = vpop.f32.mrb[5].mxu1 }
  0xff   :  { %v849_v59 = vadd.f32 %v848_v57, %v847_v55  ;;  %v1225_v60 = vadd.f32 %v884_v58, %v883_v56  ;;  %v850_v61 = vpop.f32.mrb[6].mxu0  ;;  %v886_v62 = vpop.f32.mrb[6].mxu1 }
 0x100   :  { %v851_v63 = vpop.f32.mrb[7].mxu0  ;;  %v887_v0 = vpop.f32.mrb[7].mxu1 }
 0x101   :  { %v852_v1 = vadd.f32 %v851_v63, %v850_v61  ;;  %v1227_v2 = vadd.f32 %v887_v0, %v886_v62 }
 0x105   :  { %v853_v3 = vpop.f32.mrb[8].mxu0  ;;  %v905_v5 = vpop.f32.mrb[8].mxu1 }
 0x106   :  { %v513_v6 = vadd.f32 %v905_v5, %v849_v59  ;;  %v854_v7 = vpop.f32.mrb[9].mxu0  ;;  %v504_v9 = vpop.f32.mrb[9].mxu1 }
 0x107   :  { %v855_v10 = vadd.f32 %v854_v7, %v853_v3  ;;  %v505_v11 = vadd.f32 %v843_v47, %v504_v9  ;;  %v856_v12 = vpop.f32.mrb[10].mxu0  ;;  %v906_v14 = vpop.f32.mrb[10].mxu1  ;;  %v44_v7 = vld [vmem:[#allocation2 + $0x40] sm:$0xff] }
 0x108   :  { %v569_v15 = vadd.f32 %v513_v6, %v38_v4  ;;  %v516_v16 = vadd.f32 %v906_v14, %v852_v1  ;;  %v857_v17 = vpop.f32.mrb[11].mxu0  ;;  %v507_v19 = vpop.f32.mrb[11].mxu1 }
 0x109   :  { %v567_v20 = vadd.f32 %v505_v11, %v36_v8  ;;  %v858_v21 = vadd.f32 %v857_v17, %v856_v12  ;;  %v508_v22 = vadd.f32 %v846_v53, %v507_v19 }
 0x10a   :  { %586 = vst.msk [vmem:[#allocation2 + $0x10] sm:$0xff] %vm19_vm1, %v569_v15  ;;  %v570_v23 = vadd.f32 %v516_v16, %v39_v13  ;;  %v45_v13 = vld [vmem:[#allocation2 + $0x48] sm:$0xff] }
 0x10b   :  { %584 = vst.msk [vmem:[#allocation2] sm:$0xff] %vm19_vm1, %v567_v20  ;;  %v568_v24 = vadd.f32 %v508_v22, %v37_v18 }
 0x10c   :  { %587 = vst.msk [vmem:[#allocation2 + $0x18] sm:$0xff] %vm19_vm1, %v570_v23 }
 0x10d   :  { %585 = vst.msk [vmem:[#allocation2 + $0x8] sm:$0xff] %vm19_vm1, %v568_v24  ;;  %v859_v25 = vpop.f32.mrb[12].mxu0  ;;  %v909_v26 = vpop.f32.mrb[12].mxu1  ;;  %v50_v24 = vld [vmem:[#allocation2 + $0x70] sm:$0xff] }
 0x10e   :  { %v860_v27 = vpop.f32.mrb[13].mxu0  ;;  %v520_v29 = vpop.f32.mrb[13].mxu1 }
 0x10f   :  { %v861_v31 = vadd.f32 %v860_v27, %v859_v25  ;;  %v521_v32 = vadd.f32 %v855_v10, %v520_v29  ;;  %v862_v33 = vpop.f32.mrb[14].mxu0  ;;  %v910_v34 = vpop.f32.mrb[14].mxu1  ;;  %v48_v29 = vld [vmem:[#allocation2 + $0x60] sm:$0xff] }
 0x110   :  { %v863_v36 = vpop.f32.mrb[15].mxu0  ;;  %v523_v38 = vpop.f32.mrb[15].mxu1 }
 0x111   :  { %v605_v39 = vld [vmem:[#allocation2 + $0x10] sm:$0xff]  ;;  %v529_v40 = vadd.f32 %v909_v26, %v861_v31  ;;  %v571_v41 = vadd.f32 %v521_v32, %v40_v28  ;;  %v864_v42 = vadd.f32 %v863_v36, %v862_v33  ;;  %v524_v43 = vadd.f32 %v858_v21, %v523_v38 }
 0x112   :  { %v628_v44 = vadd.f32 %v1236_v30, %v605_v39  ;;  %v603_v45 = vld [vmem:[#allocation2] sm:$0xff] }
 0x113   :  { %v626_v47 = vadd.f32 %v1236_v30, %v603_v45  ;;  %v606_v49 = vld [vmem:[#allocation2 + $0x18] sm:$0xff]  ;;  %v573_v50 = vadd.f32 %v529_v40, %v42_v35  ;;  %588 = vst.msk [vmem:[#allocation2 + $0x20] sm:$0xff] %vm19_vm1, %v571_v41  ;;  %v532_v51 = vadd.f32 %v910_v34, %v864_v42  ;;  %v572_v52 = vadd.f32 %v524_v43, %v41_v37 }
 0x114   :  { %v811_v53 = vmul.f32 -1.442695, %v628_v44  ;;  %v629_v55 = vadd.f32 %v1236_v30, %v606_v49  ;;  %v604_v56 = vld [vmem:[#allocation2 + $0x8] sm:$0xff]  ;;  %v51_v41 = vld [vmem:[#allocation2 + $0x78] sm:$0xff] }
 0x115   :  { %v809_v57 = vmul.f32 -1.442695, %v626_v47  ;;  %v627_v58 = vadd.f32 %v1236_v30, %v604_v56  ;;  %590 = vst.msk [vmem:[#allocation2 + $0x30] sm:$0xff] %vm19_vm1, %v573_v50  ;;  %v574_v59 = vadd.f32 %v532_v51, %v43_v46  ;;  %589 = vst.msk [vmem:[#allocation2 + $0x28] sm:$0xff] %vm19_vm1, %v572_v52  ;;  %v865_v61 = vpop.f32.mrb[16].mxu0  ;;  %v1245_v62 = vpop.f32.mrb[16].mxu1 }
 0x116   :  { %986 = vpow2.f32 %v811_v53  ;;  %v812_v63 = vmul.f32 -1.442695, %v629_v55  ;;  %v866_v0 = vpop.f32.mrb[17].mxu0  ;;  %v536_v1 = vpop.f32.mrb[17].mxu1  ;;  %v46_v47 = vld [vmem:[#allocation2 + $0x50] sm:$0xff] }
 0x117   :  { %988 = vpow2.f32 %v809_v57  ;;  %v810_v3 = vmul.f32 -1.442695, %v627_v58  ;;  %591 = vst.msk [vmem:[#allocation2 + $0x38] sm:$0xff] %vm19_vm1, %v574_v59  ;;  %v867_v4 = vadd.f32 %v866_v0, %v865_v61  ;;  %v868_v5 = vpop.f32.mrb[18].mxu0  ;;  %v914_v6 = vpop.f32.mrb[18].mxu1  ;;  %v49_v58 = vld [vmem:[#allocation2 + $0x68] sm:$0xff] }
 0x118   :  { %990 = vpow2.f32 %v812_v63  ;;  %v869_v8 = vpop.f32.mrb[19].mxu0  ;;  %v539_v9 = vpop.f32.mrb[19].mxu1 }
 0x119   :  { %992 = vpow2.f32 %v810_v3  ;;  %v537_v10 = vadd.f32 %v867_v4, %v536_v1  ;;  %v870_v11 = vadd.f32 %v869_v8, %v868_v5 }
 0x11a   :  { %v607_v12 = vld [vmem:[#allocation2 + $0x20] sm:$0xff] }
 0x11b   :  { %v630_v14 = vadd.f32 %v1236_v30, %v607_v12  ;;  %v575_v15 = vadd.f32 %v537_v10, %v44_v7  ;;  %v540_v16 = vadd.f32 %v870_v11, %v539_v9 }
 0x11c   :  { %v609_v17 = vld [vmem:[#allocation2 + $0x30] sm:$0xff]  ;;  %v608_v18 = vld [vmem:[#allocation2 + $0x28] sm:$0xff] }
 0x11d   :  { %v632_v19 = vadd.f32 %v1236_v30, %v609_v17  ;;  %v813_v20 = vmul.f32 -1.442695, %v630_v14  ;;  %v631_v21 = vadd.f32 %v1236_v30, %v608_v18  ;;  %592 = vst.msk [vmem:[#allocation2 + $0x40] sm:$0xff] %vm19_vm1, %v575_v15  ;;  %v576_v22 = vadd.f32 %v540_v16, %v45_v13  ;;  %v871_v23 = vpop.f32.mrb[20].mxu0  ;;  %v917_v25 = vpop.f32.mrb[20].mxu1 }
 0x11e   :  { %v610_v26 = vld [vmem:[#allocation2 + $0x38] sm:$0xff]  ;;  %v561_v27 = vadd.f32 %v917_v25, %v1225_v60  ;;  %v872_v28 = vpop.f32.mrb[21].mxu0  ;;  %v552_v31 = vpop.f32.mrb[21].mxu1 }
 0x11f   :  { %v815_v32 = vmul.f32 -1.442695, %v632_v19  ;;  %994 = vpow2.f32 %v813_v20  ;;  %v633_v33 = vadd.f32 %v1236_v30, %v610_v26  ;;  %v814_v34 = vmul.f32 -1.442695, %v631_v21  ;;  %593 = vst.msk [vmem:[#allocation2 + $0x48] sm:$0xff] %vm19_vm1, %v576_v22  ;;  %v874_v35 = vpop.f32.mrb[22].mxu0 }
 0x120   :  { %v918_v36 = vpop.f32.mrb[22].mxu1  ;;  %v987_v37 = vpop.eup %986  ;;  %v581_v38 = vadd.f32 %v561_v27, %v50_v24  ;;  %v873_v39 = vadd.f32 %v872_v28, %v871_v23  ;;  %v553_v40 = vadd.f32 %v1221_v48, %v552_v31  ;;  %v47_v48 = vld [vmem:[#allocation2 + $0x58] sm:$0xff] }
 0x121   :  { %v564_v60 = vadd.f32 %v918_v36, %v1227_v2  ;;  %v875_v42 = vpop.f32.mrb[23].mxu0  ;;  %v555_v43 = vpop.f32.mrb[23].mxu1  ;;  %v692_v45 = vadd.f32 1.0, %v987_v37  ;;  %996 = vpow2.f32 %v815_v32  ;;  %v816_v46 = vmul.f32 -1.442695, %v633_v33 }
 0x122   :  { %v989_v44 = vpop.eup %988  ;;  %v876_v49 = vadd.f32 %v875_v42, %v874_v35  ;;  %998 = vpow2.f32 %v814_v34  ;;  %598 = vst.msk [vmem:[#allocation2 + $0x70] sm:$0xff] %vm19_vm1, %v581_v38  ;;  %v545_v52 = vadd.f32 %v1245_v62, %v873_v39  ;;  %v579_v53 = vadd.f32 %v553_v40, %v48_v29 }
 0x123   :  { %v991_v50 = vpop.eup %990  ;;  %v690_v51 = vadd.f32 1.0, %v989_v44  ;;  %1000 = vrcp.f32 %v692_v45  ;;  %v582_v56 = vadd.f32 %v564_v60, %v51_v41  ;;  %v556_v0 = vadd.f32 %v1223_v54, %v555_v43 }
 0x124   :  { %v993_v55 = vpop.eup %992  ;;  %v693_v2 = vadd.f32 1.0, %v991_v50  ;;  %v548_v57 = vadd.f32 %v914_v6, %v876_v49  ;;  %v611_v61 = vld [vmem:[#allocation2 + $0x40] sm:$0xff]  ;;  %v577_v63 = vadd.f32 %v545_v52, %v46_v47  ;;  %596 = vst.msk [vmem:[#allocation2 + $0x60] sm:$0xff] %vm19_vm1, %v579_v53 }
 0x125   :  { %1002 = vrcp.f32 %v690_v51  ;;  %v691_v59 = vadd.f32 1.0, %v993_v55  ;;  %v634_v1 = vadd.f32 %v1236_v30, %v611_v61  ;;  %599 = vst.msk [vmem:[#allocation2 + $0x78] sm:$0xff] %vm19_vm1, %v582_v56  ;;  %v580_v4 = vadd.f32 %v556_v0, %v49_v58 }
 0x126   :  { %1004 = vrcp.f32 %v693_v2  ;;  %v578_v62 = vadd.f32 %v548_v57, %v47_v48  ;;  %v612_v3 = vld [vmem:[#allocation2 + $0x48] sm:$0xff]  ;;  %594 = vst.msk [vmem:[#allocation2 + $0x50] sm:$0xff] %vm19_vm1, %v577_v63 }
 0x127   :  { %1006 = vrcp.f32 %v691_v59  ;;  %v817_v5 = vmul.f32 -1.442695, %v634_v1  ;;  %v635_v6 = vadd.f32 %v1236_v30, %v612_v3  ;;  %597 = vst.msk [vmem:[#allocation2 + $0x68] sm:$0xff] %vm19_vm1, %v580_v4 }
 0x128   :  { %1008 = vpow2.f32 %v816_v46  ;;  %595 = vst.msk [vmem:[#allocation2 + $0x58] sm:$0xff] %vm19_vm1, %v578_v62 }
 0x129   :  { %v995_v54 = vpop.eup %994  ;;  %1010 = vpow2.f32 %v817_v5  ;;  %v818_v7 = vmul.f32 -1.442695, %v635_v6  ;;  %v617_v8 = vld [vmem:[#allocation2 + $0x70] sm:$0xff] }
 0x12a   :  { %v694_v9 = vadd.f32 1.0, %v995_v54  ;;  %v640_v10 = vadd.f32 %v1236_v30, %v617_v8 }
 0x12b   :  { %v997_v11 = vpop.eup %996  ;;  %1012 = vpow2.f32 %v818_v7  ;;  %v615_v12 = vld [vmem:[#allocation2 + $0x60] sm:$0xff] }
 0x12c   :  { %v999_v13 = vpop.eup %998  ;;  %v696_v14 = vadd.f32 1.0, %v997_v11  ;;  %1014 = vrcp.f32 %v694_v9  ;;  %v823_v15 = vmul.f32 -1.442695, %v640_v10  ;;  %v638_v16 = vadd.f32 %v1236_v30, %v615_v12  ;;  %v618_v17 = vld [vmem:[#allocation2 + $0x78] sm:$0xff] }
 0x12d   :  { %v1001_v18 = vpop.eup %1000  ;;  %v695_v19 = vadd.f32 1.0, %v999_v13  ;;  %v613_v20 = vld [vmem:[#allocation2 + $0x50] sm:$0xff]  ;;  %v641_v21 = vadd.f32 %v1236_v30, %v618_v17 }
 0x12e   :  { %740 = vst.msk [vmem:[%s1340_s3 + $0x10] sm:$0xff] %vm19_vm1, %v1001_v18  ;;  %1016 = vrcp.f32 %v696_v14  ;;  %v636_v23 = vadd.f32 %v1236_v30, %v613_v20  ;;  %v821_v24 = vmul.f32 -1.442695, %v638_v16  ;;  %v616_v29 = vld [vmem:[#allocation2 + $0x68] sm:$0xff] }
 0x12f   :  { %v1003_v22 = vpop.eup %1002  ;;  %v614_v25 = vld [vmem:[#allocation2 + $0x58] sm:$0xff]  ;;  %1018 = vrcp.f32 %v695_v19  ;;  %v824_v27 = vmul.f32 -1.442695, %v641_v21  ;;  %v639_v33 = vadd.f32 %v1236_v30, %v616_v29 }
 0x130   :  { %v1005_v26 = vpop.eup %1004  ;;  %738 = vst.msk [vmem:[%s1340_s3] sm:$0xff] %vm19_vm1, %v1003_v22  ;;  %v637_v28 = vadd.f32 %v1236_v30, %v614_v25  ;;  %1020 = vpow2.f32 %v823_v15  ;;  %v819_v32 = vmul.f32 -1.442695, %v636_v23 }
 0x131   :  { %v1007_v31 = vpop.eup %1006  ;;  %741 = vst.msk [vmem:[%s1340_s3 + $0x18] sm:$0xff] %vm19_vm1, %v1005_v26  ;;  %1022 = vpow2.f32 %v821_v24  ;;  %v822_v38 = vmul.f32 -1.442695, %v639_v33 }
 0x132   :  { %v1009_v34 = vpop.eup %1008  ;;  %739 = vst.msk [vmem:[%s1340_s3 + $0x8] sm:$0xff] %vm19_vm1, %v1007_v31  ;;  %v820_v35 = vmul.f32 -1.442695, %v637_v28  ;;  %1024 = vpow2.f32 %v819_v32 }
 0x133   :  { %v697_v36 = vadd.f32 1.0, %v1009_v34  ;;  %v1011_v37 = vpop.eup %1010  ;;  %1026 = vpow2.f32 %v824_v27 }
 0x134   :  { %v698_v39 = vadd.f32 1.0, %v1011_v37 }
 0x135   :  { %1028 = vrcp.f32 %v697_v36  ;;  %v1013_v40 = vpop.eup %1012 }
 0x136   :  { %1030 = vpow2.f32 %v820_v35  ;;  %v1015_v41 = vpop.eup %1014  ;;  %v699_v30 = vadd.f32 1.0, %v1013_v40 }
 0x137   :  { %1032 = vrcp.f32 %v698_v39  ;;  %742 = vst.msk [vmem:[%s1340_s3 + $0x20] sm:$0xff] %vm19_vm1, %v1015_v41 }
 0x138   :  { %1034 = vpow2.f32 %v822_v38  ;;  %v1017_v60 = vpop.eup %1016 }
 0x139   :  { %1036 = vrcp.f32 %v699_v30  ;;  %v1019_v42 = vpop.eup %1018  ;;  %744 = vst.msk [vmem:[%s1340_s3 + $0x30] sm:$0xff] %vm19_vm1, %v1017_v60 }
 0x13a   :  { %v1021_v43 = vpop.eup %1020  ;;  %743 = vst.msk [vmem:[%s1340_s3 + $0x28] sm:$0xff] %vm19_vm1, %v1019_v42 }
 0x13b   :  { %v1023_v44 = vpop.eup %1022  ;;  %v704_v45 = vadd.f32 1.0, %v1021_v43 }
 0x13c   :  { %v1025_v46 = vpop.eup %1024  ;;  %v702_v47 = vadd.f32 1.0, %v1023_v44 }
 0x13d   :  { %v1027_v49 = vpop.eup %1026  ;;  %1038 = vrcp.f32 %v704_v45  ;;  %v700_v50 = vadd.f32 1.0, %v1025_v46 }
 0x13e   :  { %1040 = vrcp.f32 %v702_v47  ;;  %v705_v52 = vadd.f32 1.0, %v1027_v49 }
 0x13f   :  { %v1029_v51 = vpop.eup %1028  ;;  %1042 = vrcp.f32 %v700_v50 }
 0x140   :  { %v1031_v53 = vpop.eup %1030  ;;  %745 = vst.msk [vmem:[%s1340_s3 + $0x38] sm:$0xff] %vm19_vm1, %v1029_v51  ;;  %1044 = vrcp.f32 %v705_v52 }
 0x141   :  { %v1033_v48 = vpop.eup %1032  ;;  %v701_v55 = vadd.f32 1.0, %v1031_v53 }
 0x142   :  { %v1035_v2 = vpop.eup %1034  ;;  %746 = vst.msk [vmem:[%s1340_s3 + $0x40] sm:$0xff] %vm19_vm1, %v1033_v48 }
 0x143   :  { %v1037_v56 = vpop.eup %1036  ;;  %1046 = vrcp.f32 %v701_v55  ;;  %v703_v57 = vadd.f32 1.0, %v1035_v2 }
 0x144   :  { %747 = vst.msk [vmem:[%s1340_s3 + $0x48] sm:$0xff] %vm19_vm1, %v1037_v56 }
 0x145   :  { %1048 = vrcp.f32 %v703_v57 }
 0x147   :  { %v1039_v58 = vpop.eup %1038 }
 0x148   :  { %v1041_v59 = vpop.eup %1040  ;;  %752 = vst.msk [vmem:[%s1340_s3 + $0x70] sm:$0xff] %vm19_vm1, %v1039_v58 }
 0x149   :  { %v1043_v61 = vpop.eup %1042  ;;  %750 = vst.msk [vmem:[%s1340_s3 + $0x60] sm:$0xff] %vm19_vm1, %v1041_v59 }
 0x14a   :  { %v1045_v63 = vpop.eup %1044  ;;  %748 = vst.msk [vmem:[%s1340_s3 + $0x50] sm:$0xff] %vm19_vm1, %v1043_v61 }
 0x14b   :  { %753 = vst.msk [vmem:[%s1340_s3 + $0x78] sm:$0xff] %vm19_vm1, %v1045_v63 }
 0x14d   :  { %v1047_v0 = vpop.eup %1046 }
 0x14e   :  { %749 = vst.msk [vmem:[%s1340_s3 + $0x58] sm:$0xff] %vm19_vm1, %v1047_v0 }
 0x14f   :  { %v1049_v1 = vpop.eup %1048 }
 0x150   :  { %751 = vst.msk [vmem:[%s1340_s3 + $0x68] sm:$0xff] %vm19_vm1, %v1049_v1 }

// kernel: invoice_forgery_forward.13
= control target key start
LH: loop header
LB: loop body
LE: loop exit
PB: predicated region body
PF: predicated region fallthrough
CT: control target
= control target key end

     0   :  { %v1846_v0 = vmov 0.0   ;;  %vm1847_vm0 = vmmov 0   ;;  %vm84_vm1 = vcmask 130048   ;;  %v1848_v29 = vmov 0   ;;  %s2424_s3 = inlined_call_operand.vmem [shape: bf16[16,96], index: 3, kind: input, shape index: {}]   ;;  %s2425_s2 = inlined_call_operand.vmem [shape: f32[2,16], index: 2, kind: input, shape index: {}]   ;;  %s2426_s5 = inlined_call_operand.vmem [shape: bf16[96,768], index: 5, kind: input, shape index: {}]   ;;  %s2427_s8 = inlined_call_operand.vmem [shape: bf16[768,256], index: 8, kind: input, shape index: {}]   ;;  %s2428_s4 = inlined_call_operand.vmem [shape: f32[1,96], index: 4, kind: input, shape index: {}]   ;;  %s2429_s0 = inlined_call_operand.vmem [shape: f32[2,256], index: 0, kind: input, shape index: {}]   ;;  %s2430_s1 = inlined_call_operand.vmem [shape: f32[2,256], index: 1, kind: input, shape index: {}]   ;;  %s2431_s6 = inlined_call_operand.vmem [shape: f32[1,768], index: 6, kind: input, shape index: {}]   ;;  %s2432_s10 = inlined_call_operand.vmem [shape: bf16[256,1], index: 10, kind: input, shape index: {}]   ;;  %s2433_s7 = inlined_call_operand.vmem [shape: bf16[1,256], index: 7, kind: input, shape index: {}]   ;;  %s2434_s9 = inlined_call_operand.vmem [shape: f32[1,256], index: 9, kind: input, shape index: {}]   ;;  %s2435_s11 = inlined_call_operand.<no memory space> [shape: f32[1,1], index: 11, kind: input, shape index: {}]   ;;  %s2436_s12 = inlined_call_operand.vmem [shape: f32[2,1], index: 12, kind: output, shape index: {}]  }
   0x1   :  { %1617 = vmatprep.subr.bf16.mxu1 %v1846_v0  ;;  %v1627_v1 = vld [vmem:[%s2424_s3] sm:$0xff]   ;;  %1619 = vmatprep.mubr.msk.bf16.mxu1 %vm1847_vm0, %v1846_v0  ;;  %v1634_v8 = vld [vmem:[%s2426_s5 + $0x30] ss:$24 sps:$4 sm:$0xff]   ;;  %v1636_v9 = vld [vmem:[%s2426_s5 + $0x34] ss:$24 sps:$4 sm:$0xff]   ;;  %vm377_vm2 = vcmask 785408  }
   0x2   :  { %v67_v2 = vld [vmem:[%s2425_s2] sm:$0x3]  ;;  %1618 = vmatpush3.bf16.msra.mxu1 %v1627_v1  ;;  %v1630_v5 = vld [vmem:[%s2426_s5 + $0x4] ss:$24 sps:$4 sm:$0xff]   ;;  %v1639_v11 = vld [vmem:[%s2426_s5 + $0x38] ss:$24 sps:$4 sm:$0xff]   ;;  %454 = vmatprep.mubr.bf16.mxu0 %v1848_v29 }
   0x3   :  { %v68_v3 = vpack.c.bf16 %v67_v2, %v67_v2  ;;  %v1628_v4 = vld [vmem:[%s2426_s5] ss:$24 sps:$4 sm:$0xff]   ;;  %v1631_v6 = vld [vmem:[%s2426_s5 + $0xc] ss:$24 sps:$4 sm:$0xff]   ;;  %381 = vmatprep.subr.bf16.mxu1 %v1630_v5  ;;  %v1637_v10 = vld [vmem:[%s2426_s5 + $0x3c] ss:$24 sps:$4 sm:$0xff]  }
   0x4   :  { %v1633_v7 = vld [vmem:[%s2426_s5 + $0x8] ss:$24 sps:$4 sm:$0xff]   ;;  %422 = vmatprep.subr.bf16.mxu0 %v1631_v6  ;;  %v1642_v12 = vld [vmem:[%s2426_s5 + $0x64] ss:$24 sps:$4 sm:$0xff]   ;;  %v1648_v16 = vld [vmem:[%s2426_s5 + $0x94] ss:$24 sps:$4 sm:$0xff]  }
   0x5   :  { %1620 = vmatmul.mubr.msk.bf16.vlgmr.msra.gmra.mrb[0].mxu1 %vm84_vm1, %v68_v3  ;;  %423 = vmatpush1.bf16.msra.mxu0 %v1633_v7  ;;  %v1643_v13 = vld [vmem:[%s2426_s5 + $0x6c] ss:$24 sps:$4 sm:$0xff]   ;;  %v1640_v14 = vld [vmem:[%s2426_s5 + $0x60] ss:$24 sps:$4 sm:$0xff]   ;;  %v1649_v17 = vld [vmem:[%s2426_s5 + $0x9c] ss:$24 sps:$4 sm:$0xff]  }
   0x6   :  { %382 = vmatpush1.bf16.msra.mxu1 %v1628_v4  ;;  %424 = vmatprep.subr.bf16.mxu0 %v1637_v10  ;;  %v1645_v15 = vld [vmem:[%s2426_s5 + $0x68] ss:$24 sps:$4 sm:$0xff]   ;;  %v1651_v19 = vld [vmem:[%s2426_s5 + $0x98] ss:$24 sps:$4 sm:$0xff]   ;;  %v1654_v20 = vld [vmem:[%s2426_s5 + $0xc4] ss:$24 sps:$4 sm:$0xff]  }
   0x7   :  { %383 = vmatprep.subr.bf16.mxu1 %v1636_v9  ;;  %v1646_v18 = vld [vmem:[%s2426_s5 + $0x90] ss:$24 sps:$4 sm:$0xff]   ;;  %v1655_v21 = vld [vmem:[%s2426_s5 + $0xcc] ss:$24 sps:$4 sm:$0xff]   ;;  %v1652_v22 = vld [vmem:[%s2426_s5 + $0xc0] ss:$24 sps:$4 sm:$0xff]   ;;  %413 = vmatprep.mubr.bf16.mxu1 %v1848_v29 }
   0x8   :  { %v1657_v23 = vld [vmem:[%s2426_s5 + $0xc8] ss:$24 sps:$4 sm:$0xff]   ;;  %v1660_v24 = vld [vmem:[%s2426_s5 + $0xf4] ss:$24 sps:$4 sm:$0xff]   ;;  %v1663_v27 = vld [vmem:[%s2426_s5 + $0xf8] ss:$24 sps:$4 sm:$0xff]  }
   0x9   :  { %425 = vmatpush1.bf16.msra.mxu0 %v1639_v11  ;;  %v1658_v25 = vld [vmem:[%s2426_s5 + $0xf0] ss:$24 sps:$4 sm:$0xff]   ;;  %v1661_v26 = vld [vmem:[%s2426_s5 + $0xfc] ss:$24 sps:$4 sm:$0xff]   ;;  %v1684_v30 = vld [vmem:[%s2427_s8 + $0x4] ss:$8 sps:$4 sm:$0xff]  }
   0xa   :  { %384 = vmatpush1.bf16.msra.mxu1 %v1634_v8  ;;  %426 = vmatprep.subr.bf16.mxu0 %v1643_v13  ;;  %v1666_v28 = vld [vmem:[%s2426_s5 + $0x14] ss:$24 sps:$4 sm:$0xff]   ;;  %v1437_v31 = vld [vmem:[%s2428_s4] ss:$0 sm:$0xff]  ;;  %v1664_v36 = vld [vmem:[%s2426_s5 + $0x10] ss:$24 sps:$4 sm:$0xff]  }
   0xb   :  { %385 = vmatprep.subr.bf16.mxu1 %v1642_v12  ;;  %v1669_v39 = vld [vmem:[%s2426_s5 + $0x44] ss:$24 sps:$4 sm:$0xff]   ;;  %v1682_v40 = vld [vmem:[%s2427_s8] ss:$8 sps:$4 sm:$0xff]   ;;  %v1672_v43 = vld [vmem:[%s2426_s5 + $0x74] ss:$24 sps:$4 sm:$0xff]  }
   0xc   :  { %v1690_v41 = vld [vmem:[%s2427_s8 + $0x14] ss:$8 sps:$4 sm:$0xff]   ;;  %v1667_v42 = vld [vmem:[%s2426_s5 + $0x40] ss:$24 sps:$4 sm:$0xff]   ;;  %v1696_v45 = vld [vmem:[%s2427_s8 + $0x24] ss:$8 sps:$4 sm:$0xff]  }
   0xd   :  { %427 = vmatpush1.bf16.msra.mxu0 %v1645_v15  ;;  %v1688_v44 = vld [vmem:[%s2427_s8 + $0x10] ss:$8 sps:$4 sm:$0xff]   ;;  %v1675_v47 = vld [vmem:[%s2426_s5 + $0xa4] ss:$24 sps:$4 sm:$0xff]   ;;  %v1694_v48 = vld [vmem:[%s2427_s8 + $0x20] ss:$8 sps:$4 sm:$0xff]  }
   0xe   :  { %386 = vmatpush1.bf16.msra.mxu1 %v1640_v14  ;;  %428 = vmatprep.subr.bf16.mxu0 %v1649_v17  ;;  %v1670_v46 = vld [vmem:[%s2426_s5 + $0x70] ss:$24 sps:$4 sm:$0xff]   ;;  %v1702_v49 = vld [vmem:[%s2427_s8 + $0x34] ss:$8 sps:$4 sm:$0xff]   ;;  %v1673_v50 = vld [vmem:[%s2426_s5 + $0xa0] ss:$24 sps:$4 sm:$0xff]  }
   0xf   :  { %387 = vmatprep.subr.bf16.mxu1 %v1648_v16  ;;  %v1678_v51 = vld [vmem:[%s2426_s5 + $0xd4] ss:$24 sps:$4 sm:$0xff]   ;;  %v1700_v52 = vld [vmem:[%s2427_s8 + $0x30] ss:$8 sps:$4 sm:$0xff]   ;;  %v1681_v55 = vld [vmem:[%s2426_s5 + $0x104] ss:$24 sps:$4 sm:$0xff]  }
  0x10   :  { %v1708_v53 = vld [vmem:[%s2427_s8 + $0x44] ss:$8 sps:$4 sm:$0xff]   ;;  %v1676_v54 = vld [vmem:[%s2426_s5 + $0xd0] ss:$24 sps:$4 sm:$0xff]   ;;  %v1714_v57 = vld [vmem:[%s2427_s8 + $0x54] ss:$8 sps:$4 sm:$0xff]  }
  0x11   :  { %429 = vmatpush1.bf16.msra.mxu0 %v1651_v19  ;;  %v1706_v56 = vld [vmem:[%s2427_s8 + $0x40] ss:$8 sps:$4 sm:$0xff]   ;;  %v1687_v59 = vld [vmem:[%s2427_s8 + $0x104] ss:$8 sps:$4 sm:$0xff]   ;;  %v1712_v60 = vld [vmem:[%s2427_s8 + $0x50] ss:$8 sps:$4 sm:$0xff]  }
  0x12   :  { %388 = vmatpush1.bf16.msra.mxu1 %v1646_v18  ;;  %430 = vmatprep.subr.bf16.mxu0 %v1655_v21  ;;  %v1679_v58 = vld [vmem:[%s2426_s5 + $0x100] ss:$24 sps:$4 sm:$0xff]   ;;  %v1720_v61 = vld [vmem:[%s2427_s8 + $0x64] ss:$8 sps:$4 sm:$0xff]   ;;  %v1693_v63 = vld [vmem:[%s2427_s8 + $0x114] ss:$8 sps:$4 sm:$0xff]  }
  0x13   :  { %389 = vmatprep.subr.bf16.mxu1 %v1654_v20  ;;  %v1685_v62 = vld [vmem:[%s2427_s8 + $0x100] ss:$8 sps:$4 sm:$0xff]   ;;  %v1726_v1 = vld [vmem:[%s2427_s8 + $0x74] ss:$8 sps:$4 sm:$0xff]   ;;  %v1691_v2 = vld [vmem:[%s2427_s8 + $0x110] ss:$8 sps:$4 sm:$0xff]  }
  0x14   :  { %v1718_v0 = vld [vmem:[%s2427_s8 + $0x60] ss:$8 sps:$4 sm:$0xff]   ;;  %v1699_v3 = vld [vmem:[%s2427_s8 + $0x124] ss:$8 sps:$4 sm:$0xff]   ;;  %v1724_v4 = vld [vmem:[%s2427_s8 + $0x70] ss:$8 sps:$4 sm:$0xff]  }
  0x15   :  { %431 = vmatpush1.bf16.msra.mxu0 %v1657_v23  ;;  %v1732_v5 = vld [vmem:[%s2427_s8 + $0x84] ss:$8 sps:$4 sm:$0xff]   ;;  %v1697_v6 = vld [vmem:[%s2427_s8 + $0x120] ss:$8 sps:$4 sm:$0xff]   ;;  %v1705_v7 = vld [vmem:[%s2427_s8 + $0x134] ss:$8 sps:$4 sm:$0xff]  }
  0x16   :  { %390 = vmatpush1.bf16.msra.mxu1 %v1652_v22  ;;  %432 = vmatprep.subr.bf16.mxu0 %v1661_v26  ;;  %v1730_v8 = vld [vmem:[%s2427_s8 + $0x80] ss:$8 sps:$4 sm:$0xff]   ;;  %v1738_v9 = vld [vmem:[%s2427_s8 + $0x94] ss:$8 sps:$4 sm:$0xff]   ;;  %v1703_v10 = vld [vmem:[%s2427_s8 + $0x130] ss:$8 sps:$4 sm:$0xff]  }
  0x17   :  { %391 = vmatprep.subr.bf16.mxu1 %v1660_v24  ;;  %v1711_v11 = vld [vmem:[%s2427_s8 + $0x144] ss:$8 sps:$4 sm:$0xff]   ;;  %v1736_v12 = vld [vmem:[%s2427_s8 + $0x90] ss:$8 sps:$4 sm:$0xff]   ;;  %v1709_v14 = vld [vmem:[%s2427_s8 + $0x140] ss:$8 sps:$4 sm:$0xff]  }
  0x18   :  { %v1744_v13 = vld [vmem:[%s2427_s8 + $0xa4] ss:$8 sps:$4 sm:$0xff]   ;;  %v1717_v15 = vld [vmem:[%s2427_s8 + $0x154] ss:$8 sps:$4 sm:$0xff]   ;;  %v1742_v16 = vld [vmem:[%s2427_s8 + $0xa0] ss:$8 sps:$4 sm:$0xff]  }
  0x19   :  { %433 = vmatpush1.bf16.msra.mxu0 %v1663_v27  ;;  %v1750_v17 = vld [vmem:[%s2427_s8 + $0xb4] ss:$8 sps:$4 sm:$0xff]   ;;  %v1715_v18 = vld [vmem:[%s2427_s8 + $0x150] ss:$8 sps:$4 sm:$0xff]   ;;  %v1723_v19 = vld [vmem:[%s2427_s8 + $0x164] ss:$8 sps:$4 sm:$0xff]  }
  0x1a   :  { %392 = vmatpush1.bf16.msra.mxu1 %v1658_v25  ;;  %1109 = vmatprep.subr.bf16.mxu0 %v1684_v30  ;;  %v1748_v20 = vld [vmem:[%s2427_s8 + $0xb0] ss:$8 sps:$4 sm:$0xff]   ;;  %v1756_v21 = vld [vmem:[%s2427_s8 + $0xc4] ss:$8 sps:$4 sm:$0xff]   ;;  %v1721_v22 = vld [vmem:[%s2427_s8 + $0x160] ss:$8 sps:$4 sm:$0xff]  }
  0x1b   :  { %463 = vmatprep.subr.bf16.mxu1 %v1666_v28  ;;  %v1729_v23 = vld [vmem:[%s2427_s8 + $0x174] ss:$8 sps:$4 sm:$0xff]   ;;  %v1754_v24 = vld [vmem:[%s2427_s8 + $0xc0] ss:$8 sps:$4 sm:$0xff]   ;;  %v1727_v26 = vld [vmem:[%s2427_s8 + $0x170] ss:$8 sps:$4 sm:$0xff]  }
  0x1c   :  { %v1762_v25 = vld [vmem:[%s2427_s8 + $0xd4] ss:$8 sps:$4 sm:$0xff]   ;;  %v1735_v27 = vld [vmem:[%s2427_s8 + $0x184] ss:$8 sps:$4 sm:$0xff]   ;;  %v1760_v28 = vld [vmem:[%s2427_s8 + $0xd0] ss:$8 sps:$4 sm:$0xff]  }
  0x1d   :  { %v1733_v30 = vld [vmem:[%s2427_s8 + $0x180] ss:$8 sps:$4 sm:$0xff]   ;;  %vm59_vm3 = vcmask 1041408   ;;  %vm1431_vm4 = vcmask 1024  }
  0xd8   :  { %v122_v32 = vpop.f32.mrb[0].mxu1 }
  0xd9   :  { %v123_v33 = vadd.f32 %v1437_v31, %v122_v32  ;;  %v1621_v34 = vpop.f32.mrb[1].mxu1  ;;  %v1741_v31 = vld [vmem:[%s2427_s8 + $0x194] ss:$8 sps:$4 sm:$0xff]   ;;  %v1766_v32 = vld [vmem:[%s2427_s8 + $0xe0] ss:$8 sps:$4 sm:$0xff]  }
  0xda   :  { %v125_v35 = vpop.f32.mrb[2].mxu1  ;;  %v1747_v34 = vld [vmem:[%s2427_s8 + $0x1a4] ss:$8 sps:$4 sm:$0xff]  }
  0xdb   :  { %v128_v37 = vpack.c.bf16 %v123_v33, %v123_v33  ;;  %v1622_v38 = vpop.f32.mrb[3].mxu1  ;;  %v1739_v33 = vld [vmem:[%s2427_s8 + $0x190] ss:$8 sps:$4 sm:$0xff]   ;;  %v1745_v35 = vld [vmem:[%s2427_s8 + $0x1a0] ss:$8 sps:$4 sm:$0xff]  }
  0xdc   :  { %v1759_v38 = vld [vmem:[%s2427_s8 + $0x1c4] ss:$8 sps:$4 sm:$0xff]  }
  0xdd   :  { %1476 = vmatmul.mubr.msk.bf16.vlgmr.msra.gmra.mrb[4].mxu1 %vm377_vm2, %v128_v37  ;;  %1477 = vmatmul.mubr.msk.bf16.vlgmr.msra.gmra.mrb[0].mxu0 %vm377_vm2, %v128_v37 }
  0xde   :  { %464 = vmatpush1.bf16.msra.mxu1 %v1664_v36  ;;  %495 = vmatprep.mubr.bf16.mxu1 %v1848_v29  ;;  %v1768_v29 = vld [vmem:[%s2427_s8 + $0xe4] ss:$8 sps:$4 sm:$0xff]   ;;  %v1753_v36 = vld [vmem:[%s2427_s8 + $0x1b4] ss:$8 sps:$4 sm:$0xff]  }
  0xdf   :  { %465 = vmatprep.subr.bf16.mxu1 %v1669_v39  ;;  %1110 = vmatpush1.bf16.msra.mxu0 %v1682_v40  ;;  %v1757_v39 = vld [vmem:[%s2427_s8 + $0x1c0] ss:$8 sps:$4 sm:$0xff]   ;;  %v1765_v40 = vld [vmem:[%s2427_s8 + $0x1d4] ss:$8 sps:$4 sm:$0xff]  }
  0xe0   :  { %1111 = vmatprep.subr.bf16.mxu0 %v1690_v41  ;;  %v1763_v41 = vld [vmem:[%s2427_s8 + $0x1d0] ss:$8 sps:$4 sm:$0xff]  }
  0xe2   :  { %466 = vmatpush1.bf16.msra.mxu1 %v1667_v42  ;;  %v1771_v42 = vld [vmem:[%s2427_s8 + $0x1e4] ss:$8 sps:$4 sm:$0xff]  }
  0xe3   :  { %467 = vmatprep.subr.bf16.mxu1 %v1672_v43  ;;  %1112 = vmatpush1.bf16.msra.mxu0 %v1688_v44  ;;  %v1769_v43 = vld [vmem:[%s2427_s8 + $0x1e0] ss:$8 sps:$4 sm:$0xff]   ;;  %v1774_v44 = vld [vmem:[%s2427_s8 + $0xf4] ss:$8 sps:$4 sm:$0xff]  }
  0xe4   :  { %1113 = vmatprep.subr.bf16.mxu0 %v1696_v45  ;;  %v1772_v45 = vld [vmem:[%s2427_s8 + $0xf0] ss:$8 sps:$4 sm:$0xff]  }
  0xe6   :  { %468 = vmatpush1.bf16.msra.mxu1 %v1670_v46  ;;  %v1777_v46 = vld [vmem:[%s2427_s8 + $0x1f4] ss:$8 sps:$4 sm:$0xff]  }
  0xe7   :  { %469 = vmatprep.subr.bf16.mxu1 %v1675_v47  ;;  %1114 = vmatpush1.bf16.msra.mxu0 %v1694_v48  ;;  %v1775_v47 = vld [vmem:[%s2427_s8 + $0x1f0] ss:$8 sps:$4 sm:$0xff]   ;;  %v1780_v48 = vld [vmem:[%s2427_s8 + $0x204] ss:$8 sps:$4 sm:$0xff]  }
  0xe8   :  { %1115 = vmatprep.subr.bf16.mxu0 %v1702_v49  ;;  %v52_v49 = vlaneseq }
  0xea   :  { %470 = vmatpush1.bf16.msra.mxu1 %v1673_v50  ;;  %v1849_v50 = vmov 1983009808  }
  0xeb   :  { %471 = vmatprep.subr.bf16.mxu1 %v1678_v51  ;;  %1116 = vmatpush1.bf16.msra.mxu0 %v1700_v52  ;;  %v50_v51 = vunpack.c.l.s4 %v1849_v50  ;;  %v44_v52 = vld [vmem:[%s2429_s0] sm:$0xf]  ;;  %v1807_v50 = vld [vmem:[%s2427_s8 + $0x294] ss:$8 sps:$4 sm:$0xff]  }
  0xec   :  { %1117 = vmatprep.subr.bf16.mxu0 %v1708_v53  ;;  %v45_v53 = vld [vmem:[%s2430_s1] sm:$0xf] }
  0xee   :  { %472 = vmatpush1.bf16.msra.mxu1 %v1676_v54  ;;  %v2236_v54 = vshrl.u32 %v52_v49, 7  ;;  %v1802_v49 = vld [vmem:[%s2427_s8 + $0x280] ss:$8 sps:$4 sm:$0xff]  }
  0xef   :  { %473 = vmatprep.subr.bf16.mxu1 %v1681_v55  ;;  %1118 = vmatpush1.bf16.msra.mxu0 %v1706_v56  ;;  %v46_v55 = vsub.f32 %v44_v52, %v45_v53  ;;  %v51_v56 = vunpack.c.0.s8 %v50_v51  ;;  %v1805_v51 = vld [vmem:[%s2427_s8 + $0x290] ss:$8 sps:$4 sm:$0xff]   ;;  %v1810_v52 = vld [vmem:[%s2427_s8 + $0x2a4] ss:$8 sps:$4 sm:$0xff]   ;;  %v1808_v53 = vld [vmem:[%s2427_s8 + $0x2a0] ss:$8 sps:$4 sm:$0xff]  }
  0xf0   :  { %1119 = vmatprep.subr.bf16.mxu0 %v1714_v57 }
  0xf1   :  { %v47_v57 = vmul.f32 %v46_v55, %v46_v55  ;;  %v1813_v55 = vld [vmem:[%s2427_s8 + $0x2b4] ss:$8 sps:$4 sm:$0xff]  }
  0xf2   :  { %474 = vmatpush1.bf16.msra.mxu1 %v1679_v58  ;;  %v54_v58 = vsub.s32 %v51_v56, %v2236_v54  ;;  %v1811_v56 = vld [vmem:[%s2427_s8 + $0x2b0] ss:$8 sps:$4 sm:$0xff]  }
  0xf3   :  { %1150 = vmatprep.subr.bf16.mxu1 %v1687_v59  ;;  %1120 = vmatpush1.bf16.msra.mxu0 %v1712_v60 }
  0xf4   :  { %1121 = vmatprep.subr.bf16.mxu0 %v1720_v61  ;;  %v55_v59 = vrot.slane %v47_v57, %v54_v58  ;;  %v1816_v57 = vld [vmem:[%s2427_s8 + $0x2c4] ss:$8 sps:$4 sm:$0xff]   ;;  %v1814_v58 = vld [vmem:[%s2427_s8 + $0x2c0] ss:$8 sps:$4 sm:$0xff]  }
  0xf5   :  { %1478 = vmatmul.mubr.msk.bf16.vlgmr.msra.gmra.mrb[8].mxu1 %vm377_vm2, %v128_v37  ;;  %v1751_v37 = vld [vmem:[%s2427_s8 + $0x1b0] ss:$8 sps:$4 sm:$0xff]  }
  0xf6   :  { %1151 = vmatpush1.bf16.msra.mxu1 %v1685_v62  ;;  %v56_v60 = vcombine.high %v55_v59, %v55_v59  ;;  %v60_v61 = vsel %vm59_vm3, %v55_v59, 0.0  ;;  %v1819_v59 = vld [vmem:[%s2427_s8 + $0x2d4] ss:$8 sps:$4 sm:$0xff]  }
  0xf7   :  { %1152 = vmatprep.subr.bf16.mxu1 %v1693_v63  ;;  %1122 = vmatpush1.bf16.msra.mxu0 %v1718_v0  ;;  %v2240_v0 = vsub.s32 0, %v2236_v54 }
  0xf8   :  { %1123 = vmatprep.subr.bf16.mxu0 %v1726_v1  ;;  %v61_v62 = vsel %vm59_vm3, %v56_v60, 0.0  ;;  %v177_v1 = vsub.s32 2, %v2236_v54  ;;  %v1817_v60 = vld [vmem:[%s2427_s8 + $0x2d0] ss:$8 sps:$4 sm:$0xff]  }
  0xf9   :  { %v62_v63 = vadd.f32 %v61_v62, %v60_v61  ;;  %v185_v61 = vsub.s32 4, %v2236_v54  ;;  %v1822_v62 = vld [vmem:[%s2427_s8 + $0x2e4] ss:$8 sps:$4 sm:$0xff]  }
  0xfa   :  { %1153 = vmatpush1.bf16.msra.mxu1 %v1691_v2  ;;  %v2246_v2 = vld [vmem:[%s2431_s6] sm:$0x3f] }
  0xfb   :  { %1154 = vmatprep.subr.bf16.mxu1 %v1699_v3  ;;  %1124 = vmatpush1.bf16.msra.mxu0 %v1724_v4  ;;  %v173_v3 = vsub.s32 1, %v2236_v54  ;;  %v181_v4 = vsub.s32 3, %v2236_v54 }
  0xfc   :  { %1125 = vmatprep.subr.bf16.mxu0 %v1732_v5  ;;  %63 = vadd.xlane.f32.xlu0 %v62_v63  ;;  %v170_v5 = vrot.slane %v2246_v2, %v2240_v0  ;;  %v1820_v63 = vld [vmem:[%s2427_s8 + $0x2e0] ss:$8 sps:$4 sm:$0xff]  }
  0xfe   :  { %1155 = vmatpush1.bf16.msra.mxu1 %v1697_v6  ;;  %v178_v6 = vrot.slane %v2246_v2, %v177_v1 }
  0xff   :  { %1156 = vmatprep.subr.bf16.mxu1 %v1705_v7  ;;  %1126 = vmatpush1.bf16.msra.mxu0 %v1730_v8  ;;  %v174_v7 = vrot.slane %v2246_v2, %v173_v3  ;;  %v182_v8 = vrot.slane %v2246_v2, %v181_v4  ;;  %v186_v4 = vrot.slane %v2246_v2, %v185_v61 }
 0x100   :  { %1127 = vmatprep.subr.bf16.mxu0 %v1738_v9 }
 0x102   :  { %1157 = vmatpush1.bf16.msra.mxu1 %v1703_v10 }
 0x103   :  { %1158 = vmatprep.subr.bf16.mxu1 %v1711_v11  ;;  %1128 = vmatpush1.bf16.msra.mxu0 %v1736_v12 }
 0x104   :  { %1129 = vmatprep.subr.bf16.mxu0 %v1744_v13 }
 0x106   :  { %1159 = vmatpush1.bf16.msra.mxu1 %v1709_v14 }
 0x107   :  { %1160 = vmatprep.subr.bf16.mxu1 %v1717_v15  ;;  %1130 = vmatpush1.bf16.msra.mxu0 %v1742_v16 }
 0x108   :  { %1131 = vmatprep.subr.bf16.mxu0 %v1750_v17 }
 0x10a   :  { %1161 = vmatpush1.bf16.msra.mxu1 %v1715_v18 }
 0x10b   :  { %1162 = vmatprep.subr.bf16.mxu1 %v1723_v19  ;;  %1132 = vmatpush1.bf16.msra.mxu0 %v1748_v20 }
 0x10c   :  { %1133 = vmatprep.subr.bf16.mxu0 %v1756_v21 }
 0x10e   :  { %1163 = vmatpush1.bf16.msra.mxu1 %v1721_v22 }
 0x10f   :  { %1164 = vmatprep.subr.bf16.mxu1 %v1729_v23  ;;  %1134 = vmatpush1.bf16.msra.mxu0 %v1754_v24  ;;  %v1778_v23 = vld [vmem:[%s2427_s8 + $0x200] ss:$8 sps:$4 sm:$0xff]  }
 0x110   :  { %1135 = vmatprep.subr.bf16.mxu0 %v1762_v25 }
 0x112   :  { %1165 = vmatpush1.bf16.msra.mxu1 %v1727_v26  ;;  %v1783_v26 = vld [vmem:[%s2427_s8 + $0x214] ss:$8 sps:$4 sm:$0xff]  }
 0x113   :  { %1166 = vmatprep.subr.bf16.mxu1 %v1735_v27  ;;  %1136 = vmatpush1.bf16.msra.mxu0 %v1760_v28  ;;  %v1781_v27 = vld [vmem:[%s2427_s8 + $0x210] ss:$8 sps:$4 sm:$0xff]   ;;  %v1786_v28 = vld [vmem:[%s2427_s8 + $0x224] ss:$8 sps:$4 sm:$0xff]  }
 0x114   :  { %1137 = vmatprep.subr.bf16.mxu0 %v1768_v29  ;;  %v1784_v29 = vld [vmem:[%s2427_s8 + $0x220] ss:$8 sps:$4 sm:$0xff]  }
 0x116   :  { %1167 = vmatpush1.bf16.msra.mxu1 %v1733_v30  ;;  %v1789_v30 = vld [vmem:[%s2427_s8 + $0x234] ss:$8 sps:$4 sm:$0xff]  }
 0x117   :  { %1168 = vmatprep.subr.bf16.mxu1 %v1741_v31  ;;  %1138 = vmatpush1.bf16.msra.mxu0 %v1766_v32  ;;  %v1787_v31 = vld [vmem:[%s2427_s8 + $0x230] ss:$8 sps:$4 sm:$0xff]   ;;  %v1792_v32 = vld [vmem:[%s2427_s8 + $0x244] ss:$8 sps:$4 sm:$0xff]  }
 0x118   :  { %1139 = vmatprep.subr.bf16.mxu0 %v1774_v44 }
 0x11a   :  { %1169 = vmatpush1.bf16.msra.mxu1 %v1739_v33  ;;  %v189_v33 = vsub.s32 5, %v2236_v54 }
 0x11b   :  { %1170 = vmatprep.subr.bf16.mxu1 %v1747_v34  ;;  %1140 = vmatpush1.bf16.msra.mxu0 %v1772_v45  ;;  %v1790_v34 = vld [vmem:[%s2427_s8 + $0x240] ss:$8 sps:$4 sm:$0xff]  }
 0x11c   :  { %1191 = vmatprep.subr.bf16.mxu0 %v1780_v48  ;;  %v1796_v45 = vld [vmem:[%s2427_s8 + $0x260] ss:$8 sps:$4 sm:$0xff]   ;;  %v1804_v48 = vld [vmem:[%s2427_s8 + $0x284] ss:$8 sps:$4 sm:$0xff]  }
 0x11e   :  { %1171 = vmatpush1.bf16.msra.mxu1 %v1745_v35  ;;  %v1795_v35 = vld [vmem:[%s2427_s8 + $0x254] ss:$8 sps:$4 sm:$0xff]  }
 0x11f   :  { %1172 = vmatprep.subr.bf16.mxu1 %v1753_v36  ;;  %v190_v36 = vrot.slane %v2246_v2, %v189_v33  ;;  %v1827_v2 = vld [vmem:[%s2432_s10] sm:$0xff]  }
 0x122   :  { %1173 = vmatpush1.bf16.msra.mxu1 %v1751_v37 }
 0x123   :  { %1174 = vmatprep.subr.bf16.mxu1 %v1759_v38  ;;  %v1793_v38 = vld [vmem:[%s2427_s8 + $0x250] ss:$8 sps:$4 sm:$0xff]  }
 0x126   :  { %1175 = vmatpush1.bf16.msra.mxu1 %v1757_v39 }
 0x127   :  { %1176 = vmatprep.subr.bf16.mxu1 %v1765_v40  ;;  %v1798_v40 = vld [vmem:[%s2427_s8 + $0x264] ss:$8 sps:$4 sm:$0xff]  }
 0x12a   :  { %1177 = vmatpush1.bf16.msra.mxu1 %v1763_v41 }
 0x12b   :  { %1178 = vmatprep.subr.bf16.mxu1 %v1771_v42 }
 0x12e   :  { %1179 = vmatpush1.bf16.msra.mxu1 %v1769_v43 }
 0x12f   :  { %1180 = vmatprep.subr.bf16.mxu1 %v1777_v46  ;;  %v1801_v46 = vld [vmem:[%s2427_s8 + $0x274] ss:$8 sps:$4 sm:$0xff]  }
 0x132   :  { %1181 = vmatpush1.bf16.msra.mxu1 %v1775_v47  ;;  %v1799_v47 = vld [vmem:[%s2427_s8 + $0x270] ss:$8 sps:$4 sm:$0xff]  }
 0x1b0   :  { %v415_v9 = vpop.f32.mrb[4].mxu1  ;;  %v456_v10 = vpop.f32.mrb[0].mxu0 }
 0x1b1   :  { %v416_v11 = vadd.f32 %v415_v9, %v170_v5  ;;  %v457_v12 = vadd.f32 %v456_v10, %v178_v6  ;;  %v417_v13 = vpop.f32.mrb[5].mxu1  ;;  %v458_v14 = vpop.f32.mrb[1].mxu0  ;;  %v1825_v5 = vld [vmem:[%s2427_s8 + $0x2f4] ss:$8 sps:$4 sm:$0xff]   ;;  %v1823_v6 = vld [vmem:[%s2427_s8 + $0x2f0] ss:$8 sps:$4 sm:$0xff]  }
 0x1b2   :  { %v418_v15 = vadd.f32 %v417_v13, %v174_v7  ;;  %v459_v16 = vadd.f32 %v458_v14, %v182_v8  ;;  %v419_v17 = vpop.f32.mrb[6].mxu1  ;;  %v460_v18 = vpop.f32.mrb[2].mxu0  ;;  %v1826_v9 = vld [vmem:[%s2432_s10 + $0x40] sm:$0xff]   ;;  %v1828_v10 = vld [vmem:[%s2432_s10 + $0x48] sm:$0xff]   ;;  %v1831_v13 = vld [vmem:[%s2432_s10 + $0x10] sm:$0xff]  }
 0x1b3   :  { %v420_v19 = vpop.f32.mrb[7].mxu1  ;;  %v461_v20 = vpop.f32.mrb[3].mxu0  ;;  %v504_v24 = vpack.c.bf16 %v416_v11, %v416_v11  ;;  %v506_v25 = vpack.c.bf16 %v457_v12, %v457_v12  ;;  %1595 = vmatprep.subr.bf16.mxu1 %v1826_v9  ;;  %v1829_v11 = vld [vmem:[%s2432_s10 + $0x8] sm:$0xff]   ;;  %v1830_v12 = vld [vmem:[%s2432_s10 + $0x50] sm:$0xff]   ;;  %v1832_v14 = vld [vmem:[%s2432_s10 + $0x58] sm:$0xff]  }
 0x1b4   :  { %v505_v21 = vpack.c.bf16 %v418_v15, %v418_v15  ;;  %v507_v22 = vpack.c.bf16 %v459_v16, %v459_v16  ;;  %v1833_v15 = vld [vmem:[%s2432_s10 + $0x18] sm:$0xff]   ;;  %v1834_v16 = vld [vmem:[%s2432_s10 + $0x60] sm:$0xff]   ;;  %v1836_v18 = vld [vmem:[%s2432_s10 + $0x68] sm:$0xff]  }
 0x1b5   :  { %v1835_v17 = vld [vmem:[%s2432_s10 + $0x20] sm:$0xff]   ;;  %v1837_v19 = vld [vmem:[%s2432_s10 + $0x28] sm:$0xff]   ;;  %v1838_v20 = vld [vmem:[%s2432_s10 + $0x70] sm:$0xff]  }
 0x1b6   :  { %1141 = vmatprep.mubr.bf16.mxu0 %v505_v21  ;;  %1182 = vmatprep.mubr.bf16.mxu1 %v507_v22  ;;  %v1839_v21 = vld [vmem:[%s2432_s10 + $0x30] sm:$0xff]   ;;  %v1840_v22 = vld [vmem:[%s2432_s10 + $0x78] sm:$0xff]  }
 0x1b7   :  { %1142 = vmatmul.mubr.bf16.vlgmr.msra.gmra.mrb[4].mxu0 %v504_v24  ;;  %1183 = vmatmul.mubr.bf16.vlgmr.msra.gmra.mrb[12].mxu1 %v506_v25  ;;  %v606_v24 = vld [vmem:[%s2433_s7] sm:$0x3] }
 0x1b8   :  { %1192 = vmatpush1.bf16.msra.mxu0 %v1778_v23  ;;  %1596 = vmatpush3.bf16.msra.mxu1 %v1827_v2  ;;  %v1841_v23 = vld [vmem:[%s2432_s10 + $0x38] sm:$0xff]   ;;  %v607_v25 = vunpack.c.l.bf16 %v606_v24 }
 0x1b9   :  { %1193 = vmatprep.subr.bf16.mxu0 %v1783_v26  ;;  %1597 = vmatprep.subr.bf16.mxu1 %v1828_v10 }
 0x1ba   :  { %v612_v26 = vrot.slane %v607_v25, %v2240_v0 }
 0x1bc   :  { %1194 = vmatpush1.bf16.msra.mxu0 %v1781_v27  ;;  %1598 = vmatpush3.bf16.msra.mxu1 %v1829_v11  ;;  %v64_v27 = vpop.xlane.xlu0 %63 }
 0x1bd   :  { %1195 = vmatprep.subr.bf16.mxu0 %v1786_v28  ;;  %1599 = vmatprep.subr.bf16.mxu1 %v1830_v12  ;;  %v616_v28 = vrot.slane %v607_v25, %v177_v1  ;;  %v1232_v1 = vld [vmem:[%s2434_s9] sm:$0x3] }
 0x1c0   :  { %1196 = vmatpush1.bf16.msra.mxu0 %v1784_v29  ;;  %1600 = vmatpush3.bf16.msra.mxu1 %v1831_v13  ;;  %v66_v29 = vmul.f32 0.00390625, %v64_v27 }
 0x1c1   :  { %1197 = vmatprep.subr.bf16.mxu0 %v1789_v30  ;;  %1601 = vmatprep.subr.bf16.mxu1 %v1832_v14  ;;  %v622_v30 = vrot.slane %v612_v26, %v2240_v0 }
 0x1c4   :  { %1198 = vmatpush1.bf16.msra.mxu0 %v1787_v31  ;;  %1602 = vmatpush3.bf16.msra.mxu1 %v1833_v15  ;;  %v626_v31 = vrot.slane %v616_v28, %v2240_v0 }
 0x1c5   :  { %1199 = vmatprep.subr.bf16.mxu0 %v1792_v32  ;;  %1603 = vmatprep.subr.bf16.mxu1 %v1834_v16  ;;  %v627_v32 = vmul.f32 %v622_v30, %v66_v29 }
 0x1c6   :  { %v628_v33 = vmul.f32 %v626_v31, %v66_v29 }
 0x1c8   :  { %v497_v37 = vpop.f32.mrb[8].mxu1  ;;  %1200 = vmatpush1.bf16.msra.mxu0 %v1790_v34  ;;  %1604 = vmatpush3.bf16.msra.mxu1 %v1835_v17 }
 0x1c9   :  { %v499_v39 = vpop.f32.mrb[9].mxu1  ;;  %1201 = vmatprep.subr.bf16.mxu0 %v1795_v35  ;;  %v498_v7 = vadd.f32 %v497_v37, %v186_v4  ;;  %1605 = vmatprep.subr.bf16.mxu1 %v1836_v18 }
 0x1ca   :  { %v500_v41 = vadd.f32 %v499_v39, %v190_v36  ;;  %v501_v42 = vpop.f32.mrb[10].mxu1 }
 0x1cb   :  { %v502_v43 = vpop.f32.mrb[11].mxu1  ;;  %v508_v8 = vpack.c.bf16 %v498_v7, %v498_v7 }
 0x1cc   :  { %v509_v44 = vpack.c.bf16 %v500_v41, %v500_v41  ;;  %1202 = vmatpush1.bf16.msra.mxu0 %v1793_v38  ;;  %1606 = vmatpush3.bf16.msra.mxu1 %v1837_v19 }
 0x1cd   :  { %1203 = vmatprep.subr.bf16.mxu0 %v1798_v40  ;;  %1607 = vmatprep.subr.bf16.mxu1 %v1838_v20 }
 0x1ce   :  { %1223 = vmatprep.mubr.bf16.mxu0 %v509_v44 }
 0x1d0   :  { %1204 = vmatpush1.bf16.msra.mxu0 %v1796_v45  ;;  %1608 = vmatpush3.bf16.msra.mxu1 %v1839_v21 }
 0x1d1   :  { %1205 = vmatprep.subr.bf16.mxu0 %v1801_v46  ;;  %1609 = vmatprep.subr.bf16.mxu1 %v1840_v22  ;;  %v1237_v46 = vrot.slane %v1232_v1, %v2240_v0  ;;  %v17_v0 = vstv %s2435_s11 }
 0x1d2   :  { %18 = vst [vmem:[#allocation2] sm:$0x1] %v17_v0 }
 0x1d4   :  { %1206 = vmatpush1.bf16.msra.mxu0 %v1799_v47  ;;  %1610 = vmatpush3.bf16.msra.mxu1 %v1841_v23 }
 0x1d5   :  { %1207 = vmatprep.subr.bf16.mxu0 %v1804_v48  ;;  %v1241_v48 = vrot.slane %v1232_v1, %v173_v3 }
 0x1d8   :  { %1208 = vmatpush1.bf16.msra.mxu0 %v1802_v49 }
 0x1d9   :  { %1209 = vmatprep.subr.bf16.mxu0 %v1807_v50  ;;  %v1575_v3 = vld [vmem:[#allocation2] ss:$0 sm:$0xff] }
 0x1dc   :  { %1210 = vmatpush1.bf16.msra.mxu0 %v1805_v51 }
 0x1dd   :  { %1211 = vmatprep.subr.bf16.mxu0 %v1810_v52 }
 0x1e0   :  { %1212 = vmatpush1.bf16.msra.mxu0 %v1808_v53 }
 0x1e1   :  { %1213 = vmatprep.subr.bf16.mxu0 %v1813_v55 }
 0x1e4   :  { %1214 = vmatpush1.bf16.msra.mxu0 %v1811_v56 }
 0x1e5   :  { %1215 = vmatprep.subr.bf16.mxu0 %v1816_v57 }
 0x1e8   :  { %1216 = vmatpush1.bf16.msra.mxu0 %v1814_v58 }
 0x1e9   :  { %1217 = vmatprep.subr.bf16.mxu0 %v1819_v59 }
 0x1ec   :  { %1218 = vmatpush1.bf16.msra.mxu0 %v1817_v60 }
 0x1ed   :  { %1219 = vmatprep.subr.bf16.mxu0 %v1822_v62 }
 0x1f0   :  { %1220 = vmatpush1.bf16.msra.mxu0 %v1820_v63 }
 0x1f1   :  { %1221 = vmatprep.subr.bf16.mxu0 %v1825_v5 }
 0x1f4   :  { %1222 = vmatpush1.bf16.msra.mxu0 %v1823_v6 }
 0x1f7   :  { %1224 = vmatmul.mubr.bf16.vlgmr.msra.gmra.mrb[8].mxu0 %v508_v8 }
 0x28a   :  { %v1143_v34 = vpop.f32.mrb[4].mxu0  ;;  %v1184_v35 = vpop.f32.mrb[12].mxu1 }
 0x28b   :  { %v1144_v36 = vadd.f32 %v1143_v34, %v627_v32  ;;  %v1145_v37 = vpop.f32.mrb[5].mxu0  ;;  %v1186_v38 = vpop.f32.mrb[13].mxu1 }
 0x28c   :  { %v1146_v39 = vadd.f32 %v1145_v37, %v628_v33  ;;  %v1147_v40 = vpop.f32.mrb[6].mxu0  ;;  %v1188_v41 = vpop.f32.mrb[14].mxu1 }
 0x28d   :  { %v1185_v42 = vadd.f32 %v1184_v35, %v1144_v36  ;;  %v1148_v43 = vpop.f32.mrb[7].mxu0  ;;  %v1189_v44 = vpop.f32.mrb[15].mxu1 }
 0x28e   :  { %v1187_v45 = vadd.f32 %v1186_v38, %v1146_v39 }
 0x2ca   :  { %v1225_v47 = vpop.f32.mrb[8].mxu0 }
 0x2cb   :  { %v1226_v49 = vadd.f32 %v1225_v47, %v1185_v42  ;;  %v1227_v50 = vpop.f32.mrb[9].mxu0 }
 0x2cc   :  { %v1228_v51 = vadd.f32 %v1227_v50, %v1187_v45  ;;  %v1229_v52 = vpop.f32.mrb[10].mxu0 }
 0x2cd   :  { %v1244_v53 = vadd.f32 %v1237_v46, %v1226_v49  ;;  %v1230_v55 = vpop.f32.mrb[11].mxu0 }
 0x2ce   :  { %v1245_v56 = vadd.f32 %v1241_v48, %v1228_v51 }
 0x2cf   :  { %v1246_v57 = vmax.f32 %v1244_v53, 0.0 }
 0x2d0   :  { %v1247_v58 = vmax.f32 %v1245_v56, 0.0 }
 0x2d1   :  { %v1248_v60 = vpack.c.bf16 %v1246_v57, %v1246_v57 }
 0x2d2   :  { %v1249_v59 = vpack.c.bf16 %v1247_v58, %v1247_v58 }
 0x2d4   :  { %1417 = vmatprep.mubr.bf16.mxu1 %v1249_v59 }
 0x2d5   :  { %1418 = vmatmul.mubr.bf16.vlgmr.msra.gmra.mrb[16].mxu1 %v1248_v60 }
 0x3a8   :  { %v1611_v54 = vpop.f32.mrb[16].mxu1 }
 0x3a9   :  { %v1612_v61 = vpop.f32.mrb[17].mxu1 }
 0x3aa   :  { %v1613_v62 = vadd.f32 %v1612_v61, %v1611_v54  ;;  %v1614_v63 = vpop.f32.mrb[18].mxu1 }
 0x3ab   :  { %v1615_v4 = vpop.f32.mrb[19].mxu1 }
 0x3ac   :  { %v1420_v5 = vadd.f32 %v1613_v62, %v1575_v3 }
 0x3ae   :  { %v1592_v6 = vmul.f32 -1.442695, %v1420_v5 }
 0x3b0   :  { %1842 = vpow2.f32 %v1592_v6 }
 0x3ba   :  { %v1843_v7 = vpop.eup %1842 }
 0x3bb   :  { %v1428_v8 = vadd.f32 1.0, %v1843_v7 }
 0x3bd   :  { %1844 = vrcp.f32 %v1428_v8 }
 0x3c7   :  { %v1845_v9 = vpop.eup %1844 }
 0x3c8   :  { %1432 = vst.msk [vmem:[%s2436_s12] sm:$0x3] %vm1431_vm4, %v1845_v9 }

</bundles_post_ra>
